<compile_context>
chip_gen: v7x
topology: tpu7x:2x2x1
jax: 0.10.0
libtpu: 0.0.40
codegen_flags: <defaults>
</compile_context>

<pallas_src>
import functools
import math

import jax
import jax.numpy as jnp
from jax.experimental import pallas as pl
from jax.experimental.pallas import tpu as pltpu


def _rup(v, m):
    return -(-v // m) * m


def _vmem_budget():
    """(per-step working-set budget, vmem_limit_bytes) derived from the chip's VMEM."""
    try:
        cap = int(pltpu.get_tpu_info().vmem_capacity_bytes)
    except Exception:
        cap = 128 * 1024 * 1024            # v5e/v6e physical; v7x reports 64 MiB
    budget = max(8 << 20, min(cap // 3, 48 << 20))
    limit = max(32 << 20, min(int(cap * 3 // 4), 112 << 20))
    return budget, limit


def _pick_batch_block(n, s_out, est, budget):
    """Largest divisor-of-n batch block whose per-step VMEM footprint fits the budget
    and whose output block keeps the sublane dim 8-aligned; prefers >= 2 grid steps so
    both of v7x's TensorCores get work.
    TODO(synk): allow non-divisor blocks (pad batch + mask the BN partial sums) so
    awkward batch sizes don't collapse to tiny blocks."""
    cands = [d for d in range(1, n + 1)
             if n % d == 0 and (d == n or (d * s_out) % 8 == 0)]
    feas = [d for d in cands if est(d) <= budget] or [min(cands)]
    multi = [d for d in feas if 2 * d <= n]
    return max(multi) if multi else max(feas)


# ---------------------------------------------------------------------------
# Fused conv kernel:  (deferred BN affine + SiLU, once per element) -> im2col
#                     -> single deep-K bf16 MXU dot -> (+bias, optional SiLU)
#                     -> flat 2D output + partial BN stats
# ---------------------------------------------------------------------------
def _fused_conv_kernel(*refs, apply_input_affine, apply_output_silu, emit_stats):
    """One stride-2 / 3x3 / pad-1 conv layer, fully fused.

    refs (in order):
      x_ref     : (4, bn, hp, wp, cin)  phase-major stride-2 phases of the padded input
      w_ref     : (9*cin, cout)  bf16   HWIO weight reshaped, K ordered (kh, kw, cin)
      b_ref     : (1, cout)      f32
      [scale_ref, shift_ref : (1, cin) f32]   (deferred BN affine of the prev layer)
      o_ref     : (bn*ho*wo, cout) bf16       flat raw conv output
      [stats_ref: (1, 2, cout) f32]           per-grid-step partial [sum ; sumsq]
      lhs_ref   : (bn*ho*wo, 9*cin) bf16      VMEM scratch: im2col operand
      [act_ref  : (4, bn, hp, wp, cin) bf16   VMEM scratch: pre-activated input]
    """
    x_ref, w_ref, b_ref = refs[0], refs[1], refs[2]
    i = 3
    if apply_input_affine:
        scale_ref, shift_ref = refs[i], refs[i + 1]
        i += 2
    o_ref = refs[i]
    i += 1
    stats_ref = None
    if emit_stats:
        stats_ref = refs[i]
        i += 1
    lhs_ref = refs[i]
    i += 1
    act_ref = refs[i] if apply_input_affine else None

    _, bn, hp, wp, cin = x_ref.shape
    ho, wo = hp - 1, wp - 1
    s_out = ho * wo
    m = bn * s_out
    cout = w_ref.shape[1]

    if apply_input_affine:
        # Previous layer's BatchNorm affine + SiLU applied ONCE per element (not per
        # tap); the pad ring of each phase is re-zeroed with an iota mask so it matches
        # PyTorch's zero padding of the *activated* tensor.
        scale = scale_ref[...].reshape(1, 1, 1, cin)
        shift = shift_ref[...].reshape(1, 1, 1, cin)
        r = jax.lax.broadcasted_iota(jnp.int32, (1, hp, wp, 1), 1)
        c = jax.lax.broadcasted_iota(jnp.int32, (1, hp, wp, 1), 2)
        for p in range(4):
            pa, pb = p // 2, p % 2
            valid = ((r >= 1 - pa) & (r < hp - pa)
                     & (c >= 1 - pb) & (c < wp - pb)).astype(jnp.float32)
            y = x_ref[p].astype(jnp.float32) * scale + shift
            act = (y * jax.nn.sigmoid(y)) * valid
            act_ref[p] = act.astype(act_ref.dtype)
        src = act_ref
    else:
        src = x_ref

    # im2col: 9 batch-wide tap stores into the (m, 9*cin) bf16 MXU operand.
    for kh in range(3):
        rs = kh // 2
        for kw in range(3):
            cs = kw // 2
            p = 2 * (kh % 2) + (kw % 2)
            k0 = (kh * 3 + kw) * cin
            tap = src[p, :, rs:rs + ho, cs:cs + wo, :]
            lhs_ref[:, k0:k0 + cin] = tap.reshape(m, cin).astype(lhs_ref.dtype)

    # Single deep-K MXU matmul (bf16 x bf16 -> f32) for the whole layer block.
    z = jnp.dot(lhs_ref[...], w_ref[...], preferred_element_type=jnp.float32)
    z = z + b_ref[...]
    if apply_output_silu:
        z = z * jax.nn.sigmoid(z)
    o_ref[...] = z.astype(o_ref.dtype)

    if emit_stats:
        # Training-mode BatchNorm partial sums, in f32 from the f32 accumulator.
        stats_ref[:, 0:1, :] = jnp.sum(z, axis=0, keepdims=True)[None]
        stats_ref[:, 1:2, :] = jnp.sum(z * z, axis=0, keepdims=True)[None]


# ---------------------------------------------------------------------------
# Final fused pass: BN affine + SiLU + global average pool (batched)
# ---------------------------------------------------------------------------
def _affine_silu_pool_kernel(x_ref, scale_ref, shift_ref, o_ref):
    x = x_ref[...].astype(jnp.float32)                      # (bn, S, C)
    c = x.shape[-1]
    y = x * scale_ref[...].reshape(1, 1, c) + shift_ref[...].reshape(1, 1, c)
    a = y * jax.nn.sigmoid(y)
    o_ref[...] = jnp.mean(a, axis=1).astype(o_ref.dtype)    # (bn, C)


# ---------------------------------------------------------------------------
# Wrappers
# ---------------------------------------------------------------------------
def fused_conv(x, w, b, *, scale=None, shift=None,
               apply_output_silu=False, emit_stats=False):
    """Fused stride-2 3x3 conv layer.

    x: (N, H, W, Cin).  If scale/shift are given, x is the previous layer's *raw*
    conv output and SiLU(x*scale+shift) (deferred BatchNorm+SiLU) is applied in-kernel
    before the convolution.  Returns (z, stats): z is the flat raw conv output
    (N*(H//2)*(W//2), Cout) in bf16, stats the per-grid-step partial [sum; sumsq]
    of shape (G, 2, Cout) in f32 (or None).
    """
    n, h, wdt, cin = x.shape
    cout = w.shape[-1]
    assert h % 2 == 0 and wdt % 2 == 0, "even spatial dims required"
    # TODO(synk): odd H/W (PyTorch floor semantics) unsupported by the phase split.
    ho, wo = h // 2, wdt // 2
    hp, wp = ho + 1, wo + 1
    s_out = ho * wo
    apply_input_affine = scale is not None

    # 4 stride-2 phases of the zero-padded input (phase-major, bf16) so every conv tap
    # is a contiguous slice in-kernel.
    xp = jnp.pad(x, ((0, 0), (1, 1), (1, 1), (0, 0)))
    phases = jnp.stack(
        [xp[:, a::2, b::2, :] for a in (0, 1) for b in (0, 1)],
        axis=0).astype(jnp.bfloat16)                        # (4, N, hp, wp, cin)
    # TODO(synk): emit this phase-split layout directly from the producer kernel's
    # epilogue to remove the remaining inter-layer HBM round trip.
    w2d = w.reshape(9 * cin, cout).astype(jnp.bfloat16)     # K ordered (kh, kw, cin)
    b2d = b.reshape(1, cout).astype(jnp.float32)

    budget, vmem_limit = _vmem_budget()

    def est(bn):                     # honest per-step VMEM footprint estimate (bytes)
        m = bn * s_out
        in_b = 4 * bn * hp * _rup(wp, 8) * _rup(cin, 128) * 2
        out_b = _rup(m, 8) * _rup(cout, 128) * 2
        lhs_b = _rup(m, 8) * _rup(9 * cin, 128) * 2
        act_b = in_b if apply_input_affine else 0
        z_b = _rup(m, 8) * _rup(cout, 128) * 4               # f32 matmul-result value
        w_b = _rup(9 * cin, 8) * _rup(cout, 128) * 2 + 8 * _rup(cout, 128) * 4
        aff_b = 2 * 8 * _rup(cin, 128) * 4 if apply_input_affine else 0
        st_b = 8 * _rup(cout, 128) * 4 if emit_stats else 0
        return 2 * (in_b + out_b + w_b + aff_b + st_b) + lhs_b + act_b + z_b

    bn = _pick_batch_block(n, s_out, est, budget)
    grid = (n // bn,)

    in_specs = [
        pl.BlockSpec((4, bn, hp, wp, cin), lambda g: (0, g, 0, 0, 0)),
        pl.BlockSpec((9 * cin, cout), lambda g: (0, 0)),
        pl.BlockSpec((1, cout), lambda g: (0, 0)),
    ]
    inputs = [phases, w2d, b2d]
    if apply_input_affine:
        in_specs += [pl.BlockSpec((1, cin), lambda g: (0, 0)),
                     pl.BlockSpec((1, cin), lambda g: (0, 0))]
        inputs += [scale.reshape(1, cin).astype(jnp.float32),
                   shift.reshape(1, cin).astype(jnp.float32)]
    # TODO(synk): pipeline_mode=pl.Buffered(1) on the broadcast operands (weights,
    # bias, scale, shift) would drop their second pipeline buffer.

    out_shape = [jax.ShapeDtypeStruct((n * s_out, cout), jnp.bfloat16)]
    out_specs = [pl.BlockSpec((bn * s_out, cout), lambda g: (g, 0))]
    if emit_stats:
        out_shape.append(jax.ShapeDtypeStruct((grid[0], 2, cout), jnp.float32))
        out_specs.append(pl.BlockSpec((1, 2, cout), lambda g: (g, 0, 0)))

    scratch = [pltpu.VMEM((bn * s_out, 9 * cin), jnp.bfloat16)]
    if apply_input_affine:
        scratch.append(pltpu.VMEM((4, bn, hp, wp, cin), jnp.bfloat16))

    kernel = functools.partial(
        _fused_conv_kernel,
        apply_input_affine=apply_input_affine,
        apply_output_silu=apply_output_silu,
        emit_stats=emit_stats)

    res = pl.pallas_call(
        kernel,
        grid=grid,
        in_specs=in_specs,
        out_specs=tuple(out_specs) if emit_stats else out_specs[0],
        out_shape=tuple(out_shape) if emit_stats else out_shape[0],
        scratch_shapes=scratch,
        compiler_params=pltpu.CompilerParams(
            dimension_semantics=("parallel",),
            vmem_limit_bytes=vmem_limit),
    )(*inputs)
    return (res if emit_stats else (res, None))


def _bn_scale_shift(stats, count, gamma, beta, eps=1e-5):
    """Fold training-mode BatchNorm (batch stats, biased var) into scale/shift (f32)."""
    s = jnp.sum(stats, axis=0)                      # (2, C)
    mean = s[0] / count
    # TODO(synk): E[x^2]-E[x]^2 can cancel for large |mean|/std; fine at these scales.
    var = jnp.maximum(s[1] / count - mean * mean, 0.0)
    scale = gamma * jax.lax.rsqrt(var + eps)
    shift = beta - mean * scale
    return scale, shift
    # TODO(synk): running_mean/running_var momentum buffers are not updated
    # (training-time bookkeeping only; forward output unaffected).


def affine_silu_pool(z, scale, shift):
    """z: (N, S, C) raw conv output (bf16) -> (N, C) = mean_S SiLU(z*scale+shift)."""
    n, s, c = z.shape
    budget, vmem_limit = _vmem_budget()

    def est(bn):
        blk = bn * _rup(s, 8) * _rup(c, 128)
        return (2 * 2 * blk + 4 * blk
                + 2 * (8 * _rup(c, 128) * 4) * 2
                + 2 * _rup(bn, 8) * _rup(c, 128) * 4)

    bn = _pick_batch_block(n, 1, est, budget)
    out = pl.pallas_call(
        _affine_silu_pool_kernel,
        grid=(n // bn,),
        in_specs=[
            pl.BlockSpec((bn, s, c), lambda i: (i, 0, 0)),
            pl.BlockSpec((1, c), lambda i: (0, 0)),
            pl.BlockSpec((1, c), lambda i: (0, 0)),
        ],
        out_specs=pl.BlockSpec((bn, c), lambda i: (i, 0)),
        out_shape=jax.ShapeDtypeStruct((n, c), jnp.float32),
        compiler_params=pltpu.CompilerParams(
            dimension_semantics=("parallel",),
            vmem_limit_bytes=vmem_limit),
    )(z, scale.reshape(1, c).astype(jnp.float32),
      shift.reshape(1, c).astype(jnp.float32))
    return out


@jax.jit
def discriminator_forward(x_nchw, params):
    x = jnp.transpose(x_nchw, (0, 2, 3, 1)).astype(jnp.float32)  # NCHW -> NHWC
    n, h, w, _ = x.shape

    # Conv(3,16) + SiLU (SiLU fused into the conv kernel epilogue).
    a1, _ = fused_conv(x, params["w1"], params["b1"], apply_output_silu=True)
    h, w = h // 2, w // 2
    a1 = a1.reshape(n, h, w, 16)

    # Conv(16,32); BN stats fused into the conv; BN affine+SiLU deferred into layer 3.
    z2, st2 = fused_conv(a1, params["w2"], params["b2"], emit_stats=True)
    h, w = h // 2, w // 2
    sc2, sh2 = _bn_scale_shift(st2, n * h * w, params["g2"], params["be2"])
    z2 = z2.reshape(n, h, w, 32)

    # Conv(32,64) with layer-2 BN+SiLU applied in-kernel; stats for layer-3 BN.
    z3, st3 = fused_conv(z2, params["w3"], params["b3"],
                         scale=sc2, shift=sh2, emit_stats=True)
    h, w = h // 2, w // 2
    sc3, sh3 = _bn_scale_shift(st3, n * h * w, params["g3"], params["be3"])
    z3 = z3.reshape(n, h, w, 64)

    # Conv(64,128) with layer-3 BN+SiLU applied in-kernel; stats for layer-4 BN.
    z4, st4 = fused_conv(z3, params["w4"], params["b4"],
                         scale=sc3, shift=sh3, emit_stats=True)
    h, w = h // 2, w // 2
    sc4, sh4 = _bn_scale_shift(st4, n * h * w, params["g4"], params["be4"])

    # Layer-4 BN+SiLU + global average pool fused; the (N,128)x(128,1)+sigmoid head is
    # a degenerate MXU shape -> plain JAX.
    pooled = affine_silu_pool(z4.reshape(n, h * w, 128), sc4, sh4)      # (N, 128)
    logit = jnp.dot(pooled, params["wl"],
                    precision=jax.lax.Precision.HIGHEST) + params["bl"]
    return jax.nn.sigmoid(logit)


# ---------------------------------------------------------------------------
# Deterministic parameter init (shapes from the module's __init__)
# ---------------------------------------------------------------------------
def init_params(key):
    def conv_init(k, cin, cout):
        kw, kb = jax.random.split(k)
        bound = 1.0 / math.sqrt(cin * 9)
        w = jax.random.uniform(kw, (3, 3, cin, cout), jnp.float32, -bound, bound)
        b = jax.random.uniform(kb, (cout,), jnp.float32, -bound, bound)
        return w, b

    keys = jax.random.split(key, 5)
    p = {}
    p["w1"], p["b1"] = conv_init(keys[0], 3, 16)
    p["w2"], p["b2"] = conv_init(keys[1], 16, 32)
    p["w3"], p["b3"] = conv_init(keys[2], 32, 64)
    p["w4"], p["b4"] = conv_init(keys[3], 64, 128)
    kl_w, kl_b = jax.random.split(keys[4])
    bound = 1.0 / math.sqrt(128)
    p["wl"] = jax.random.uniform(kl_w, (128, 1), jnp.float32, -bound, bound)
    p["bl"] = jax.random.uniform(kl_b, (1,), jnp.float32, -bound, bound)
    # BatchNorm affine params (PyTorch defaults: weight=1, bias=0)
    p["g2"], p["be2"] = jnp.ones((32,), jnp.float32), jnp.zeros((32,), jnp.float32)
    p["g3"], p["be3"] = jnp.ones((64,), jnp.float32), jnp.zeros((64,), jnp.float32)
    p["g4"], p["be4"] = jnp.ones((128,), jnp.float32), jnp.zeros((128,), jnp.float32)
    return p


# ---------------------------------------------------------------------------
# Pure-JAX f32 reference (for correctness check)
# ---------------------------------------------------------------------------
def reference_forward(x_nchw, params, eps=1e-5):
    x = jnp.transpose(x_nchw, (0, 2, 3, 1)).astype(jnp.float32)

    def conv(v, w, b):
        y = jax.lax.conv_general_dilated(
            v, w, window_strides=(2, 2), padding=((1, 1), (1, 1)),
            dimension_numbers=("NHWC", "HWIO", "NHWC"),
            precision=jax.lax.Precision.HIGHEST)
        return y + b

    def bn(v, g, b):
        mean = jnp.mean(v, axis=(0, 1, 2))
        var = jnp.var(v, axis=(0, 1, 2))
        return (v - mean) * jax.lax.rsqrt(var + eps) * g + b

    silu = lambda v: v * jax.nn.sigmoid(v)
    y = silu(conv(x, params["w1"], params["b1"]))
    y = silu(bn(conv(y, params["w2"], params["b2"]), params["g2"], params["be2"]))
    y = silu(bn(conv(y, params["w3"], params["b3"]), params["g3"], params["be3"]))
    y = silu(bn(conv(y, params["w4"], params["b4"]), params["g4"], params["be4"]))
    pooled = jnp.mean(y, axis=(1, 2))
    return jax.nn.sigmoid(pooled @ params["wl"] + params["bl"])


if __name__ == "__main__":
    key = jax.random.PRNGKey(0)
    pkey, xkey = jax.random.split(key)
    params = init_params(pkey)
    x = jax.random.normal(xkey, (2, 3, 16, 16), jnp.float32)  # NCHW, like PyTorch

    out = discriminator_forward(x, params)
    out = jax.block_until_ready(out)
    assert out.shape == (2, 1), out.shape

    ref = reference_forward(x, params)
    max_err = float(jnp.max(jnp.abs(out - ref)))
    # bf16 activations / matmul operands (f32 accumulate & BN stats) vs f32 reference.
    if max_err > 3e-2:
        raise AssertionError(f"Pallas output mismatch vs reference: max_err={max_err}")

    print("KERNEL_OK")
</pallas_src>

<mosaic_0001>
module attributes {stable_mosaic.version = 11 : i64} {
  func.func @_fused_conv_kernel(%arg0: i32, %arg1: memref<4x1x9x9x3xbf16, #tpu.memory_space<vmem>>, %arg2: memref<27x16xbf16, #tpu.memory_space<vmem>>, %arg3: memref<1x16xf32, #tpu.memory_space<vmem>>, %arg4: memref<64x16xbf16, #tpu.memory_space<vmem>>, %arg5: memref<64x27xbf16, #tpu.memory_space<vmem>>) attributes {dimension_semantics = [#tpu.dimension_semantics<parallel>], iteration_bounds = array<i64: 2>, scalar_prefetch = 0 : i64, scratch_operands = 1 : i64, tpu.core_type = #tpu.core_type<tc>, window_params = [{transform_indices = @transform_0, window_bounds = array<i64: 4, 1, 9, 9, 3>}, {pipeline_mode = #tpu.pipeline_mode<synchronous>, transform_indices = @transform_1, window_bounds = array<i64: 27, 16>}, {pipeline_mode = #tpu.pipeline_mode<synchronous>, transform_indices = @transform_2, window_bounds = array<i64: 1, 16>}, {transform_indices = @transform_3, window_bounds = array<i64: 64, 16>}]} {
    %c0 = arith.constant 0 : index
    %c0_0 = arith.constant 0 : index
    %c0_1 = arith.constant 0 : index
    %c0_2 = arith.constant 0 : index
    %c0_3 = arith.constant 0 : index
    %0 = vector.load %arg1[%c0, %c0_0, %c0_1, %c0_2, %c0_3] : memref<4x1x9x9x3xbf16, #tpu.memory_space<vmem>>, vector<1x1x8x8x3xbf16>
    %1 = vector.shape_cast %0 : vector<1x1x8x8x3xbf16> to vector<1x8x8x3xbf16>
    %2 = vector.shape_cast %1 : vector<1x8x8x3xbf16> to vector<64x3xbf16>
    %c0_4 = arith.constant 0 : index
    %c0_5 = arith.constant 0 : index
    %3 = vector.load %arg5[%c0_4, %c0_5] : memref<64x27xbf16, #tpu.memory_space<vmem>>, vector<64x3xbf16>
    tpu.vector_store %arg5[%c0_4, %c0_5], %2 {strides = array<i32>} : memref<64x27xbf16, #tpu.memory_space<vmem>>, vector<64x3xbf16>,
    %c1 = arith.constant 1 : index
    %c0_6 = arith.constant 0 : index
    %c0_7 = arith.constant 0 : index
    %c0_8 = arith.constant 0 : index
    %c0_9 = arith.constant 0 : index
    %4 = vector.load %arg1[%c1, %c0_6, %c0_7, %c0_8, %c0_9] : memref<4x1x9x9x3xbf16, #tpu.memory_space<vmem>>, vector<1x1x8x8x3xbf16>
    %5 = vector.shape_cast %4 : vector<1x1x8x8x3xbf16> to vector<1x8x8x3xbf16>
    %6 = vector.shape_cast %5 : vector<1x8x8x3xbf16> to vector<64x3xbf16>
    %c0_10 = arith.constant 0 : index
    %c3 = arith.constant 3 : index
    %7 = vector.load %arg5[%c0_10, %c3] : memref<64x27xbf16, #tpu.memory_space<vmem>>, vector<64x3xbf16>
    tpu.vector_store %arg5[%c0_10, %c3], %6 {strides = array<i32>} : memref<64x27xbf16, #tpu.memory_space<vmem>>, vector<64x3xbf16>,
    %c0_11 = arith.constant 0 : index
    %c0_12 = arith.constant 0 : index
    %c0_13 = arith.constant 0 : index
    %c1_14 = arith.constant 1 : index
    %c0_15 = arith.constant 0 : index
    %8 = vector.load %arg1[%c0_11, %c0_12, %c0_13, %c1_14, %c0_15] : memref<4x1x9x9x3xbf16, #tpu.memory_space<vmem>>, vector<1x1x8x8x3xbf16>
    %9 = vector.shape_cast %8 : vector<1x1x8x8x3xbf16> to vector<1x8x8x3xbf16>
    %10 = vector.shape_cast %9 : vector<1x8x8x3xbf16> to vector<64x3xbf16>
    %c0_16 = arith.constant 0 : index
    %c6 = arith.constant 6 : index
    %11 = vector.load %arg5[%c0_16, %c6] : memref<64x27xbf16, #tpu.memory_space<vmem>>, vector<64x3xbf16>
    tpu.vector_store %arg5[%c0_16, %c6], %10 {strides = array<i32>} : memref<64x27xbf16, #tpu.memory_space<vmem>>, vector<64x3xbf16>,
    %c2 = arith.constant 2 : index
    %c0_17 = arith.constant 0 : index
    %c0_18 = arith.constant 0 : index
    %c0_19 = arith.constant 0 : index
    %c0_20 = arith.constant 0 : index
    %12 = vector.load %arg1[%c2, %c0_17, %c0_18, %c0_19, %c0_20] : memref<4x1x9x9x3xbf16, #tpu.memory_space<vmem>>, vector<1x1x8x8x3xbf16>
    %13 = vector.shape_cast %12 : vector<1x1x8x8x3xbf16> to vector<1x8x8x3xbf16>
    %14 = vector.shape_cast %13 : vector<1x8x8x3xbf16> to vector<64x3xbf16>
    %c0_21 = arith.constant 0 : index
    %c9 = arith.constant 9 : index
    %15 = vector.load %arg5[%c0_21, %c9] : memref<64x27xbf16, #tpu.memory_space<vmem>>, vector<64x3xbf16>
    tpu.vector_store %arg5[%c0_21, %c9], %14 {strides = array<i32>} : memref<64x27xbf16, #tpu.memory_space<vmem>>, vector<64x3xbf16>,
    %c3_22 = arith.constant 3 : index
    %c0_23 = arith.constant 0 : index
    %c0_24 = arith.constant 0 : index
    %c0_25 = arith.constant 0 : index
    %c0_26 = arith.constant 0 : index
    %16 = vector.load %arg1[%c3_22, %c0_23, %c0_24, %c0_25, %c0_26] : memref<4x1x9x9x3xbf16, #tpu.memory_space<vmem>>, vector<1x1x8x8x3xbf16>
    %17 = vector.shape_cast %16 : vector<1x1x8x8x3xbf16> to vector<1x8x8x3xbf16>
    %18 = vector.shape_cast %17 : vector<1x8x8x3xbf16> to vector<64x3xbf16>
    %c0_27 = arith.constant 0 : index
    %c12 = arith.constant 12 : index
    %19 = vector.load %arg5[%c0_27, %c12] : memref<64x27xbf16, #tpu.memory_space<vmem>>, vector<64x3xbf16>
    tpu.vector_store %arg5[%c0_27, %c12], %18 {strides = array<i32>} : memref<64x27xbf16, #tpu.memory_space<vmem>>, vector<64x3xbf16>,
    %c2_28 = arith.constant 2 : index
    %c0_29 = arith.constant 0 : index
    %c0_30 = arith.constant 0 : index
    %c1_31 = arith.constant 1 : index
    %c0_32 = arith.constant 0 : index
    %20 = vector.load %arg1[%c2_28, %c0_29, %c0_30, %c1_31, %c0_32] : memref<4x1x9x9x3xbf16, #tpu.memory_space<vmem>>, vector<1x1x8x8x3xbf16>
    %21 = vector.shape_cast %20 : vector<1x1x8x8x3xbf16> to vector<1x8x8x3xbf16>
    %22 = vector.shape_cast %21 : vector<1x8x8x3xbf16> to vector<64x3xbf16>
    %c0_33 = arith.constant 0 : index
    %c15 = arith.constant 15 : index
    %23 = vector.load %arg5[%c0_33, %c15] : memref<64x27xbf16, #tpu.memory_space<vmem>>, vector<64x3xbf16>
    tpu.vector_store %arg5[%c0_33, %c15], %22 {strides = array<i32>} : memref<64x27xbf16, #tpu.memory_space<vmem>>, vector<64x3xbf16>,
    %c0_34 = arith.constant 0 : index
    %c0_35 = arith.constant 0 : index
    %c1_36 = arith.constant 1 : index
    %c0_37 = arith.constant 0 : index
    %c0_38 = arith.constant 0 : index
    %24 = vector.load %arg1[%c0_34, %c0_35, %c1_36, %c0_37, %c0_38] : memref<4x1x9x9x3xbf16, #tpu.memory_space<vmem>>, vector<1x1x8x8x3xbf16>
    %25 = vector.shape_cast %24 : vector<1x1x8x8x3xbf16> to vector<1x8x8x3xbf16>
    %26 = vector.shape_cast %25 : vector<1x8x8x3xbf16> to vector<64x3xbf16>
    %c0_39 = arith.constant 0 : index
    %c18 = arith.constant 18 : index
    %27 = vector.load %arg5[%c0_39, %c18] : memref<64x27xbf16, #tpu.memory_space<vmem>>, vector<64x3xbf16>
    tpu.vector_store %arg5[%c0_39, %c18], %26 {strides = array<i32>} : memref<64x27xbf16, #tpu.memory_space<vmem>>, vector<64x3xbf16>,
    %c1_40 = arith.constant 1 : index
    %c0_41 = arith.constant 0 : index
    %c1_42 = arith.constant 1 : index
    %c0_43 = arith.constant 0 : index
    %c0_44 = arith.constant 0 : index
    %28 = vector.load %arg1[%c1_40, %c0_41, %c1_42, %c0_43, %c0_44] : memref<4x1x9x9x3xbf16, #tpu.memory_space<vmem>>, vector<1x1x8x8x3xbf16>
    %29 = vector.shape_cast %28 : vector<1x1x8x8x3xbf16> to vector<1x8x8x3xbf16>
    %30 = vector.shape_cast %29 : vector<1x8x8x3xbf16> to vector<64x3xbf16>
    %c0_45 = arith.constant 0 : index
    %c21 = arith.constant 21 : index
    %31 = vector.load %arg5[%c0_45, %c21] : memref<64x27xbf16, #tpu.memory_space<vmem>>, vector<64x3xbf16>
    tpu.vector_store %arg5[%c0_45, %c21], %30 {strides = array<i32>} : memref<64x27xbf16, #tpu.memory_space<vmem>>, vector<64x3xbf16>,
    %c0_46 = arith.constant 0 : index
    %c0_47 = arith.constant 0 : index
    %c1_48 = arith.constant 1 : index
    %c1_49 = arith.constant 1 : index
    %c0_50 = arith.constant 0 : index
    %32 = vector.load %arg1[%c0_46, %c0_47, %c1_48, %c1_49, %c0_50] : memref<4x1x9x9x3xbf16, #tpu.memory_space<vmem>>, vector<1x1x8x8x3xbf16>
    %33 = vector.shape_cast %32 : vector<1x1x8x8x3xbf16> to vector<1x8x8x3xbf16>
    %34 = vector.shape_cast %33 : vector<1x8x8x3xbf16> to vector<64x3xbf16>
    %c0_51 = arith.constant 0 : index
    %c24 = arith.constant 24 : index
    %35 = vector.load %arg5[%c0_51, %c24] : memref<64x27xbf16, #tpu.memory_space<vmem>>, vector<64x3xbf16>
    tpu.vector_store %arg5[%c0_51, %c24], %34 {strides = array<i32>} : memref<64x27xbf16, #tpu.memory_space<vmem>>, vector<64x3xbf16>,
    %c0_52 = arith.constant 0 : index
    %c0_53 = arith.constant 0 : index
    %36 = vector.load %arg5[%c0_52, %c0_53] : memref<64x27xbf16, #tpu.memory_space<vmem>>, vector<64x27xbf16>
    %c0_54 = arith.constant 0 : index
    %c0_55 = arith.constant 0 : index
    %37 = vector.load %arg2[%c0_54, %c0_55] : memref<27x16xbf16, #tpu.memory_space<vmem>>, vector<27x16xbf16>
    %cst = arith.constant dense<0.000000e+00> : vector<64x16xf32>
    %38 = tpu.matmul %36, %37, %cst {dimension_numbers = #tpu.dot_dimension_numbers<[1], [0], [0], [1], [0, 0, 1, 1], [], []>} : vector<64x27xbf16>, vector<27x16xbf16>, vector<64x16xf32> -> vector<64x16xf32>
    %c0_56 = arith.constant 0 : index
    %c0_57 = arith.constant 0 : index
    %39 = vector.load %arg3[%c0_56, %c0_57] : memref<1x16xf32, #tpu.memory_space<vmem>>, vector<1x16xf32>
    %40 = vector.broadcast %39 : vector<1x16xf32> to vector<64x16xf32>
    %41 = arith.addf %38, %40 : vector<64x16xf32>
    %42 = arith.negf %41 : vector<64x16xf32>
    %43 = math.exp %42 : vector<64x16xf32>
    %cst_58 = arith.constant 1.000000e+00 : f32
    %44 = vector.broadcast %cst_58 : f32 to vector<64x16xf32>
    %45 = arith.addf %44, %43 : vector<64x16xf32>
    %46 = arith.divf %44, %45 : vector<64x16xf32>
    %47 = arith.mulf %41, %46 : vector<64x16xf32>
    %48 = arith.truncf %47 : vector<64x16xf32> to vector<64x16xbf16>
    %c0_59 = arith.constant 0 : index
    %c0_60 = arith.constant 0 : index
    %49 = vector.load %arg4[%c0_59, %c0_60] : memref<64x16xbf16, #tpu.memory_space<vmem>>, vector<64x16xbf16>
    tpu.vector_store %arg4[%c0_59, %c0_60], %48 {strides = array<i32>} : memref<64x16xbf16, #tpu.memory_space<vmem>>, vector<64x16xbf16>,
    return
  }
  func.func @transform_0(%arg0: i32) -> (i32, i32, i32, i32, i32) {
    %c0_i32 = arith.constant 0 : i32
    %c0_i32_0 = arith.constant 0 : i32
    %c0_i32_1 = arith.constant 0 : i32
    %c0_i32_2 = arith.constant 0 : i32
    %c0_i32_3 = arith.constant 0 : i32
    return %c0_i32, %arg0, %c0_i32_0, %c0_i32_1, %c0_i32_2 : i32, i32, i32, i32, i32
  }
  func.func @transform_1(%arg0: i32) -> (i32, i32) {
    %c0_i32 = arith.constant 0 : i32
    %c0_i32_0 = arith.constant 0 : i32
    %c0_i32_1 = arith.constant 0 : i32
    return %c0_i32, %c0_i32_0 : i32, i32
  }
  func.func @transform_2(%arg0: i32) -> (i32, i32) {
    %c0_i32 = arith.constant 0 : i32
    %c0_i32_0 = arith.constant 0 : i32
    %c0_i32_1 = arith.constant 0 : i32
    return %c0_i32, %c0_i32_0 : i32, i32
  }
  func.func @transform_3(%arg0: i32) -> (i32, i32) {
    %c0_i32 = arith.constant 0 : i32
    %c0_i32_0 = arith.constant 0 : i32
    return %arg0, %c0_i32 : i32, i32
  }
}

module attributes {stable_mosaic.version = 11 : i64} {
  func.func @_fused_conv_kernel(%arg0: i32, %arg1: memref<4x1x5x5x16xbf16, #tpu.memory_space<vmem>>, %arg2: memref<144x32xbf16, #tpu.memory_space<vmem>>, %arg3: memref<1x32xf32, #tpu.memory_space<vmem>>, %arg4: memref<16x32xbf16, #tpu.memory_space<vmem>>, %arg5: memref<1x2x32xf32, #tpu.memory_space<vmem>>, %arg6: memref<16x144xbf16, #tpu.memory_space<vmem>>) attributes {dimension_semantics = [#tpu.dimension_semantics<parallel>], iteration_bounds = array<i64: 2>, scalar_prefetch = 0 : i64, scratch_operands = 1 : i64, tpu.core_type = #tpu.core_type<tc>, window_params = [{transform_indices = @transform_0, window_bounds = array<i64: 4, 1, 5, 5, 16>}, {pipeline_mode = #tpu.pipeline_mode<synchronous>, transform_indices = @transform_1, window_bounds = array<i64: 144, 32>}, {pipeline_mode = #tpu.pipeline_mode<synchronous>, transform_indices = @transform_2, window_bounds = array<i64: 1, 32>}, {transform_indices = @transform_3, window_bounds = array<i64: 16, 32>}, {transform_indices = @transform_4, window_bounds = array<i64: 1, 2, 32>}]} {
    %c0 = arith.constant 0 : index
    %c0_0 = arith.constant 0 : index
    %c0_1 = arith.constant 0 : index
    %c0_2 = arith.constant 0 : index
    %c0_3 = arith.constant 0 : index
    %0 = vector.load %arg1[%c0, %c0_0, %c0_1, %c0_2, %c0_3] : memref<4x1x5x5x16xbf16, #tpu.memory_space<vmem>>, vector<1x1x4x4x16xbf16>
    %1 = vector.shape_cast %0 : vector<1x1x4x4x16xbf16> to vector<1x4x4x16xbf16>
    %2 = vector.shape_cast %1 : vector<1x4x4x16xbf16> to vector<16x16xbf16>
    %c0_4 = arith.constant 0 : index
    %c0_5 = arith.constant 0 : index
    %3 = vector.load %arg6[%c0_4, %c0_5] : memref<16x144xbf16, #tpu.memory_space<vmem>>, vector<16x16xbf16>
    tpu.vector_store %arg6[%c0_4, %c0_5], %2 {strides = array<i32>} : memref<16x144xbf16, #tpu.memory_space<vmem>>, vector<16x16xbf16>,
    %c1 = arith.constant 1 : index
    %c0_6 = arith.constant 0 : index
    %c0_7 = arith.constant 0 : index
    %c0_8 = arith.constant 0 : index
    %c0_9 = arith.constant 0 : index
    %4 = vector.load %arg1[%c1, %c0_6, %c0_7, %c0_8, %c0_9] : memref<4x1x5x5x16xbf16, #tpu.memory_space<vmem>>, vector<1x1x4x4x16xbf16>
    %5 = vector.shape_cast %4 : vector<1x1x4x4x16xbf16> to vector<1x4x4x16xbf16>
    %6 = vector.shape_cast %5 : vector<1x4x4x16xbf16> to vector<16x16xbf16>
    %c0_10 = arith.constant 0 : index
    %c16 = arith.constant 16 : index
    %7 = vector.load %arg6[%c0_10, %c16] : memref<16x144xbf16, #tpu.memory_space<vmem>>, vector<16x16xbf16>
    tpu.vector_store %arg6[%c0_10, %c16], %6 {strides = array<i32>} : memref<16x144xbf16, #tpu.memory_space<vmem>>, vector<16x16xbf16>,
    %c0_11 = arith.constant 0 : index
    %c0_12 = arith.constant 0 : index
    %c0_13 = arith.constant 0 : index
    %c1_14 = arith.constant 1 : index
    %c0_15 = arith.constant 0 : index
    %8 = vector.load %arg1[%c0_11, %c0_12, %c0_13, %c1_14, %c0_15] : memref<4x1x5x5x16xbf16, #tpu.memory_space<vmem>>, vector<1x1x4x4x16xbf16>
    %9 = vector.shape_cast %8 : vector<1x1x4x4x16xbf16> to vector<1x4x4x16xbf16>
    %10 = vector.shape_cast %9 : vector<1x4x4x16xbf16> to vector<16x16xbf16>
    %c0_16 = arith.constant 0 : index
    %c32 = arith.constant 32 : index
    %11 = vector.load %arg6[%c0_16, %c32] : memref<16x144xbf16, #tpu.memory_space<vmem>>, vector<16x16xbf16>
    tpu.vector_store %arg6[%c0_16, %c32], %10 {strides = array<i32>} : memref<16x144xbf16, #tpu.memory_space<vmem>>, vector<16x16xbf16>,
    %c2 = arith.constant 2 : index
    %c0_17 = arith.constant 0 : index
    %c0_18 = arith.constant 0 : index
    %c0_19 = arith.constant 0 : index
    %c0_20 = arith.constant 0 : index
    %12 = vector.load %arg1[%c2, %c0_17, %c0_18, %c0_19, %c0_20] : memref<4x1x5x5x16xbf16, #tpu.memory_space<vmem>>, vector<1x1x4x4x16xbf16>
    %13 = vector.shape_cast %12 : vector<1x1x4x4x16xbf16> to vector<1x4x4x16xbf16>
    %14 = vector.shape_cast %13 : vector<1x4x4x16xbf16> to vector<16x16xbf16>
    %c0_21 = arith.constant 0 : index
    %c48 = arith.constant 48 : index
    %15 = vector.load %arg6[%c0_21, %c48] : memref<16x144xbf16, #tpu.memory_space<vmem>>, vector<16x16xbf16>
    tpu.vector_store %arg6[%c0_21, %c48], %14 {strides = array<i32>} : memref<16x144xbf16, #tpu.memory_space<vmem>>, vector<16x16xbf16>,
    %c3 = arith.constant 3 : index
    %c0_22 = arith.constant 0 : index
    %c0_23 = arith.constant 0 : index
    %c0_24 = arith.constant 0 : index
    %c0_25 = arith.constant 0 : index
    %16 = vector.load %arg1[%c3, %c0_22, %c0_23, %c0_24, %c0_25] : memref<4x1x5x5x16xbf16, #tpu.memory_space<vmem>>, vector<1x1x4x4x16xbf16>
    %17 = vector.shape_cast %16 : vector<1x1x4x4x16xbf16> to vector<1x4x4x16xbf16>
    %18 = vector.shape_cast %17 : vector<1x4x4x16xbf16> to vector<16x16xbf16>
    %c0_26 = arith.constant 0 : index
    %c64 = arith.constant 64 : index
    %19 = vector.load %arg6[%c0_26, %c64] : memref<16x144xbf16, #tpu.memory_space<vmem>>, vector<16x16xbf16>
    tpu.vector_store %arg6[%c0_26, %c64], %18 {strides = array<i32>} : memref<16x144xbf16, #tpu.memory_space<vmem>>, vector<16x16xbf16>,
    %c2_27 = arith.constant 2 : index
    %c0_28 = arith.constant 0 : index
    %c0_29 = arith.constant 0 : index
    %c1_30 = arith.constant 1 : index
    %c0_31 = arith.constant 0 : index
    %20 = vector.load %arg1[%c2_27, %c0_28, %c0_29, %c1_30, %c0_31] : memref<4x1x5x5x16xbf16, #tpu.memory_space<vmem>>, vector<1x1x4x4x16xbf16>
    %21 = vector.shape_cast %20 : vector<1x1x4x4x16xbf16> to vector<1x4x4x16xbf16>
    %22 = vector.shape_cast %21 : vector<1x4x4x16xbf16> to vector<16x16xbf16>
    %c0_32 = arith.constant 0 : index
    %c80 = arith.constant 80 : index
    %23 = vector.load %arg6[%c0_32, %c80] : memref<16x144xbf16, #tpu.memory_space<vmem>>, vector<16x16xbf16>
    tpu.vector_store %arg6[%c0_32, %c80], %22 {strides = array<i32>} : memref<16x144xbf16, #tpu.memory_space<vmem>>, vector<16x16xbf16>,
    %c0_33 = arith.constant 0 : index
    %c0_34 = arith.constant 0 : index
    %c1_35 = arith.constant 1 : index
    %c0_36 = arith.constant 0 : index
    %c0_37 = arith.constant 0 : index
    %24 = vector.load %arg1[%c0_33, %c0_34, %c1_35, %c0_36, %c0_37] : memref<4x1x5x5x16xbf16, #tpu.memory_space<vmem>>, vector<1x1x4x4x16xbf16>
    %25 = vector.shape_cast %24 : vector<1x1x4x4x16xbf16> to vector<1x4x4x16xbf16>
    %26 = vector.shape_cast %25 : vector<1x4x4x16xbf16> to vector<16x16xbf16>
    %c0_38 = arith.constant 0 : index
    %c96 = arith.constant 96 : index
    %27 = vector.load %arg6[%c0_38, %c96] : memref<16x144xbf16, #tpu.memory_space<vmem>>, vector<16x16xbf16>
    tpu.vector_store %arg6[%c0_38, %c96], %26 {strides = array<i32>} : memref<16x144xbf16, #tpu.memory_space<vmem>>, vector<16x16xbf16>,
    %c1_39 = arith.constant 1 : index
    %c0_40 = arith.constant 0 : index
    %c1_41 = arith.constant 1 : index
    %c0_42 = arith.constant 0 : index
    %c0_43 = arith.constant 0 : index
    %28 = vector.load %arg1[%c1_39, %c0_40, %c1_41, %c0_42, %c0_43] : memref<4x1x5x5x16xbf16, #tpu.memory_space<vmem>>, vector<1x1x4x4x16xbf16>
    %29 = vector.shape_cast %28 : vector<1x1x4x4x16xbf16> to vector<1x4x4x16xbf16>
    %30 = vector.shape_cast %29 : vector<1x4x4x16xbf16> to vector<16x16xbf16>
    %c0_44 = arith.constant 0 : index
    %c112 = arith.constant 112 : index
    %31 = vector.load %arg6[%c0_44, %c112] : memref<16x144xbf16, #tpu.memory_space<vmem>>, vector<16x16xbf16>
    tpu.vector_store %arg6[%c0_44, %c112], %30 {strides = array<i32>} : memref<16x144xbf16, #tpu.memory_space<vmem>>, vector<16x16xbf16>,
    %c0_45 = arith.constant 0 : index
    %c0_46 = arith.constant 0 : index
    %c1_47 = arith.constant 1 : index
    %c1_48 = arith.constant 1 : index
    %c0_49 = arith.constant 0 : index
    %32 = vector.load %arg1[%c0_45, %c0_46, %c1_47, %c1_48, %c0_49] : memref<4x1x5x5x16xbf16, #tpu.memory_space<vmem>>, vector<1x1x4x4x16xbf16>
    %33 = vector.shape_cast %32 : vector<1x1x4x4x16xbf16> to vector<1x4x4x16xbf16>
    %34 = vector.shape_cast %33 : vector<1x4x4x16xbf16> to vector<16x16xbf16>
    %c0_50 = arith.constant 0 : index
    %c128 = arith.constant 128 : index
    %35 = vector.load %arg6[%c0_50, %c128] : memref<16x144xbf16, #tpu.memory_space<vmem>>, vector<16x16xbf16>
    tpu.vector_store %arg6[%c0_50, %c128], %34 {strides = array<i32>} : memref<16x144xbf16, #tpu.memory_space<vmem>>, vector<16x16xbf16>,
    %c0_51 = arith.constant 0 : index
    %c0_52 = arith.constant 0 : index
    %36 = vector.load %arg6[%c0_51, %c0_52] : memref<16x144xbf16, #tpu.memory_space<vmem>>, vector<16x144xbf16>
    %c0_53 = arith.constant 0 : index
    %c0_54 = arith.constant 0 : index
    %37 = vector.load %arg2[%c0_53, %c0_54] : memref<144x32xbf16, #tpu.memory_space<vmem>>, vector<144x32xbf16>
    %cst = arith.constant dense<0.000000e+00> : vector<16x32xf32>
    %38 = tpu.matmul %36, %37, %cst {dimension_numbers = #tpu.dot_dimension_numbers<[1], [0], [0], [1], [0, 0, 1, 1], [], []>} : vector<16x144xbf16>, vector<144x32xbf16>, vector<16x32xf32> -> vector<16x32xf32>
    %c0_55 = arith.constant 0 : index
    %c0_56 = arith.constant 0 : index
    %39 = vector.load %arg3[%c0_55, %c0_56] : memref<1x32xf32, #tpu.memory_space<vmem>>, vector<1x32xf32>
    %40 = vector.broadcast %39 : vector<1x32xf32> to vector<16x32xf32>
    %41 = arith.addf %38, %40 : vector<16x32xf32>
    %42 = arith.truncf %41 : vector<16x32xf32> to vector<16x32xbf16>
    %c0_57 = arith.constant 0 : index
    %c0_58 = arith.constant 0 : index
    %43 = vector.load %arg4[%c0_57, %c0_58] : memref<16x32xbf16, #tpu.memory_space<vmem>>, vector<16x32xbf16>
    tpu.vector_store %arg4[%c0_57, %c0_58], %42 {strides = array<i32>} : memref<16x32xbf16, #tpu.memory_space<vmem>>, vector<16x32xbf16>,
    %cst_59 = arith.constant dense<0.000000e+00> : vector<32xf32>
    %44 = vector.multi_reduction <add>, %41, %cst_59 [0] : vector<16x32xf32> to vector<32xf32>
    %45 = vector.shape_cast %44 : vector<32xf32> to vector<1x32xf32>
    %46 = vector.shape_cast %45 : vector<1x32xf32> to vector<1x1x32xf32>
    %c0_60 = arith.constant 0 : index
    %c0_61 = arith.constant 0 : index
    %c0_62 = arith.constant 0 : index
    %47 = vector.load %arg5[%c0_60, %c0_61, %c0_62] : memref<1x2x32xf32, #tpu.memory_space<vmem>>, vector<1x1x32xf32>
    tpu.vector_store %arg5[%c0_60, %c0_61, %c0_62], %46 {strides = array<i32>} : memref<1x2x32xf32, #tpu.memory_space<vmem>>, vector<1x1x32xf32>,
    %48 = arith.mulf %41, %41 : vector<16x32xf32>
    %cst_63 = arith.constant dense<0.000000e+00> : vector<32xf32>
    %49 = vector.multi_reduction <add>, %48, %cst_63 [0] : vector<16x32xf32> to vector<32xf32>
    %50 = vector.shape_cast %49 : vector<32xf32> to vector<1x32xf32>
    %51 = vector.shape_cast %50 : vector<1x32xf32> to vector<1x1x32xf32>
    %c0_64 = arith.constant 0 : index
    %c1_65 = arith.constant 1 : index
    %c0_66 = arith.constant 0 : index
    %52 = vector.load %arg5[%c0_64, %c1_65, %c0_66] : memref<1x2x32xf32, #tpu.memory_space<vmem>>, vector<1x1x32xf32>
    tpu.vector_store %arg5[%c0_64, %c1_65, %c0_66], %51 {strides = array<i32>} : memref<1x2x32xf32, #tpu.memory_space<vmem>>, vector<1x1x32xf32>,
    return
  }
  func.func @transform_0(%arg0: i32) -> (i32, i32, i32, i32, i32) {
    %c0_i32 = arith.constant 0 : i32
    %c0_i32_0 = arith.constant 0 : i32
    %c0_i32_1 = arith.constant 0 : i32
    %c0_i32_2 = arith.constant 0 : i32
    %c0_i32_3 = arith.constant 0 : i32
    return %c0_i32, %arg0, %c0_i32_0, %c0_i32_1, %c0_i32_2 : i32, i32, i32, i32, i32
  }
  func.func @transform_1(%arg0: i32) -> (i32, i32) {
    %c0_i32 = arith.constant 0 : i32
    %c0_i32_0 = arith.constant 0 : i32
    %c0_i32_1 = arith.constant 0 : i32
    return %c0_i32, %c0_i32_0 : i32, i32
  }
  func.func @transform_2(%arg0: i32) -> (i32, i32) {
    %c0_i32 = arith.constant 0 : i32
    %c0_i32_0 = arith.constant 0 : i32
    %c0_i32_1 = arith.constant 0 : i32
    return %c0_i32, %c0_i32_0 : i32, i32
  }
  func.func @transform_3(%arg0: i32) -> (i32, i32) {
    %c0_i32 = arith.constant 0 : i32
    %c0_i32_0 = arith.constant 0 : i32
    return %arg0, %c0_i32 : i32, i32
  }
  func.func @transform_4(%arg0: i32) -> (i32, i32, i32) {
    %c0_i32 = arith.constant 0 : i32
    %c0_i32_0 = arith.constant 0 : i32
    %c0_i32_1 = arith.constant 0 : i32
    return %arg0, %c0_i32, %c0_i32_0 : i32, i32, i32
  }
}

module attributes {stable_mosaic.version = 11 : i64} {
  func.func @_fused_conv_kernel(%arg0: i32, %arg1: memref<4x2x3x3x32xbf16, #tpu.memory_space<vmem>>, %arg2: memref<288x64xbf16, #tpu.memory_space<vmem>>, %arg3: memref<1x64xf32, #tpu.memory_space<vmem>>, %arg4: memref<1x32xf32, #tpu.memory_space<vmem>>, %arg5: memref<1x32xf32, #tpu.memory_space<vmem>>, %arg6: memref<8x64xbf16, #tpu.memory_space<vmem>>, %arg7: memref<1x2x64xf32, #tpu.memory_space<vmem>>, %arg8: memref<8x288xbf16, #tpu.memory_space<vmem>>, %arg9: memref<4x2x3x3x32xbf16, #tpu.memory_space<vmem>>) attributes {dimension_semantics = [#tpu.dimension_semantics<parallel>], iteration_bounds = array<i64: 1>, scalar_prefetch = 0 : i64, scratch_operands = 2 : i64, tpu.core_type = #tpu.core_type<tc>, window_params = [{transform_indices = @transform_0, window_bounds = array<i64: 4, 2, 3, 3, 32>}, {pipeline_mode = #tpu.pipeline_mode<synchronous>, transform_indices = @transform_1, window_bounds = array<i64: 288, 64>}, {pipeline_mode = #tpu.pipeline_mode<synchronous>, transform_indices = @transform_2, window_bounds = array<i64: 1, 64>}, {pipeline_mode = #tpu.pipeline_mode<synchronous>, transform_indices = @transform_3, window_bounds = array<i64: 1, 32>}, {pipeline_mode = #tpu.pipeline_mode<synchronous>, transform_indices = @transform_4, window_bounds = array<i64: 1, 32>}, {transform_indices = @transform_5, window_bounds = array<i64: 8, 64>}, {transform_indices = @transform_6, window_bounds = array<i64: 1, 2, 64>}]} {
    %c0 = arith.constant 0 : index
    %c0_0 = arith.constant 0 : index
    %0 = vector.load %arg4[%c0, %c0_0] : memref<1x32xf32, #tpu.memory_space<vmem>>, vector<1x32xf32>
    %1 = vector.shape_cast %0 : vector<1x32xf32> to vector<1x1x1x32xf32>
    %c0_1 = arith.constant 0 : index
    %c0_2 = arith.constant 0 : index
    %2 = vector.load %arg5[%c0_1, %c0_2] : memref<1x32xf32, #tpu.memory_space<vmem>>, vector<1x32xf32>
    %3 = vector.shape_cast %2 : vector<1x32xf32> to vector<1x1x1x32xf32>
    %4 = tpu.iota {dimensions = array<i32: 1>} : vector<1x3x3x1xi32>
    %5 = tpu.iota {dimensions = array<i32: 2>} : vector<1x3x3x1xi32>
    %c1_i32 = arith.constant 1 : i32
    %6 = vector.broadcast %c1_i32 : i32 to vector<1x3x3x1xi32>
    %7 = arith.cmpi sge, %4, %6 : vector<1x3x3x1xi32>
    %c3_i32 = arith.constant 3 : i32
    %8 = vector.broadcast %c3_i32 : i32 to vector<1x3x3x1xi32>
    %9 = arith.cmpi slt, %4, %8 : vector<1x3x3x1xi32>
    %10 = arith.andi %7, %9 : vector<1x3x3x1xi1>
    %c1_i32_3 = arith.constant 1 : i32
    %11 = vector.broadcast %c1_i32_3 : i32 to vector<1x3x3x1xi32>
    %12 = arith.cmpi sge, %5, %11 : vector<1x3x3x1xi32>
    %13 = arith.andi %10, %12 : vector<1x3x3x1xi1>
    %c3_i32_4 = arith.constant 3 : i32
    %14 = vector.broadcast %c3_i32_4 : i32 to vector<1x3x3x1xi32>
    %15 = arith.cmpi slt, %5, %14 : vector<1x3x3x1xi32>
    %16 = arith.andi %13, %15 : vector<1x3x3x1xi1>
    %17 = arith.extui %16 : vector<1x3x3x1xi1> to vector<1x3x3x1xi32>
    %18 = arith.sitofp %17 : vector<1x3x3x1xi32> to vector<1x3x3x1xf32>
    %c0_5 = arith.constant 0 : index
    %c0_6 = arith.constant 0 : index
    %c0_7 = arith.constant 0 : index
    %c0_8 = arith.constant 0 : index
    %c0_9 = arith.constant 0 : index
    %19 = vector.load %arg1[%c0_5, %c0_6, %c0_7, %c0_8, %c0_9] : memref<4x2x3x3x32xbf16, #tpu.memory_space<vmem>>, vector<1x2x3x3x32xbf16>
    %20 = vector.shape_cast %19 : vector<1x2x3x3x32xbf16> to vector<2x3x3x32xbf16>
    %21 = arith.extf %20 : vector<2x3x3x32xbf16> to vector<2x3x3x32xf32>
    %22 = vector.broadcast %1 : vector<1x1x1x32xf32> to vector<2x3x3x32xf32>
    %23 = arith.mulf %21, %22 : vector<2x3x3x32xf32>
    %24 = vector.broadcast %3 : vector<1x1x1x32xf32> to vector<2x3x3x32xf32>
    %25 = arith.addf %23, %24 : vector<2x3x3x32xf32>
    %26 = arith.negf %25 : vector<2x3x3x32xf32>
    %27 = math.exp %26 : vector<2x3x3x32xf32>
    %cst = arith.constant 1.000000e+00 : f32
    %28 = vector.broadcast %cst : f32 to vector<2x3x3x32xf32>
    %29 = arith.addf %28, %27 : vector<2x3x3x32xf32>
    %30 = arith.divf %28, %29 : vector<2x3x3x32xf32>
    %31 = arith.mulf %25, %30 : vector<2x3x3x32xf32>
    %32 = vector.broadcast %18 : vector<1x3x3x1xf32> to vector<2x3x3x32xf32>
    %33 = arith.mulf %31, %32 : vector<2x3x3x32xf32>
    %34 = arith.truncf %33 : vector<2x3x3x32xf32> to vector<2x3x3x32xbf16>
    %c0_10 = arith.constant 0 : index
    %c0_11 = arith.constant 0 : index
    %c0_12 = arith.constant 0 : index
    %c0_13 = arith.constant 0 : index
    %c0_14 = arith.constant 0 : index
    %35 = vector.load %arg9[%c0_10, %c0_11, %c0_12, %c0_13, %c0_14] : memref<4x2x3x3x32xbf16, #tpu.memory_space<vmem>>, vector<1x2x3x3x32xbf16>
    %36 = vector.shape_cast %35 : vector<1x2x3x3x32xbf16> to vector<2x3x3x32xbf16>
    %37 = vector.shape_cast %34 : vector<2x3x3x32xbf16> to vector<1x2x3x3x32xbf16>
    tpu.vector_store %arg9[%c0_10, %c0_11, %c0_12, %c0_13, %c0_14], %37 {strides = array<i32>} : memref<4x2x3x3x32xbf16, #tpu.memory_space<vmem>>, vector<1x2x3x3x32xbf16>,
    %c1_i32_15 = arith.constant 1 : i32
    %38 = vector.broadcast %c1_i32_15 : i32 to vector<1x3x3x1xi32>
    %39 = arith.cmpi sge, %4, %38 : vector<1x3x3x1xi32>
    %c3_i32_16 = arith.constant 3 : i32
    %40 = vector.broadcast %c3_i32_16 : i32 to vector<1x3x3x1xi32>
    %41 = arith.cmpi slt, %4, %40 : vector<1x3x3x1xi32>
    %42 = arith.andi %39, %41 : vector<1x3x3x1xi1>
    %c0_i32 = arith.constant 0 : i32
    %43 = vector.broadcast %c0_i32 : i32 to vector<1x3x3x1xi32>
    %44 = arith.cmpi sge, %5, %43 : vector<1x3x3x1xi32>
    %45 = arith.andi %42, %44 : vector<1x3x3x1xi1>
    %c2_i32 = arith.constant 2 : i32
    %46 = vector.broadcast %c2_i32 : i32 to vector<1x3x3x1xi32>
    %47 = arith.cmpi slt, %5, %46 : vector<1x3x3x1xi32>
    %48 = arith.andi %45, %47 : vector<1x3x3x1xi1>
    %49 = arith.extui %48 : vector<1x3x3x1xi1> to vector<1x3x3x1xi32>
    %50 = arith.sitofp %49 : vector<1x3x3x1xi32> to vector<1x3x3x1xf32>
    %c1 = arith.constant 1 : index
    %c0_17 = arith.constant 0 : index
    %c0_18 = arith.constant 0 : index
    %c0_19 = arith.constant 0 : index
    %c0_20 = arith.constant 0 : index
    %51 = vector.load %arg1[%c1, %c0_17, %c0_18, %c0_19, %c0_20] : memref<4x2x3x3x32xbf16, #tpu.memory_space<vmem>>, vector<1x2x3x3x32xbf16>
    %52 = vector.shape_cast %51 : vector<1x2x3x3x32xbf16> to vector<2x3x3x32xbf16>
    %53 = arith.extf %52 : vector<2x3x3x32xbf16> to vector<2x3x3x32xf32>
    %54 = vector.broadcast %1 : vector<1x1x1x32xf32> to vector<2x3x3x32xf32>
    %55 = arith.mulf %53, %54 : vector<2x3x3x32xf32>
    %56 = vector.broadcast %3 : vector<1x1x1x32xf32> to vector<2x3x3x32xf32>
    %57 = arith.addf %55, %56 : vector<2x3x3x32xf32>
    %58 = arith.negf %57 : vector<2x3x3x32xf32>
    %59 = math.exp %58 : vector<2x3x3x32xf32>
    %cst_21 = arith.constant 1.000000e+00 : f32
    %60 = vector.broadcast %cst_21 : f32 to vector<2x3x3x32xf32>
    %61 = arith.addf %60, %59 : vector<2x3x3x32xf32>
    %62 = arith.divf %60, %61 : vector<2x3x3x32xf32>
    %63 = arith.mulf %57, %62 : vector<2x3x3x32xf32>
    %64 = vector.broadcast %50 : vector<1x3x3x1xf32> to vector<2x3x3x32xf32>
    %65 = arith.mulf %63, %64 : vector<2x3x3x32xf32>
    %66 = arith.truncf %65 : vector<2x3x3x32xf32> to vector<2x3x3x32xbf16>
    %c1_22 = arith.constant 1 : index
    %c0_23 = arith.constant 0 : index
    %c0_24 = arith.constant 0 : index
    %c0_25 = arith.constant 0 : index
    %c0_26 = arith.constant 0 : index
    %67 = vector.load %arg9[%c1_22, %c0_23, %c0_24, %c0_25, %c0_26] : memref<4x2x3x3x32xbf16, #tpu.memory_space<vmem>>, vector<1x2x3x3x32xbf16>
    %68 = vector.shape_cast %67 : vector<1x2x3x3x32xbf16> to vector<2x3x3x32xbf16>
    %69 = vector.shape_cast %66 : vector<2x3x3x32xbf16> to vector<1x2x3x3x32xbf16>
    tpu.vector_store %arg9[%c1_22, %c0_23, %c0_24, %c0_25, %c0_26], %69 {strides = array<i32>} : memref<4x2x3x3x32xbf16, #tpu.memory_space<vmem>>, vector<1x2x3x3x32xbf16>,
    %c0_i32_27 = arith.constant 0 : i32
    %70 = vector.broadcast %c0_i32_27 : i32 to vector<1x3x3x1xi32>
    %71 = arith.cmpi sge, %4, %70 : vector<1x3x3x1xi32>
    %c2_i32_28 = arith.constant 2 : i32
    %72 = vector.broadcast %c2_i32_28 : i32 to vector<1x3x3x1xi32>
    %73 = arith.cmpi slt, %4, %72 : vector<1x3x3x1xi32>
    %74 = arith.andi %71, %73 : vector<1x3x3x1xi1>
    %c1_i32_29 = arith.constant 1 : i32
    %75 = vector.broadcast %c1_i32_29 : i32 to vector<1x3x3x1xi32>
    %76 = arith.cmpi sge, %5, %75 : vector<1x3x3x1xi32>
    %77 = arith.andi %74, %76 : vector<1x3x3x1xi1>
    %c3_i32_30 = arith.constant 3 : i32
    %78 = vector.broadcast %c3_i32_30 : i32 to vector<1x3x3x1xi32>
    %79 = arith.cmpi slt, %5, %78 : vector<1x3x3x1xi32>
    %80 = arith.andi %77, %79 : vector<1x3x3x1xi1>
    %81 = arith.extui %80 : vector<1x3x3x1xi1> to vector<1x3x3x1xi32>
    %82 = arith.sitofp %81 : vector<1x3x3x1xi32> to vector<1x3x3x1xf32>
    %c2 = arith.constant 2 : index
    %c0_31 = arith.constant 0 : index
    %c0_32 = arith.constant 0 : index
    %c0_33 = arith.constant 0 : index
    %c0_34 = arith.constant 0 : index
    %83 = vector.load %arg1[%c2, %c0_31, %c0_32, %c0_33, %c0_34] : memref<4x2x3x3x32xbf16, #tpu.memory_space<vmem>>, vector<1x2x3x3x32xbf16>
    %84 = vector.shape_cast %83 : vector<1x2x3x3x32xbf16> to vector<2x3x3x32xbf16>
    %85 = arith.extf %84 : vector<2x3x3x32xbf16> to vector<2x3x3x32xf32>
    %86 = vector.broadcast %1 : vector<1x1x1x32xf32> to vector<2x3x3x32xf32>
    %87 = arith.mulf %85, %86 : vector<2x3x3x32xf32>
    %88 = vector.broadcast %3 : vector<1x1x1x32xf32> to vector<2x3x3x32xf32>
    %89 = arith.addf %87, %88 : vector<2x3x3x32xf32>
    %90 = arith.negf %89 : vector<2x3x3x32xf32>
    %91 = math.exp %90 : vector<2x3x3x32xf32>
    %cst_35 = arith.constant 1.000000e+00 : f32
    %92 = vector.broadcast %cst_35 : f32 to vector<2x3x3x32xf32>
    %93 = arith.addf %92, %91 : vector<2x3x3x32xf32>
    %94 = arith.divf %92, %93 : vector<2x3x3x32xf32>
    %95 = arith.mulf %89, %94 : vector<2x3x3x32xf32>
    %96 = vector.broadcast %82 : vector<1x3x3x1xf32> to vector<2x3x3x32xf32>
    %97 = arith.mulf %95, %96 : vector<2x3x3x32xf32>
    %98 = arith.truncf %97 : vector<2x3x3x32xf32> to vector<2x3x3x32xbf16>
    %c2_36 = arith.constant 2 : index
    %c0_37 = arith.constant 0 : index
    %c0_38 = arith.constant 0 : index
    %c0_39 = arith.constant 0 : index
    %c0_40 = arith.constant 0 : index
    %99 = vector.load %arg9[%c2_36, %c0_37, %c0_38, %c0_39, %c0_40] : memref<4x2x3x3x32xbf16, #tpu.memory_space<vmem>>, vector<1x2x3x3x32xbf16>
    %100 = vector.shape_cast %99 : vector<1x2x3x3x32xbf16> to vector<2x3x3x32xbf16>
    %101 = vector.shape_cast %98 : vector<2x3x3x32xbf16> to vector<1x2x3x3x32xbf16>
    tpu.vector_store %arg9[%c2_36, %c0_37, %c0_38, %c0_39, %c0_40], %101 {strides = array<i32>} : memref<4x2x3x3x32xbf16, #tpu.memory_space<vmem>>, vector<1x2x3x3x32xbf16>,
    %c0_i32_41 = arith.constant 0 : i32
    %102 = vector.broadcast %c0_i32_41 : i32 to vector<1x3x3x1xi32>
    %103 = arith.cmpi sge, %4, %102 : vector<1x3x3x1xi32>
    %c2_i32_42 = arith.constant 2 : i32
    %104 = vector.broadcast %c2_i32_42 : i32 to vector<1x3x3x1xi32>
    %105 = arith.cmpi slt, %4, %104 : vector<1x3x3x1xi32>
    %106 = arith.andi %103, %105 : vector<1x3x3x1xi1>
    %c0_i32_43 = arith.constant 0 : i32
    %107 = vector.broadcast %c0_i32_43 : i32 to vector<1x3x3x1xi32>
    %108 = arith.cmpi sge, %5, %107 : vector<1x3x3x1xi32>
    %109 = arith.andi %106, %108 : vector<1x3x3x1xi1>
    %c2_i32_44 = arith.constant 2 : i32
    %110 = vector.broadcast %c2_i32_44 : i32 to vector<1x3x3x1xi32>
    %111 = arith.cmpi slt, %5, %110 : vector<1x3x3x1xi32>
    %112 = arith.andi %109, %111 : vector<1x3x3x1xi1>
    %113 = arith.extui %112 : vector<1x3x3x1xi1> to vector<1x3x3x1xi32>
    %114 = arith.sitofp %113 : vector<1x3x3x1xi32> to vector<1x3x3x1xf32>
    %c3 = arith.constant 3 : index
    %c0_45 = arith.constant 0 : index
    %c0_46 = arith.constant 0 : index
    %c0_47 = arith.constant 0 : index
    %c0_48 = arith.constant 0 : index
    %115 = vector.load %arg1[%c3, %c0_45, %c0_46, %c0_47, %c0_48] : memref<4x2x3x3x32xbf16, #tpu.memory_space<vmem>>, vector<1x2x3x3x32xbf16>
    %116 = vector.shape_cast %115 : vector<1x2x3x3x32xbf16> to vector<2x3x3x32xbf16>
    %117 = arith.extf %116 : vector<2x3x3x32xbf16> to vector<2x3x3x32xf32>
    %118 = vector.broadcast %1 : vector<1x1x1x32xf32> to vector<2x3x3x32xf32>
    %119 = arith.mulf %117, %118 : vector<2x3x3x32xf32>
    %120 = vector.broadcast %3 : vector<1x1x1x32xf32> to vector<2x3x3x32xf32>
    %121 = arith.addf %119, %120 : vector<2x3x3x32xf32>
    %122 = arith.negf %121 : vector<2x3x3x32xf32>
    %123 = math.exp %122 : vector<2x3x3x32xf32>
    %cst_49 = arith.constant 1.000000e+00 : f32
    %124 = vector.broadcast %cst_49 : f32 to vector<2x3x3x32xf32>
    %125 = arith.addf %124, %123 : vector<2x3x3x32xf32>
    %126 = arith.divf %124, %125 : vector<2x3x3x32xf32>
    %127 = arith.mulf %121, %126 : vector<2x3x3x32xf32>
    %128 = vector.broadcast %114 : vector<1x3x3x1xf32> to vector<2x3x3x32xf32>
    %129 = arith.mulf %127, %128 : vector<2x3x3x32xf32>
    %130 = arith.truncf %129 : vector<2x3x3x32xf32> to vector<2x3x3x32xbf16>
    %c3_50 = arith.constant 3 : index
    %c0_51 = arith.constant 0 : index
    %c0_52 = arith.constant 0 : index
    %c0_53 = arith.constant 0 : index
    %c0_54 = arith.constant 0 : index
    %131 = vector.load %arg9[%c3_50, %c0_51, %c0_52, %c0_53, %c0_54] : memref<4x2x3x3x32xbf16, #tpu.memory_space<vmem>>, vector<1x2x3x3x32xbf16>
    %132 = vector.shape_cast %131 : vector<1x2x3x3x32xbf16> to vector<2x3x3x32xbf16>
    %133 = vector.shape_cast %130 : vector<2x3x3x32xbf16> to vector<1x2x3x3x32xbf16>
    tpu.vector_store %arg9[%c3_50, %c0_51, %c0_52, %c0_53, %c0_54], %133 {strides = array<i32>} : memref<4x2x3x3x32xbf16, #tpu.memory_space<vmem>>, vector<1x2x3x3x32xbf16>,
    %c0_55 = arith.constant 0 : index
    %c0_56 = arith.constant 0 : index
    %c0_57 = arith.constant 0 : index
    %c0_58 = arith.constant 0 : index
    %c0_59 = arith.constant 0 : index
    %134 = vector.load %arg9[%c0_55, %c0_56, %c0_57, %c0_58, %c0_59] : memref<4x2x3x3x32xbf16, #tpu.memory_space<vmem>>, vector<1x2x2x2x32xbf16>
    %135 = vector.shape_cast %134 : vector<1x2x2x2x32xbf16> to vector<2x2x2x32xbf16>
    %136 = vector.shape_cast %135 : vector<2x2x2x32xbf16> to vector<8x32xbf16>
    %c0_60 = arith.constant 0 : index
    %c0_61 = arith.constant 0 : index
    %137 = vector.load %arg8[%c0_60, %c0_61] : memref<8x288xbf16, #tpu.memory_space<vmem>>, vector<8x32xbf16>
    tpu.vector_store %arg8[%c0_60, %c0_61], %136 {strides = array<i32>} : memref<8x288xbf16, #tpu.memory_space<vmem>>, vector<8x32xbf16>,
    %c1_62 = arith.constant 1 : index
    %c0_63 = arith.constant 0 : index
    %c0_64 = arith.constant 0 : index
    %c0_65 = arith.constant 0 : index
    %c0_66 = arith.constant 0 : index
    %138 = vector.load %arg9[%c1_62, %c0_63, %c0_64, %c0_65, %c0_66] : memref<4x2x3x3x32xbf16, #tpu.memory_space<vmem>>, vector<1x2x2x2x32xbf16>
    %139 = vector.shape_cast %138 : vector<1x2x2x2x32xbf16> to vector<2x2x2x32xbf16>
    %140 = vector.shape_cast %139 : vector<2x2x2x32xbf16> to vector<8x32xbf16>
    %c0_67 = arith.constant 0 : index
    %c32 = arith.constant 32 : index
    %141 = vector.load %arg8[%c0_67, %c32] : memref<8x288xbf16, #tpu.memory_space<vmem>>, vector<8x32xbf16>
    tpu.vector_store %arg8[%c0_67, %c32], %140 {strides = array<i32>} : memref<8x288xbf16, #tpu.memory_space<vmem>>, vector<8x32xbf16>,
    %c0_68 = arith.constant 0 : index
    %c0_69 = arith.constant 0 : index
    %c0_70 = arith.constant 0 : index
    %c1_71 = arith.constant 1 : index
    %c0_72 = arith.constant 0 : index
    %142 = vector.load %arg9[%c0_68, %c0_69, %c0_70, %c1_71, %c0_72] : memref<4x2x3x3x32xbf16, #tpu.memory_space<vmem>>, vector<1x2x2x2x32xbf16>
    %143 = vector.shape_cast %142 : vector<1x2x2x2x32xbf16> to vector<2x2x2x32xbf16>
    %144 = vector.shape_cast %143 : vector<2x2x2x32xbf16> to vector<8x32xbf16>
    %c0_73 = arith.constant 0 : index
    %c64 = arith.constant 64 : index
    %145 = vector.load %arg8[%c0_73, %c64] : memref<8x288xbf16, #tpu.memory_space<vmem>>, vector<8x32xbf16>
    tpu.vector_store %arg8[%c0_73, %c64], %144 {strides = array<i32>} : memref<8x288xbf16, #tpu.memory_space<vmem>>, vector<8x32xbf16>,
    %c2_74 = arith.constant 2 : index
    %c0_75 = arith.constant 0 : index
    %c0_76 = arith.constant 0 : index
    %c0_77 = arith.constant 0 : index
    %c0_78 = arith.constant 0 : index
    %146 = vector.load %arg9[%c2_74, %c0_75, %c0_76, %c0_77, %c0_78] : memref<4x2x3x3x32xbf16, #tpu.memory_space<vmem>>, vector<1x2x2x2x32xbf16>
    %147 = vector.shape_cast %146 : vector<1x2x2x2x32xbf16> to vector<2x2x2x32xbf16>
    %148 = vector.shape_cast %147 : vector<2x2x2x32xbf16> to vector<8x32xbf16>
    %c0_79 = arith.constant 0 : index
    %c96 = arith.constant 96 : index
    %149 = vector.load %arg8[%c0_79, %c96] : memref<8x288xbf16, #tpu.memory_space<vmem>>, vector<8x32xbf16>
    tpu.vector_store %arg8[%c0_79, %c96], %148 {strides = array<i32>} : memref<8x288xbf16, #tpu.memory_space<vmem>>, vector<8x32xbf16>,
    %c3_80 = arith.constant 3 : index
    %c0_81 = arith.constant 0 : index
    %c0_82 = arith.constant 0 : index
    %c0_83 = arith.constant 0 : index
    %c0_84 = arith.constant 0 : index
    %150 = vector.load %arg9[%c3_80, %c0_81, %c0_82, %c0_83, %c0_84] : memref<4x2x3x3x32xbf16, #tpu.memory_space<vmem>>, vector<1x2x2x2x32xbf16>
    %151 = vector.shape_cast %150 : vector<1x2x2x2x32xbf16> to vector<2x2x2x32xbf16>
    %152 = vector.shape_cast %151 : vector<2x2x2x32xbf16> to vector<8x32xbf16>
    %c0_85 = arith.constant 0 : index
    %c128 = arith.constant 128 : index
    %153 = vector.load %arg8[%c0_85, %c128] : memref<8x288xbf16, #tpu.memory_space<vmem>>, vector<8x32xbf16>
    tpu.vector_store %arg8[%c0_85, %c128], %152 {strides = array<i32>} : memref<8x288xbf16, #tpu.memory_space<vmem>>, vector<8x32xbf16>,
    %c2_86 = arith.constant 2 : index
    %c0_87 = arith.constant 0 : index
    %c0_88 = arith.constant 0 : index
    %c1_89 = arith.constant 1 : index
    %c0_90 = arith.constant 0 : index
    %154 = vector.load %arg9[%c2_86, %c0_87, %c0_88, %c1_89, %c0_90] : memref<4x2x3x3x32xbf16, #tpu.memory_space<vmem>>, vector<1x2x2x2x32xbf16>
    %155 = vector.shape_cast %154 : vector<1x2x2x2x32xbf16> to vector<2x2x2x32xbf16>
    %156 = vector.shape_cast %155 : vector<2x2x2x32xbf16> to vector<8x32xbf16>
    %c0_91 = arith.constant 0 : index
    %c160 = arith.constant 160 : index
    %157 = vector.load %arg8[%c0_91, %c160] : memref<8x288xbf16, #tpu.memory_space<vmem>>, vector<8x32xbf16>
    tpu.vector_store %arg8[%c0_91, %c160], %156 {strides = array<i32>} : memref<8x288xbf16, #tpu.memory_space<vmem>>, vector<8x32xbf16>,
    %c0_92 = arith.constant 0 : index
    %c0_93 = arith.constant 0 : index
    %c1_94 = arith.constant 1 : index
    %c0_95 = arith.constant 0 : index
    %c0_96 = arith.constant 0 : index
    %158 = vector.load %arg9[%c0_92, %c0_93, %c1_94, %c0_95, %c0_96] : memref<4x2x3x3x32xbf16, #tpu.memory_space<vmem>>, vector<1x2x2x2x32xbf16>
    %159 = vector.shape_cast %158 : vector<1x2x2x2x32xbf16> to vector<2x2x2x32xbf16>
    %160 = vector.shape_cast %159 : vector<2x2x2x32xbf16> to vector<8x32xbf16>
    %c0_97 = arith.constant 0 : index
    %c192 = arith.constant 192 : index
    %161 = vector.load %arg8[%c0_97, %c192] : memref<8x288xbf16, #tpu.memory_space<vmem>>, vector<8x32xbf16>
    tpu.vector_store %arg8[%c0_97, %c192], %160 {strides = array<i32>} : memref<8x288xbf16, #tpu.memory_space<vmem>>, vector<8x32xbf16>,
    %c1_98 = arith.constant 1 : index
    %c0_99 = arith.constant 0 : index
    %c1_100 = arith.constant 1 : index
    %c0_101 = arith.constant 0 : index
    %c0_102 = arith.constant 0 : index
    %162 = vector.load %arg9[%c1_98, %c0_99, %c1_100, %c0_101, %c0_102] : memref<4x2x3x3x32xbf16, #tpu.memory_space<vmem>>, vector<1x2x2x2x32xbf16>
    %163 = vector.shape_cast %162 : vector<1x2x2x2x32xbf16> to vector<2x2x2x32xbf16>
    %164 = vector.shape_cast %163 : vector<2x2x2x32xbf16> to vector<8x32xbf16>
    %c0_103 = arith.constant 0 : index
    %c224 = arith.constant 224 : index
    %165 = vector.load %arg8[%c0_103, %c224] : memref<8x288xbf16, #tpu.memory_space<vmem>>, vector<8x32xbf16>
    tpu.vector_store %arg8[%c0_103, %c224], %164 {strides = array<i32>} : memref<8x288xbf16, #tpu.memory_space<vmem>>, vector<8x32xbf16>,
    %c0_104 = arith.constant 0 : index
    %c0_105 = arith.constant 0 : index
    %c1_106 = arith.constant 1 : index
    %c1_107 = arith.constant 1 : index
    %c0_108 = arith.constant 0 : index
    %166 = vector.load %arg9[%c0_104, %c0_105, %c1_106, %c1_107, %c0_108] : memref<4x2x3x3x32xbf16, #tpu.memory_space<vmem>>, vector<1x2x2x2x32xbf16>
    %167 = vector.shape_cast %166 : vector<1x2x2x2x32xbf16> to vector<2x2x2x32xbf16>
    %168 = vector.shape_cast %167 : vector<2x2x2x32xbf16> to vector<8x32xbf16>
    %c0_109 = arith.constant 0 : index
    %c256 = arith.constant 256 : index
    %169 = vector.load %arg8[%c0_109, %c256] : memref<8x288xbf16, #tpu.memory_space<vmem>>, vector<8x32xbf16>
    tpu.vector_store %arg8[%c0_109, %c256], %168 {strides = array<i32>} : memref<8x288xbf16, #tpu.memory_space<vmem>>, vector<8x32xbf16>,
    %c0_110 = arith.constant 0 : index
    %c0_111 = arith.constant 0 : index
    %170 = vector.load %arg8[%c0_110, %c0_111] : memref<8x288xbf16, #tpu.memory_space<vmem>>, vector<8x288xbf16>
    %c0_112 = arith.constant 0 : index
    %c0_113 = arith.constant 0 : index
    %171 = vector.load %arg2[%c0_112, %c0_113] : memref<288x64xbf16, #tpu.memory_space<vmem>>, vector<288x64xbf16>
    %cst_114 = arith.constant dense<0.000000e+00> : vector<8x64xf32>
    %172 = tpu.matmul %170, %171, %cst_114 {dimension_numbers = #tpu.dot_dimension_numbers<[1], [0], [0], [1], [0, 0, 1, 1], [], []>} : vector<8x288xbf16>, vector<288x64xbf16>, vector<8x64xf32> -> vector<8x64xf32>
    %c0_115 = arith.constant 0 : index
    %c0_116 = arith.constant 0 : index
    %173 = vector.load %arg3[%c0_115, %c0_116] : memref<1x64xf32, #tpu.memory_space<vmem>>, vector<1x64xf32>
    %174 = vector.broadcast %173 : vector<1x64xf32> to vector<8x64xf32>
    %175 = arith.addf %172, %174 : vector<8x64xf32>
    %176 = arith.truncf %175 : vector<8x64xf32> to vector<8x64xbf16>
    %c0_117 = arith.constant 0 : index
    %c0_118 = arith.constant 0 : index
    %177 = vector.load %arg6[%c0_117, %c0_118] : memref<8x64xbf16, #tpu.memory_space<vmem>>, vector<8x64xbf16>
    tpu.vector_store %arg6[%c0_117, %c0_118], %176 {strides = array<i32>} : memref<8x64xbf16, #tpu.memory_space<vmem>>, vector<8x64xbf16>,
    %cst_119 = arith.constant dense<0.000000e+00> : vector<64xf32>
    %178 = vector.multi_reduction <add>, %175, %cst_119 [0] : vector<8x64xf32> to vector<64xf32>
    %179 = vector.shape_cast %178 : vector<64xf32> to vector<1x64xf32>
    %180 = vector.shape_cast %179 : vector<1x64xf32> to vector<1x1x64xf32>
    %c0_120 = arith.constant 0 : index
    %c0_121 = arith.constant 0 : index
    %c0_122 = arith.constant 0 : index
    %181 = vector.load %arg7[%c0_120, %c0_121, %c0_122] : memref<1x2x64xf32, #tpu.memory_space<vmem>>, vector<1x1x64xf32>
    tpu.vector_store %arg7[%c0_120, %c0_121, %c0_122], %180 {strides = array<i32>} : memref<1x2x64xf32, #tpu.memory_space<vmem>>, vector<1x1x64xf32>,
    %182 = arith.mulf %175, %175 : vector<8x64xf32>
    %cst_123 = arith.constant dense<0.000000e+00> : vector<64xf32>
    %183 = vector.multi_reduction <add>, %182, %cst_123 [0] : vector<8x64xf32> to vector<64xf32>
    %184 = vector.shape_cast %183 : vector<64xf32> to vector<1x64xf32>
    %185 = vector.shape_cast %184 : vector<1x64xf32> to vector<1x1x64xf32>
    %c0_124 = arith.constant 0 : index
    %c1_125 = arith.constant 1 : index
    %c0_126 = arith.constant 0 : index
    %186 = vector.load %arg7[%c0_124, %c1_125, %c0_126] : memref<1x2x64xf32, #tpu.memory_space<vmem>>, vector<1x1x64xf32>
    tpu.vector_store %arg7[%c0_124, %c1_125, %c0_126], %185 {strides = array<i32>} : memref<1x2x64xf32, #tpu.memory_space<vmem>>, vector<1x1x64xf32>,
    return
  }
  func.func @transform_0(%arg0: i32) -> (i32, i32, i32, i32, i32) {
    %c0_i32 = arith.constant 0 : i32
    %c0_i32_0 = arith.constant 0 : i32
    %c0_i32_1 = arith.constant 0 : i32
    %c0_i32_2 = arith.constant 0 : i32
    %c0_i32_3 = arith.constant 0 : i32
    return %c0_i32, %arg0, %c0_i32_0, %c0_i32_1, %c0_i32_2 : i32, i32, i32, i32, i32
  }
  func.func @transform_1(%arg0: i32) -> (i32, i32) {
    %c0_i32 = arith.constant 0 : i32
    %c0_i32_0 = arith.constant 0 : i32
    %c0_i32_1 = arith.constant 0 : i32
    return %c0_i32, %c0_i32_0 : i32, i32
  }
  func.func @transform_2(%arg0: i32) -> (i32, i32) {
    %c0_i32 = arith.constant 0 : i32
    %c0_i32_0 = arith.constant 0 : i32
    %c0_i32_1 = arith.constant 0 : i32
    return %c0_i32, %c0_i32_0 : i32, i32
  }
  func.func @transform_3(%arg0: i32) -> (i32, i32) {
    %c0_i32 = arith.constant 0 : i32
    %c0_i32_0 = arith.constant 0 : i32
    %c0_i32_1 = arith.constant 0 : i32
    return %c0_i32, %c0_i32_0 : i32, i32
  }
  func.func @transform_4(%arg0: i32) -> (i32, i32) {
    %c0_i32 = arith.constant 0 : i32
    %c0_i32_0 = arith.constant 0 : i32
    %c0_i32_1 = arith.constant 0 : i32
    return %c0_i32, %c0_i32_0 : i32, i32
  }
  func.func @transform_5(%arg0: i32) -> (i32, i32) {
    %c0_i32 = arith.constant 0 : i32
    %c0_i32_0 = arith.constant 0 : i32
    return %arg0, %c0_i32 : i32, i32
  }
  func.func @transform_6(%arg0: i32) -> (i32, i32, i32) {
    %c0_i32 = arith.constant 0 : i32
    %c0_i32_0 = arith.constant 0 : i32
    %c0_i32_1 = arith.constant 0 : i32
    return %arg0, %c0_i32, %c0_i32_0 : i32, i32, i32
  }
}

module attributes {stable_mosaic.version = 11 : i64} {
  func.func @_fused_conv_kernel(%arg0: i32, %arg1: memref<4x2x2x2x64xbf16, #tpu.memory_space<vmem>>, %arg2: memref<576x128xbf16, #tpu.memory_space<vmem>>, %arg3: memref<1x128xf32, #tpu.memory_space<vmem>>, %arg4: memref<1x64xf32, #tpu.memory_space<vmem>>, %arg5: memref<1x64xf32, #tpu.memory_space<vmem>>, %arg6: memref<2x128xbf16, #tpu.memory_space<vmem>>, %arg7: memref<1x2x128xf32, #tpu.memory_space<vmem>>, %arg8: memref<2x576xbf16, #tpu.memory_space<vmem>>, %arg9: memref<4x2x2x2x64xbf16, #tpu.memory_space<vmem>>) attributes {dimension_semantics = [#tpu.dimension_semantics<parallel>], iteration_bounds = array<i64: 1>, scalar_prefetch = 0 : i64, scratch_operands = 2 : i64, tpu.core_type = #tpu.core_type<tc>, window_params = [{transform_indices = @transform_0, window_bounds = array<i64: 4, 2, 2, 2, 64>}, {pipeline_mode = #tpu.pipeline_mode<synchronous>, transform_indices = @transform_1, window_bounds = array<i64: 576, 128>}, {pipeline_mode = #tpu.pipeline_mode<synchronous>, transform_indices = @transform_2, window_bounds = array<i64: 1, 128>}, {pipeline_mode = #tpu.pipeline_mode<synchronous>, transform_indices = @transform_3, window_bounds = array<i64: 1, 64>}, {pipeline_mode = #tpu.pipeline_mode<synchronous>, transform_indices = @transform_4, window_bounds = array<i64: 1, 64>}, {transform_indices = @transform_5, window_bounds = array<i64: 2, 128>}, {transform_indices = @transform_6, window_bounds = array<i64: 1, 2, 128>}]} {
    %c0 = arith.constant 0 : index
    %c0_0 = arith.constant 0 : index
    %0 = vector.load %arg4[%c0, %c0_0] : memref<1x64xf32, #tpu.memory_space<vmem>>, vector<1x64xf32>
    %1 = vector.shape_cast %0 : vector<1x64xf32> to vector<1x1x1x64xf32>
    %c0_1 = arith.constant 0 : index
    %c0_2 = arith.constant 0 : index
    %2 = vector.load %arg5[%c0_1, %c0_2] : memref<1x64xf32, #tpu.memory_space<vmem>>, vector<1x64xf32>
    %3 = vector.shape_cast %2 : vector<1x64xf32> to vector<1x1x1x64xf32>
    %4 = tpu.iota {dimensions = array<i32: 1>} : vector<1x2x2x1xi32>
    %5 = tpu.iota {dimensions = array<i32: 2>} : vector<1x2x2x1xi32>
    %c1_i32 = arith.constant 1 : i32
    %6 = vector.broadcast %c1_i32 : i32 to vector<1x2x2x1xi32>
    %7 = arith.cmpi sge, %4, %6 : vector<1x2x2x1xi32>
    %c2_i32 = arith.constant 2 : i32
    %8 = vector.broadcast %c2_i32 : i32 to vector<1x2x2x1xi32>
    %9 = arith.cmpi slt, %4, %8 : vector<1x2x2x1xi32>
    %10 = arith.andi %7, %9 : vector<1x2x2x1xi1>
    %c1_i32_3 = arith.constant 1 : i32
    %11 = vector.broadcast %c1_i32_3 : i32 to vector<1x2x2x1xi32>
    %12 = arith.cmpi sge, %5, %11 : vector<1x2x2x1xi32>
    %13 = arith.andi %10, %12 : vector<1x2x2x1xi1>
    %c2_i32_4 = arith.constant 2 : i32
    %14 = vector.broadcast %c2_i32_4 : i32 to vector<1x2x2x1xi32>
    %15 = arith.cmpi slt, %5, %14 : vector<1x2x2x1xi32>
    %16 = arith.andi %13, %15 : vector<1x2x2x1xi1>
    %17 = arith.extui %16 : vector<1x2x2x1xi1> to vector<1x2x2x1xi32>
    %18 = arith.sitofp %17 : vector<1x2x2x1xi32> to vector<1x2x2x1xf32>
    %c0_5 = arith.constant 0 : index
    %c0_6 = arith.constant 0 : index
    %c0_7 = arith.constant 0 : index
    %c0_8 = arith.constant 0 : index
    %c0_9 = arith.constant 0 : index
    %19 = vector.load %arg1[%c0_5, %c0_6, %c0_7, %c0_8, %c0_9] : memref<4x2x2x2x64xbf16, #tpu.memory_space<vmem>>, vector<1x2x2x2x64xbf16>
    %20 = vector.shape_cast %19 : vector<1x2x2x2x64xbf16> to vector<2x2x2x64xbf16>
    %21 = arith.extf %20 : vector<2x2x2x64xbf16> to vector<2x2x2x64xf32>
    %22 = vector.broadcast %1 : vector<1x1x1x64xf32> to vector<2x2x2x64xf32>
    %23 = arith.mulf %21, %22 : vector<2x2x2x64xf32>
    %24 = vector.broadcast %3 : vector<1x1x1x64xf32> to vector<2x2x2x64xf32>
    %25 = arith.addf %23, %24 : vector<2x2x2x64xf32>
    %26 = arith.negf %25 : vector<2x2x2x64xf32>
    %27 = math.exp %26 : vector<2x2x2x64xf32>
    %cst = arith.constant 1.000000e+00 : f32
    %28 = vector.broadcast %cst : f32 to vector<2x2x2x64xf32>
    %29 = arith.addf %28, %27 : vector<2x2x2x64xf32>
    %30 = arith.divf %28, %29 : vector<2x2x2x64xf32>
    %31 = arith.mulf %25, %30 : vector<2x2x2x64xf32>
    %32 = vector.broadcast %18 : vector<1x2x2x1xf32> to vector<2x2x2x64xf32>
    %33 = arith.mulf %31, %32 : vector<2x2x2x64xf32>
    %34 = arith.truncf %33 : vector<2x2x2x64xf32> to vector<2x2x2x64xbf16>
    %c0_10 = arith.constant 0 : index
    %c0_11 = arith.constant 0 : index
    %c0_12 = arith.constant 0 : index
    %c0_13 = arith.constant 0 : index
    %c0_14 = arith.constant 0 : index
    %35 = vector.load %arg9[%c0_10, %c0_11, %c0_12, %c0_13, %c0_14] : memref<4x2x2x2x64xbf16, #tpu.memory_space<vmem>>, vector<1x2x2x2x64xbf16>
    %36 = vector.shape_cast %35 : vector<1x2x2x2x64xbf16> to vector<2x2x2x64xbf16>
    %37 = vector.shape_cast %34 : vector<2x2x2x64xbf16> to vector<1x2x2x2x64xbf16>
    tpu.vector_store %arg9[%c0_10, %c0_11, %c0_12, %c0_13, %c0_14], %37 {strides = array<i32>} : memref<4x2x2x2x64xbf16, #tpu.memory_space<vmem>>, vector<1x2x2x2x64xbf16>,
    %c1_i32_15 = arith.constant 1 : i32
    %38 = vector.broadcast %c1_i32_15 : i32 to vector<1x2x2x1xi32>
    %39 = arith.cmpi sge, %4, %38 : vector<1x2x2x1xi32>
    %c2_i32_16 = arith.constant 2 : i32
    %40 = vector.broadcast %c2_i32_16 : i32 to vector<1x2x2x1xi32>
    %41 = arith.cmpi slt, %4, %40 : vector<1x2x2x1xi32>
    %42 = arith.andi %39, %41 : vector<1x2x2x1xi1>
    %c0_i32 = arith.constant 0 : i32
    %43 = vector.broadcast %c0_i32 : i32 to vector<1x2x2x1xi32>
    %44 = arith.cmpi sge, %5, %43 : vector<1x2x2x1xi32>
    %45 = arith.andi %42, %44 : vector<1x2x2x1xi1>
    %c1_i32_17 = arith.constant 1 : i32
    %46 = vector.broadcast %c1_i32_17 : i32 to vector<1x2x2x1xi32>
    %47 = arith.cmpi slt, %5, %46 : vector<1x2x2x1xi32>
    %48 = arith.andi %45, %47 : vector<1x2x2x1xi1>
    %49 = arith.extui %48 : vector<1x2x2x1xi1> to vector<1x2x2x1xi32>
    %50 = arith.sitofp %49 : vector<1x2x2x1xi32> to vector<1x2x2x1xf32>
    %c1 = arith.constant 1 : index
    %c0_18 = arith.constant 0 : index
    %c0_19 = arith.constant 0 : index
    %c0_20 = arith.constant 0 : index
    %c0_21 = arith.constant 0 : index
    %51 = vector.load %arg1[%c1, %c0_18, %c0_19, %c0_20, %c0_21] : memref<4x2x2x2x64xbf16, #tpu.memory_space<vmem>>, vector<1x2x2x2x64xbf16>
    %52 = vector.shape_cast %51 : vector<1x2x2x2x64xbf16> to vector<2x2x2x64xbf16>
    %53 = arith.extf %52 : vector<2x2x2x64xbf16> to vector<2x2x2x64xf32>
    %54 = vector.broadcast %1 : vector<1x1x1x64xf32> to vector<2x2x2x64xf32>
    %55 = arith.mulf %53, %54 : vector<2x2x2x64xf32>
    %56 = vector.broadcast %3 : vector<1x1x1x64xf32> to vector<2x2x2x64xf32>
    %57 = arith.addf %55, %56 : vector<2x2x2x64xf32>
    %58 = arith.negf %57 : vector<2x2x2x64xf32>
    %59 = math.exp %58 : vector<2x2x2x64xf32>
    %cst_22 = arith.constant 1.000000e+00 : f32
    %60 = vector.broadcast %cst_22 : f32 to vector<2x2x2x64xf32>
    %61 = arith.addf %60, %59 : vector<2x2x2x64xf32>
    %62 = arith.divf %60, %61 : vector<2x2x2x64xf32>
    %63 = arith.mulf %57, %62 : vector<2x2x2x64xf32>
    %64 = vector.broadcast %50 : vector<1x2x2x1xf32> to vector<2x2x2x64xf32>
    %65 = arith.mulf %63, %64 : vector<2x2x2x64xf32>
    %66 = arith.truncf %65 : vector<2x2x2x64xf32> to vector<2x2x2x64xbf16>
    %c1_23 = arith.constant 1 : index
    %c0_24 = arith.constant 0 : index
    %c0_25 = arith.constant 0 : index
    %c0_26 = arith.constant 0 : index
    %c0_27 = arith.constant 0 : index
    %67 = vector.load %arg9[%c1_23, %c0_24, %c0_25, %c0_26, %c0_27] : memref<4x2x2x2x64xbf16, #tpu.memory_space<vmem>>, vector<1x2x2x2x64xbf16>
    %68 = vector.shape_cast %67 : vector<1x2x2x2x64xbf16> to vector<2x2x2x64xbf16>
    %69 = vector.shape_cast %66 : vector<2x2x2x64xbf16> to vector<1x2x2x2x64xbf16>
    tpu.vector_store %arg9[%c1_23, %c0_24, %c0_25, %c0_26, %c0_27], %69 {strides = array<i32>} : memref<4x2x2x2x64xbf16, #tpu.memory_space<vmem>>, vector<1x2x2x2x64xbf16>,
    %c0_i32_28 = arith.constant 0 : i32
    %70 = vector.broadcast %c0_i32_28 : i32 to vector<1x2x2x1xi32>
    %71 = arith.cmpi sge, %4, %70 : vector<1x2x2x1xi32>
    %c1_i32_29 = arith.constant 1 : i32
    %72 = vector.broadcast %c1_i32_29 : i32 to vector<1x2x2x1xi32>
    %73 = arith.cmpi slt, %4, %72 : vector<1x2x2x1xi32>
    %74 = arith.andi %71, %73 : vector<1x2x2x1xi1>
    %c1_i32_30 = arith.constant 1 : i32
    %75 = vector.broadcast %c1_i32_30 : i32 to vector<1x2x2x1xi32>
    %76 = arith.cmpi sge, %5, %75 : vector<1x2x2x1xi32>
    %77 = arith.andi %74, %76 : vector<1x2x2x1xi1>
    %c2_i32_31 = arith.constant 2 : i32
    %78 = vector.broadcast %c2_i32_31 : i32 to vector<1x2x2x1xi32>
    %79 = arith.cmpi slt, %5, %78 : vector<1x2x2x1xi32>
    %80 = arith.andi %77, %79 : vector<1x2x2x1xi1>
    %81 = arith.extui %80 : vector<1x2x2x1xi1> to vector<1x2x2x1xi32>
    %82 = arith.sitofp %81 : vector<1x2x2x1xi32> to vector<1x2x2x1xf32>
    %c2 = arith.constant 2 : index
    %c0_32 = arith.constant 0 : index
    %c0_33 = arith.constant 0 : index
    %c0_34 = arith.constant 0 : index
    %c0_35 = arith.constant 0 : index
    %83 = vector.load %arg1[%c2, %c0_32, %c0_33, %c0_34, %c0_35] : memref<4x2x2x2x64xbf16, #tpu.memory_space<vmem>>, vector<1x2x2x2x64xbf16>
    %84 = vector.shape_cast %83 : vector<1x2x2x2x64xbf16> to vector<2x2x2x64xbf16>
    %85 = arith.extf %84 : vector<2x2x2x64xbf16> to vector<2x2x2x64xf32>
    %86 = vector.broadcast %1 : vector<1x1x1x64xf32> to vector<2x2x2x64xf32>
    %87 = arith.mulf %85, %86 : vector<2x2x2x64xf32>
    %88 = vector.broadcast %3 : vector<1x1x1x64xf32> to vector<2x2x2x64xf32>
    %89 = arith.addf %87, %88 : vector<2x2x2x64xf32>
    %90 = arith.negf %89 : vector<2x2x2x64xf32>
    %91 = math.exp %90 : vector<2x2x2x64xf32>
    %cst_36 = arith.constant 1.000000e+00 : f32
    %92 = vector.broadcast %cst_36 : f32 to vector<2x2x2x64xf32>
    %93 = arith.addf %92, %91 : vector<2x2x2x64xf32>
    %94 = arith.divf %92, %93 : vector<2x2x2x64xf32>
    %95 = arith.mulf %89, %94 : vector<2x2x2x64xf32>
    %96 = vector.broadcast %82 : vector<1x2x2x1xf32> to vector<2x2x2x64xf32>
    %97 = arith.mulf %95, %96 : vector<2x2x2x64xf32>
    %98 = arith.truncf %97 : vector<2x2x2x64xf32> to vector<2x2x2x64xbf16>
    %c2_37 = arith.constant 2 : index
    %c0_38 = arith.constant 0 : index
    %c0_39 = arith.constant 0 : index
    %c0_40 = arith.constant 0 : index
    %c0_41 = arith.constant 0 : index
    %99 = vector.load %arg9[%c2_37, %c0_38, %c0_39, %c0_40, %c0_41] : memref<4x2x2x2x64xbf16, #tpu.memory_space<vmem>>, vector<1x2x2x2x64xbf16>
    %100 = vector.shape_cast %99 : vector<1x2x2x2x64xbf16> to vector<2x2x2x64xbf16>
    %101 = vector.shape_cast %98 : vector<2x2x2x64xbf16> to vector<1x2x2x2x64xbf16>
    tpu.vector_store %arg9[%c2_37, %c0_38, %c0_39, %c0_40, %c0_41], %101 {strides = array<i32>} : memref<4x2x2x2x64xbf16, #tpu.memory_space<vmem>>, vector<1x2x2x2x64xbf16>,
    %c0_i32_42 = arith.constant 0 : i32
    %102 = vector.broadcast %c0_i32_42 : i32 to vector<1x2x2x1xi32>
    %103 = arith.cmpi sge, %4, %102 : vector<1x2x2x1xi32>
    %c1_i32_43 = arith.constant 1 : i32
    %104 = vector.broadcast %c1_i32_43 : i32 to vector<1x2x2x1xi32>
    %105 = arith.cmpi slt, %4, %104 : vector<1x2x2x1xi32>
    %106 = arith.andi %103, %105 : vector<1x2x2x1xi1>
    %c0_i32_44 = arith.constant 0 : i32
    %107 = vector.broadcast %c0_i32_44 : i32 to vector<1x2x2x1xi32>
    %108 = arith.cmpi sge, %5, %107 : vector<1x2x2x1xi32>
    %109 = arith.andi %106, %108 : vector<1x2x2x1xi1>
    %c1_i32_45 = arith.constant 1 : i32
    %110 = vector.broadcast %c1_i32_45 : i32 to vector<1x2x2x1xi32>
    %111 = arith.cmpi slt, %5, %110 : vector<1x2x2x1xi32>
    %112 = arith.andi %109, %111 : vector<1x2x2x1xi1>
    %113 = arith.extui %112 : vector<1x2x2x1xi1> to vector<1x2x2x1xi32>
    %114 = arith.sitofp %113 : vector<1x2x2x1xi32> to vector<1x2x2x1xf32>
    %c3 = arith.constant 3 : index
    %c0_46 = arith.constant 0 : index
    %c0_47 = arith.constant 0 : index
    %c0_48 = arith.constant 0 : index
    %c0_49 = arith.constant 0 : index
    %115 = vector.load %arg1[%c3, %c0_46, %c0_47, %c0_48, %c0_49] : memref<4x2x2x2x64xbf16, #tpu.memory_space<vmem>>, vector<1x2x2x2x64xbf16>
    %116 = vector.shape_cast %115 : vector<1x2x2x2x64xbf16> to vector<2x2x2x64xbf16>
    %117 = arith.extf %116 : vector<2x2x2x64xbf16> to vector<2x2x2x64xf32>
    %118 = vector.broadcast %1 : vector<1x1x1x64xf32> to vector<2x2x2x64xf32>
    %119 = arith.mulf %117, %118 : vector<2x2x2x64xf32>
    %120 = vector.broadcast %3 : vector<1x1x1x64xf32> to vector<2x2x2x64xf32>
    %121 = arith.addf %119, %120 : vector<2x2x2x64xf32>
    %122 = arith.negf %121 : vector<2x2x2x64xf32>
    %123 = math.exp %122 : vector<2x2x2x64xf32>
    %cst_50 = arith.constant 1.000000e+00 : f32
    %124 = vector.broadcast %cst_50 : f32 to vector<2x2x2x64xf32>
    %125 = arith.addf %124, %123 : vector<2x2x2x64xf32>
    %126 = arith.divf %124, %125 : vector<2x2x2x64xf32>
    %127 = arith.mulf %121, %126 : vector<2x2x2x64xf32>
    %128 = vector.broadcast %114 : vector<1x2x2x1xf32> to vector<2x2x2x64xf32>
    %129 = arith.mulf %127, %128 : vector<2x2x2x64xf32>
    %130 = arith.truncf %129 : vector<2x2x2x64xf32> to vector<2x2x2x64xbf16>
    %c3_51 = arith.constant 3 : index
    %c0_52 = arith.constant 0 : index
    %c0_53 = arith.constant 0 : index
    %c0_54 = arith.constant 0 : index
    %c0_55 = arith.constant 0 : index
    %131 = vector.load %arg9[%c3_51, %c0_52, %c0_53, %c0_54, %c0_55] : memref<4x2x2x2x64xbf16, #tpu.memory_space<vmem>>, vector<1x2x2x2x64xbf16>
    %132 = vector.shape_cast %131 : vector<1x2x2x2x64xbf16> to vector<2x2x2x64xbf16>
    %133 = vector.shape_cast %130 : vector<2x2x2x64xbf16> to vector<1x2x2x2x64xbf16>
    tpu.vector_store %arg9[%c3_51, %c0_52, %c0_53, %c0_54, %c0_55], %133 {strides = array<i32>} : memref<4x2x2x2x64xbf16, #tpu.memory_space<vmem>>, vector<1x2x2x2x64xbf16>,
    %c0_56 = arith.constant 0 : index
    %c0_57 = arith.constant 0 : index
    %c0_58 = arith.constant 0 : index
    %c0_59 = arith.constant 0 : index
    %c0_60 = arith.constant 0 : index
    %134 = vector.load %arg9[%c0_56, %c0_57, %c0_58, %c0_59, %c0_60] : memref<4x2x2x2x64xbf16, #tpu.memory_space<vmem>>, vector<1x2x1x1x64xbf16>
    %135 = vector.shape_cast %134 : vector<1x2x1x1x64xbf16> to vector<2x1x1x64xbf16>
    %136 = vector.shape_cast %135 : vector<2x1x1x64xbf16> to vector<2x64xbf16>
    %c0_61 = arith.constant 0 : index
    %c0_62 = arith.constant 0 : index
    %137 = vector.load %arg8[%c0_61, %c0_62] : memref<2x576xbf16, #tpu.memory_space<vmem>>, vector<2x64xbf16>
    tpu.vector_store %arg8[%c0_61, %c0_62], %136 {strides = array<i32>} : memref<2x576xbf16, #tpu.memory_space<vmem>>, vector<2x64xbf16>,
    %c1_63 = arith.constant 1 : index
    %c0_64 = arith.constant 0 : index
    %c0_65 = arith.constant 0 : index
    %c0_66 = arith.constant 0 : index
    %c0_67 = arith.constant 0 : index
    %138 = vector.load %arg9[%c1_63, %c0_64, %c0_65, %c0_66, %c0_67] : memref<4x2x2x2x64xbf16, #tpu.memory_space<vmem>>, vector<1x2x1x1x64xbf16>
    %139 = vector.shape_cast %138 : vector<1x2x1x1x64xbf16> to vector<2x1x1x64xbf16>
    %140 = vector.shape_cast %139 : vector<2x1x1x64xbf16> to vector<2x64xbf16>
    %c0_68 = arith.constant 0 : index
    %c64 = arith.constant 64 : index
    %141 = vector.load %arg8[%c0_68, %c64] : memref<2x576xbf16, #tpu.memory_space<vmem>>, vector<2x64xbf16>
    tpu.vector_store %arg8[%c0_68, %c64], %140 {strides = array<i32>} : memref<2x576xbf16, #tpu.memory_space<vmem>>, vector<2x64xbf16>,
    %c0_69 = arith.constant 0 : index
    %c0_70 = arith.constant 0 : index
    %c0_71 = arith.constant 0 : index
    %c1_72 = arith.constant 1 : index
    %c0_73 = arith.constant 0 : index
    %142 = vector.load %arg9[%c0_69, %c0_70, %c0_71, %c1_72, %c0_73] : memref<4x2x2x2x64xbf16, #tpu.memory_space<vmem>>, vector<1x2x1x1x64xbf16>
    %143 = vector.shape_cast %142 : vector<1x2x1x1x64xbf16> to vector<2x1x1x64xbf16>
    %144 = vector.shape_cast %143 : vector<2x1x1x64xbf16> to vector<2x64xbf16>
    %c0_74 = arith.constant 0 : index
    %c128 = arith.constant 128 : index
    %145 = vector.load %arg8[%c0_74, %c128] : memref<2x576xbf16, #tpu.memory_space<vmem>>, vector<2x64xbf16>
    tpu.vector_store %arg8[%c0_74, %c128], %144 {strides = array<i32>} : memref<2x576xbf16, #tpu.memory_space<vmem>>, vector<2x64xbf16>,
    %c2_75 = arith.constant 2 : index
    %c0_76 = arith.constant 0 : index
    %c0_77 = arith.constant 0 : index
    %c0_78 = arith.constant 0 : index
    %c0_79 = arith.constant 0 : index
    %146 = vector.load %arg9[%c2_75, %c0_76, %c0_77, %c0_78, %c0_79] : memref<4x2x2x2x64xbf16, #tpu.memory_space<vmem>>, vector<1x2x1x1x64xbf16>
    %147 = vector.shape_cast %146 : vector<1x2x1x1x64xbf16> to vector<2x1x1x64xbf16>
    %148 = vector.shape_cast %147 : vector<2x1x1x64xbf16> to vector<2x64xbf16>
    %c0_80 = arith.constant 0 : index
    %c192 = arith.constant 192 : index
    %149 = vector.load %arg8[%c0_80, %c192] : memref<2x576xbf16, #tpu.memory_space<vmem>>, vector<2x64xbf16>
    tpu.vector_store %arg8[%c0_80, %c192], %148 {strides = array<i32>} : memref<2x576xbf16, #tpu.memory_space<vmem>>, vector<2x64xbf16>,
    %c3_81 = arith.constant 3 : index
    %c0_82 = arith.constant 0 : index
    %c0_83 = arith.constant 0 : index
    %c0_84 = arith.constant 0 : index
    %c0_85 = arith.constant 0 : index
    %150 = vector.load %arg9[%c3_81, %c0_82, %c0_83, %c0_84, %c0_85] : memref<4x2x2x2x64xbf16, #tpu.memory_space<vmem>>, vector<1x2x1x1x64xbf16>
    %151 = vector.shape_cast %150 : vector<1x2x1x1x64xbf16> to vector<2x1x1x64xbf16>
    %152 = vector.shape_cast %151 : vector<2x1x1x64xbf16> to vector<2x64xbf16>
    %c0_86 = arith.constant 0 : index
    %c256 = arith.constant 256 : index
    %153 = vector.load %arg8[%c0_86, %c256] : memref<2x576xbf16, #tpu.memory_space<vmem>>, vector<2x64xbf16>
    tpu.vector_store %arg8[%c0_86, %c256], %152 {strides = array<i32>} : memref<2x576xbf16, #tpu.memory_space<vmem>>, vector<2x64xbf16>,
    %c2_87 = arith.constant 2 : index
    %c0_88 = arith.constant 0 : index
    %c0_89 = arith.constant 0 : index
    %c1_90 = arith.constant 1 : index
    %c0_91 = arith.constant 0 : index
    %154 = vector.load %arg9[%c2_87, %c0_88, %c0_89, %c1_90, %c0_91] : memref<4x2x2x2x64xbf16, #tpu.memory_space<vmem>>, vector<1x2x1x1x64xbf16>
    %155 = vector.shape_cast %154 : vector<1x2x1x1x64xbf16> to vector<2x1x1x64xbf16>
    %156 = vector.shape_cast %155 : vector<2x1x1x64xbf16> to vector<2x64xbf16>
    %c0_92 = arith.constant 0 : index
    %c320 = arith.constant 320 : index
    %157 = vector.load %arg8[%c0_92, %c320] : memref<2x576xbf16, #tpu.memory_space<vmem>>, vector<2x64xbf16>
    tpu.vector_store %arg8[%c0_92, %c320], %156 {strides = array<i32>} : memref<2x576xbf16, #tpu.memory_space<vmem>>, vector<2x64xbf16>,
    %c0_93 = arith.constant 0 : index
    %c0_94 = arith.constant 0 : index
    %c1_95 = arith.constant 1 : index
    %c0_96 = arith.constant 0 : index
    %c0_97 = arith.constant 0 : index
    %158 = vector.load %arg9[%c0_93, %c0_94, %c1_95, %c0_96, %c0_97] : memref<4x2x2x2x64xbf16, #tpu.memory_space<vmem>>, vector<1x2x1x1x64xbf16>
    %159 = vector.shape_cast %158 : vector<1x2x1x1x64xbf16> to vector<2x1x1x64xbf16>
    %160 = vector.shape_cast %159 : vector<2x1x1x64xbf16> to vector<2x64xbf16>
    %c0_98 = arith.constant 0 : index
    %c384 = arith.constant 384 : index
    %161 = vector.load %arg8[%c0_98, %c384] : memref<2x576xbf16, #tpu.memory_space<vmem>>, vector<2x64xbf16>
    tpu.vector_store %arg8[%c0_98, %c384], %160 {strides = array<i32>} : memref<2x576xbf16, #tpu.memory_space<vmem>>, vector<2x64xbf16>,
    %c1_99 = arith.constant 1 : index
    %c0_100 = arith.constant 0 : index
    %c1_101 = arith.constant 1 : index
    %c0_102 = arith.constant 0 : index
    %c0_103 = arith.constant 0 : index
    %162 = vector.load %arg9[%c1_99, %c0_100, %c1_101, %c0_102, %c0_103] : memref<4x2x2x2x64xbf16, #tpu.memory_space<vmem>>, vector<1x2x1x1x64xbf16>
    %163 = vector.shape_cast %162 : vector<1x2x1x1x64xbf16> to vector<2x1x1x64xbf16>
    %164 = vector.shape_cast %163 : vector<2x1x1x64xbf16> to vector<2x64xbf16>
    %c0_104 = arith.constant 0 : index
    %c448 = arith.constant 448 : index
    %165 = vector.load %arg8[%c0_104, %c448] : memref<2x576xbf16, #tpu.memory_space<vmem>>, vector<2x64xbf16>
    tpu.vector_store %arg8[%c0_104, %c448], %164 {strides = array<i32>} : memref<2x576xbf16, #tpu.memory_space<vmem>>, vector<2x64xbf16>,
    %c0_105 = arith.constant 0 : index
    %c0_106 = arith.constant 0 : index
    %c1_107 = arith.constant 1 : index
    %c1_108 = arith.constant 1 : index
    %c0_109 = arith.constant 0 : index
    %166 = vector.load %arg9[%c0_105, %c0_106, %c1_107, %c1_108, %c0_109] : memref<4x2x2x2x64xbf16, #tpu.memory_space<vmem>>, vector<1x2x1x1x64xbf16>
    %167 = vector.shape_cast %166 : vector<1x2x1x1x64xbf16> to vector<2x1x1x64xbf16>
    %168 = vector.shape_cast %167 : vector<2x1x1x64xbf16> to vector<2x64xbf16>
    %c0_110 = arith.constant 0 : index
    %c512 = arith.constant 512 : index
    %169 = vector.load %arg8[%c0_110, %c512] : memref<2x576xbf16, #tpu.memory_space<vmem>>, vector<2x64xbf16>
    tpu.vector_store %arg8[%c0_110, %c512], %168 {strides = array<i32>} : memref<2x576xbf16, #tpu.memory_space<vmem>>, vector<2x64xbf16>,
    %c0_111 = arith.constant 0 : index
    %c0_112 = arith.constant 0 : index
    %170 = vector.load %arg8[%c0_111, %c0_112] : memref<2x576xbf16, #tpu.memory_space<vmem>>, vector<2x576xbf16>
    %c0_113 = arith.constant 0 : index
    %c0_114 = arith.constant 0 : index
    %171 = vector.load %arg2[%c0_113, %c0_114] : memref<576x128xbf16, #tpu.memory_space<vmem>>, vector<576x128xbf16>
    %cst_115 = arith.constant dense<0.000000e+00> : vector<2x128xf32>
    %172 = tpu.matmul %170, %171, %cst_115 {dimension_numbers = #tpu.dot_dimension_numbers<[1], [0], [0], [1], [0, 0, 1, 1], [], []>} : vector<2x576xbf16>, vector<576x128xbf16>, vector<2x128xf32> -> vector<2x128xf32>
    %c0_116 = arith.constant 0 : index
    %c0_117 = arith.constant 0 : index
    %173 = vector.load %arg3[%c0_116, %c0_117] : memref<1x128xf32, #tpu.memory_space<vmem>>, vector<1x128xf32>
    %174 = vector.broadcast %173 : vector<1x128xf32> to vector<2x128xf32>
    %175 = arith.addf %172, %174 : vector<2x128xf32>
    %176 = arith.truncf %175 : vector<2x128xf32> to vector<2x128xbf16>
    %c0_118 = arith.constant 0 : index
    %c0_119 = arith.constant 0 : index
    %177 = vector.load %arg6[%c0_118, %c0_119] : memref<2x128xbf16, #tpu.memory_space<vmem>>, vector<2x128xbf16>
    tpu.vector_store %arg6[%c0_118, %c0_119], %176 {strides = array<i32>} : memref<2x128xbf16, #tpu.memory_space<vmem>>, vector<2x128xbf16>,
    %cst_120 = arith.constant dense<0.000000e+00> : vector<128xf32>
    %178 = vector.multi_reduction <add>, %175, %cst_120 [0] : vector<2x128xf32> to vector<128xf32>
    %179 = vector.shape_cast %178 : vector<128xf32> to vector<1x128xf32>
    %180 = vector.shape_cast %179 : vector<1x128xf32> to vector<1x1x128xf32>
    %c0_121 = arith.constant 0 : index
    %c0_122 = arith.constant 0 : index
    %c0_123 = arith.constant 0 : index
    %181 = vector.load %arg7[%c0_121, %c0_122, %c0_123] : memref<1x2x128xf32, #tpu.memory_space<vmem>>, vector<1x1x128xf32>
    tpu.vector_store %arg7[%c0_121, %c0_122, %c0_123], %180 {strides = array<i32>} : memref<1x2x128xf32, #tpu.memory_space<vmem>>, vector<1x1x128xf32>,
    %182 = arith.mulf %175, %175 : vector<2x128xf32>
    %cst_124 = arith.constant dense<0.000000e+00> : vector<128xf32>
    %183 = vector.multi_reduction <add>, %182, %cst_124 [0] : vector<2x128xf32> to vector<128xf32>
    %184 = vector.shape_cast %183 : vector<128xf32> to vector<1x128xf32>
    %185 = vector.shape_cast %184 : vector<1x128xf32> to vector<1x1x128xf32>
    %c0_125 = arith.constant 0 : index
    %c1_126 = arith.constant 1 : index
    %c0_127 = arith.constant 0 : index
    %186 = vector.load %arg7[%c0_125, %c1_126, %c0_127] : memref<1x2x128xf32, #tpu.memory_space<vmem>>, vector<1x1x128xf32>
    tpu.vector_store %arg7[%c0_125, %c1_126, %c0_127], %185 {strides = array<i32>} : memref<1x2x128xf32, #tpu.memory_space<vmem>>, vector<1x1x128xf32>,
    return
  }
  func.func @transform_0(%arg0: i32) -> (i32, i32, i32, i32, i32) {
    %c0_i32 = arith.constant 0 : i32
    %c0_i32_0 = arith.constant 0 : i32
    %c0_i32_1 = arith.constant 0 : i32
    %c0_i32_2 = arith.constant 0 : i32
    %c0_i32_3 = arith.constant 0 : i32
    return %c0_i32, %arg0, %c0_i32_0, %c0_i32_1, %c0_i32_2 : i32, i32, i32, i32, i32
  }
  func.func @transform_1(%arg0: i32) -> (i32, i32) {
    %c0_i32 = arith.constant 0 : i32
    %c0_i32_0 = arith.constant 0 : i32
    %c0_i32_1 = arith.constant 0 : i32
    return %c0_i32, %c0_i32_0 : i32, i32
  }
  func.func @transform_2(%arg0: i32) -> (i32, i32) {
    %c0_i32 = arith.constant 0 : i32
    %c0_i32_0 = arith.constant 0 : i32
    %c0_i32_1 = arith.constant 0 : i32
    return %c0_i32, %c0_i32_0 : i32, i32
  }
  func.func @transform_3(%arg0: i32) -> (i32, i32) {
    %c0_i32 = arith.constant 0 : i32
    %c0_i32_0 = arith.constant 0 : i32
    %c0_i32_1 = arith.constant 0 : i32
    return %c0_i32, %c0_i32_0 : i32, i32
  }
  func.func @transform_4(%arg0: i32) -> (i32, i32) {
    %c0_i32 = arith.constant 0 : i32
    %c0_i32_0 = arith.constant 0 : i32
    %c0_i32_1 = arith.constant 0 : i32
    return %c0_i32, %c0_i32_0 : i32, i32
  }
  func.func @transform_5(%arg0: i32) -> (i32, i32) {
    %c0_i32 = arith.constant 0 : i32
    %c0_i32_0 = arith.constant 0 : i32
    return %arg0, %c0_i32 : i32, i32
  }
  func.func @transform_6(%arg0: i32) -> (i32, i32, i32) {
    %c0_i32 = arith.constant 0 : i32
    %c0_i32_0 = arith.constant 0 : i32
    %c0_i32_1 = arith.constant 0 : i32
    return %arg0, %c0_i32, %c0_i32_0 : i32, i32, i32
  }
}

module attributes {stable_mosaic.version = 11 : i64} {
  func.func @_affine_silu_pool_kernel(%arg0: i32, %arg1: memref<2x1x128xbf16, #tpu.memory_space<vmem>>, %arg2: memref<1x128xf32, #tpu.memory_space<vmem>>, %arg3: memref<1x128xf32, #tpu.memory_space<vmem>>, %arg4: memref<2x128xf32, #tpu.memory_space<vmem>>) attributes {dimension_semantics = [#tpu.dimension_semantics<parallel>], iteration_bounds = array<i64: 1>, scalar_prefetch = 0 : i64, scratch_operands = 0 : i64, tpu.core_type = #tpu.core_type<tc>, window_params = [{transform_indices = @transform_0, window_bounds = array<i64: 2, 1, 128>}, {pipeline_mode = #tpu.pipeline_mode<synchronous>, transform_indices = @transform_1, window_bounds = array<i64: 1, 128>}, {pipeline_mode = #tpu.pipeline_mode<synchronous>, transform_indices = @transform_2, window_bounds = array<i64: 1, 128>}, {transform_indices = @transform_3, window_bounds = array<i64: 2, 128>}]} {
    %c0 = arith.constant 0 : index
    %c0_0 = arith.constant 0 : index
    %c0_1 = arith.constant 0 : index
    %0 = vector.load %arg1[%c0, %c0_0, %c0_1] : memref<2x1x128xbf16, #tpu.memory_space<vmem>>, vector<2x1x128xbf16>
    %1 = arith.extf %0 : vector<2x1x128xbf16> to vector<2x1x128xf32>
    %c0_2 = arith.constant 0 : index
    %c0_3 = arith.constant 0 : index
    %2 = vector.load %arg2[%c0_2, %c0_3] : memref<1x128xf32, #tpu.memory_space<vmem>>, vector<1x128xf32>
    %3 = vector.shape_cast %2 : vector<1x128xf32> to vector<1x1x128xf32>
    %4 = vector.broadcast %3 : vector<1x1x128xf32> to vector<2x1x128xf32>
    %5 = arith.mulf %1, %4 : vector<2x1x128xf32>
    %c0_4 = arith.constant 0 : index
    %c0_5 = arith.constant 0 : index
    %6 = vector.load %arg3[%c0_4, %c0_5] : memref<1x128xf32, #tpu.memory_space<vmem>>, vector<1x128xf32>
    %7 = vector.shape_cast %6 : vector<1x128xf32> to vector<1x1x128xf32>
    %8 = vector.broadcast %7 : vector<1x1x128xf32> to vector<2x1x128xf32>
    %9 = arith.addf %5, %8 : vector<2x1x128xf32>
    %10 = arith.negf %9 : vector<2x1x128xf32>
    %11 = math.exp %10 : vector<2x1x128xf32>
    %cst = arith.constant 1.000000e+00 : f32
    %12 = vector.broadcast %cst : f32 to vector<2x1x128xf32>
    %13 = arith.addf %12, %11 : vector<2x1x128xf32>
    %14 = arith.divf %12, %13 : vector<2x1x128xf32>
    %15 = arith.mulf %9, %14 : vector<2x1x128xf32>
    %cst_6 = arith.constant dense<0.000000e+00> : vector<2x128xf32>
    %16 = vector.multi_reduction <add>, %15, %cst_6 [1] : vector<2x1x128xf32> to vector<2x128xf32>
    %cst_7 = arith.constant 1.000000e+00 : f32
    %17 = vector.broadcast %cst_7 : f32 to vector<2x128xf32>
    %18 = arith.divf %16, %17 : vector<2x128xf32>
    %c0_8 = arith.constant 0 : index
    %c0_9 = arith.constant 0 : index
    %19 = vector.load %arg4[%c0_8, %c0_9] : memref<2x128xf32, #tpu.memory_space<vmem>>, vector<2x128xf32>
    tpu.vector_store %arg4[%c0_8, %c0_9], %18 {strides = array<i32>} : memref<2x128xf32, #tpu.memory_space<vmem>>, vector<2x128xf32>,
    return
  }
  func.func @transform_0(%arg0: i32) -> (i32, i32, i32) {
    %c0_i32 = arith.constant 0 : i32
    %c0_i32_0 = arith.constant 0 : i32
    %c0_i32_1 = arith.constant 0 : i32
    return %arg0, %c0_i32, %c0_i32_0 : i32, i32, i32
  }
  func.func @transform_1(%arg0: i32) -> (i32, i32) {
    %c0_i32 = arith.constant 0 : i32
    %c0_i32_0 = arith.constant 0 : i32
    %c0_i32_1 = arith.constant 0 : i32
    return %c0_i32, %c0_i32_0 : i32, i32
  }
  func.func @transform_2(%arg0: i32) -> (i32, i32) {
    %c0_i32 = arith.constant 0 : i32
    %c0_i32_0 = arith.constant 0 : i32
    %c0_i32_1 = arith.constant 0 : i32
    return %c0_i32, %c0_i32_0 : i32, i32
  }
  func.func @transform_3(%arg0: i32) -> (i32, i32) {
    %c0_i32 = arith.constant 0 : i32
    %c0_i32_0 = arith.constant 0 : i32
    return %arg0, %c0_i32 : i32, i32
  }
}

</mosaic_0001>

<bundles_post_ra>
// kernel: discriminator_forward.6
= control target key start
LH: loop header
LB: loop body
LE: loop exit
PB: predicated region body
PF: predicated region fallthrough
CT: control target
= control target key end

     0   :  { %10 = vsyncpa [#allocation4], 0  ;;  %s1886_s0 = inlined_call_operand.hbm [shape: bf16[4,2,5,5,16], index: 0, kind: input, shape index: {}]   ;;  %s1887_s1 = inlined_call_operand.hbm [shape: bf16[144,32], index: 1, kind: input, shape index: {}]   ;;  %s1888_s2 = inlined_call_operand.hbm [shape: f32[1,32], index: 2, kind: input, shape index: {}]   ;;  %s1889_s3 = inlined_call_operand.hbm [shape: bf16[32,32], index: 3, kind: output, shape index: {0}]   ;;  %s1890_s4 = inlined_call_operand.hbm [shape: f32[2,2,32], index: 4, kind: output, shape index: {1}]  }
   0x1   :  { %12 = vsyncpa [#allocation4 + $0x1], 0 }
   0x2   :  { %13 = vsyncpa [#allocation7], 0 }
   0x3   :  { %14 = vsyncpa [#allocation5], 0 }
   0x4   :  { %16 = vsyncpa [#allocation5 + $0x1], 0 }
   0x5   :  { %17 = vsyncpa [#allocation11], 0 }
   0x6   :  { %19 = vsyncpa [#allocation11 + $0x1], 0  ;;  %s1549_s15 = smov 0   ;;  %s1551_s16 = smov 0  }
   0x7   :  { %s1553_s17 = smov 0   ;;  %s1555_s18 = smov 0  }
   0x8 LB: > { %s1570_s19 = sadd.s32 4294967295, %s1500_s18   ;;  %s1138_s20 = sadd.s32 4294967294, %s1500_s18   ;;  %s1500_s18 = sphi %s1555_s18, %s1916_s18   ;;  %s1496_s17 = sphi %s1553_s17, %s1915_s17   ;;  %s1492_s16 = sphi %s1551_s16, %s1914_s16   ;;  %s1488_s15 = sphi %s1549_s15, %s1913_s15  }
   0x9   : > { %s1574_s21 = sadd.s32 1, %s1500_s18   ;;  %s32_s22 = sadd.s32 1, %s1496_s17 }
   0xa   : > { %s29_s23 = ssub.s32 %s1500_s18, %s1574_s21  ;;  %p39_p0 = scmp.ne.s32.totalorder %s1496_s17, %s1492_s16 }
   0xb   : > { %p30_p1 = scmp.eq.s32.totalorder %s29_s23, 0  ;;  %p40_p2 = scmp.eq.s32.totalorder %s1500_s18, 0 }
   0xc   : > { %p45_p3 = scmp.ne.s32.totalorder %s1492_s16, %s1488_s15  ;;  %p1891_p4 = scmp.eq.s32.totalorder %s1570_s19, 0 }
   0xd   : > { %s1586_s24 = scalar_select %p30_p1, %s1496_s17, %s32_s22  }
   0xe   : > { %p1588_p5 = por %p40_p2, %p39_p0  ;;  %p1594_p6 = por %p1891_p4, %p45_p3 }
   0xf   : > { %p111_p7 = scmp.eq.s32.totalorder %s1570_s19, 1  ;;  %p117_p8 = scmp.eq.s32.totalorder %s1138_s20, 1 }
  0x10   : > { %s1896_s25 = scalar_select %p1588_p5, 1, 0 }
  0x11   : > { %s1897_s26 = scalar_select %p1594_p6, 1, 0 }
  0x12   : > { %p1139_p9 = scmp.ge.s32.totalorder %s1500_s18, 1  ;;  %p150_p10 = scmp.lt.s32.totalorder %s1500_s18, 3 }
  0x13   : > { %p1601_p11 = por %p111_p7, %p39_p0  ;;  %p1605_p12 = por %p117_p8, %p45_p3 }
  0x14   : > { %p1609_p13 = pnand %p1139_p9, %p150_p10  ;;  %s1502_s30 = smov [#allocation6]  }
  0x15   : > { %s1898_s27 = scalar_select %p1601_p11, 1, 0 }
  0x16   : > { %s1899_s28 = scalar_select %p1605_p12, 1, 0 }
  0x17   : > { %s1900_s29 = scalar_select %p1609_p13, 1, 0 }
  0x18   : > { %p1238_p1 = pneg %p1609_p13  ;;  %s162_s5 = sshll.u32 %s1502_s30, 4  ;;  %s163_s5 = int_to_ptr.vmem [resolvable:$true] %s162_s5 }
  0x19   : > { %s1503_s7 = smov [#allocation8]   ;;  %s1342_s11 = scalar_lea.hbm %s1887_s1, 1152 }
  0x1a   : > { %p1617_p2 = pnand %p1238_p1, %p1891_p4  ;;  %s176_s8 = sshll.u32 %s1503_s7, 4  ;;  %s1621_s8 = int_to_ptr.vmem [resolvable:$true] %s176_s8 }
  0x1b   : > { %p1343_p0 = scmp.ne.s32.totalorder %s1887_s1, %s1342_s11  ;;  %p1349_p9 = scmp.lt.u32.totalorder %s1342_s11, %s1887_s1 }
  0x1c   : > { %p1344_p3 = pneg %p1617_p2 }
  0x1e   : > { %p1345_p7 = pnand %p1344_p3, %p1343_p0 }
  0x20   : > { %p1346_p8 = pneg %p1345_p7 }
  0x22   : > { %p1351_p10 = pnand %p1349_p9, %p1346_p8 }
  0x24   : > { %1354 = shalt.err (!%p1351_p10)
}
  0x25   : > { %s1355_s22 = scalar_lea.vmem %s163_s5, 1152  ;;  %p1363_p11 = scmp.lt.s32.totalorder %s163_s5, %s163_s5 }
  0x26   : > { %p1356_p1 = scmp.ne.s32.totalorder %s163_s5, %s1355_s22  ;;  %p1364_p6 = scmp.lt.s32.totalorder %s1355_s22, %s1355_s22 }
  0x28   : > { %p1358_p4 = pnand %p1356_p1, %p1344_p3  ;;  %p1365_p13 = por %p1364_p6, %p1363_p11 }
  0x2a   : > { %p1359_p12 = pneg %p1358_p4 }
  0x2c   : > { %p1366_p5 = pnand %p1365_p13, %p1359_p12 }
  0x2e   : > { %1369 = shalt.err (!%p1366_p5)
}
  0x2f   : > { %s1504_s23 = smov 64   ;;  %s1505_s30 = smov 4  }
  0x30   : > { %1241 = dma.hbm_to_vmem [thread:$0]  (!%p1617_p2), %s1887_s1, 1152, %s163_s5, [#allocation7], %s1504_s23, %s1504_s23, %s1505_s30  }
  0x31   : > { %s1370_s12 = scalar_lea.hbm %s1888_s2, 16 }
  0x32   : > { %p1371_p4 = scmp.ne.s32.totalorder %s1888_s2, %s1370_s12  ;;  %p1377_p11 = scmp.lt.u32.totalorder %s1370_s12, %s1888_s2 }
  0x34   : > { %p1373_p5 = pnand %p1371_p4, %p1344_p3 }
  0x36   : > { %p1374_p6 = pneg %p1373_p5 }
  0x38   : > { %p1379_p12 = pnand %p1377_p11, %p1374_p6 }
  0x3a   : > { %1382 = shalt.err (!%p1379_p12)
}
  0x3b   : > { %s1383_s5 = scalar_lea.vmem %s1621_s8, 16  ;;  %s1390_s23 = scalar_lea.vmem %s1621_s8, 32 }
  0x3c   : > { %p1384_p13 = scmp.ne.s32.totalorder %s1621_s8, %s1383_s5  ;;  %p1391_p8 = scmp.lt.s32.totalorder %s1621_s8, %s1621_s8 }
  0x3d   : > { %p1392_p9 = scmp.lt.s32.totalorder %s1390_s23, %s1383_s5 }
  0x3e   : > { %p1386_p0 = pnand %p1384_p13, %p1344_p3 }
  0x3f   : > { %p1393_p10 = por %p1392_p9, %p1391_p8 }
  0x40   : > { %p1387_p7 = pneg %p1386_p0 }
  0x42   : > { %p1394_p1 = pnand %p1393_p10, %p1387_p7 }
  0x44   : > { %1397 = shalt.err (!%p1394_p1)
}
  0x45   : > { %1244 = dma.hbm_to_vmem [thread:$0]  (!%p1617_p2), %s1888_s2, 16, %s1621_s8, [#allocation7]  }
  0x46   : > { %p1142_p4 = scmp.ge.s32.totalorder %s1500_s18, 2 }
  0x48   : > { %183 = sbr.rel (%p1142_p4) target bundleno = 95 (0x5f), region = 24 }
  0x4f   : > { %s187_s9 = sand.u32 1, %s1496_s17   ;;  %s1215_s10 = smul.u32 320, %s1500_s18 }
  0x50   : > { %s1214_s6 = smul.u32 80, %s187_s9  ;;  %s1506_s11 = smov 640  }
  0x51   : > { %p1902_p3 = scmp.ne.s32.totalorder %s1896_s25, 0  ;;  %s197_s14 = scalar_lea.hbm %s1886_s0, %s1215_s10 }
  0x52   : > { %s191_s22 = scalar_lea.vmem [#allocation3], %s1214_s6  ;;  %s1507_s23 = smov 320  }
  0x53   : > { %1222 = sst [smem:[#allocation13]] (%p1902_p3), %s1506_s11  ;;  %s210_s5 = sshll.u32 %s191_s22, 4  ;;  %s211_s5 = int_to_ptr.vmem [resolvable:$true] %s210_s5 }
  0x54   : > { %s1221_s8 = scalar_select %p1902_p3, [#allocation0], [#allocation14] }
  0x55   : > { %1223 = sst [smem:[#allocation13 + $0x1]] (%p1902_p3), %s1507_s23  ;;  %s1508_s30 = smov 5  }
  0x56   : > { %s202_s20 = sld [smem:[%s1221_s8]]   ;;  %s1509_s7 = smov 64  }
  0x57   : > { %1224 = sst [smem:[#allocation13 + $0x2]] (%p1902_p3), %s1508_s30  ;;  %s1510_s11 = smov 4  }
  0x58   : > { %1225 = sst [smem:[#allocation13 + $0x3]] (%p1902_p3), %s1509_s7  ;;  %s188_s6 = scalar_lea.sflag [#allocation4], %s187_s9 }
  0x59   : > { %1226 = sst [smem:[#allocation13 + $0x4]] (%p1902_p3), %s1509_s7  ;;  %s1511_s12 = smov [#allocation12]  }
  0x5a   : > { %1227 = sst [smem:[#allocation13 + $0x5]] (%p1902_p3), %s1510_s11 }
  0x5c   : > { %s1144_s10 = sshll.u32 %s202_s20, 26 }
  0x5d   : > { %s1145_s8 = sadd.s32 134217728, %s1144_s10 }
  0x5e   : > { %1228 = dma.general (%p1902_p3), %s197_s14, 1280, %s211_s5, %s188_s6, %s1511_s12, [#allocation13], %s1145_s8, 0  }
  0x5f PF: > { %p1903_p2 = scmp.ne.s32.totalorder %s1900_s29, 0 }
  0x60   : > { %s1698_s13 = sand.u32 (!%p1903_p2), 1, %s1492_s16   ;;  %p1904_p5 = scmp.ne.s32.totalorder (!%p1903_p2), %s1897_s26, 0 }
  0x61   : > { %235 = sbr.rel (%p1903_p2) target bundleno = 536 (0x218), region = 32  ;;  %s238_s23 = scalar_lea.sflag (!%p1903_p2), [#allocation4], %s1698_s13 }
  0x62   : > { %s1216_s22 = smul.u32 (!%p1903_p2), 80, %s1698_s13 }
  0x64   : > { %s1702_s30 = scalar_lea.vmem (!%p1903_p2), [#allocation3], %s1216_s22 }
  0x68   : > { %1471 = dma.done.wait (%p1904_p5), %s238_s23, 1280  }
  0x69   : > { %1473 = vsyncadd (%p1904_p5), %s238_s23, 4294966016  ;;  %p1905_p6 = scmp.eq.s32.totalorder %s1570_s19, 0 }
  0x6b   : > { %1475 = dma.done.wait (%p1905_p6), [#allocation7], 1168   ;;  %p1906_p11 = pmov %p1905_p6 }
  0x6c   : > { %v294_v0 = vlaneseq  ;;  %v1512_v1 = vmov 1983009808   ;;  %v1513_v5 = vmov 0   ;;  %vm380_vm0 = vsmask.f32 1280  ;;  %s1514_s25 = smov 16  }
  0x6d   : > { %1477 = vsyncadd (%p1906_p11), [#allocation7], 4294966128  ;;  %v292_v2 = vunpack.c.l.s4 %v1512_v1  ;;  %906 = vmatprep.subr.bf16.mxu0 %v1513_v5  ;;  %vm381_vm1 = vsmask.f32 3336  ;;  %vm383_vm2 = vsmask.f32 5392 }
  0x6e   : > { %v295_v3 = vshrl.u32 %v294_v0, 7  ;;  %vm385_vm3 = vsmask.f32 7448  ;;  %vm382_vm4 = vmor %vm380_vm0, %vm381_vm1  ;;  %v1319_v29 = vld [vmem:[#allocation6] sm:$0xff]   ;;  %s1515_s26 = smov 48   ;;  %v1320_v39 = vld [vmem:[#allocation6 + $0x8] sm:$0xff]  }
  0x6f   : > { %v293_v4 = vunpack.c.0.s8 %v292_v2  ;;  %v1330_v7 = vld.sshfl [vmem:[%s1702_s30 + $0x14] sm:$0xf pattern:$0x76325410]  ;;  %vm1724_vm5 = vmor %vm382_vm4, %vm383_vm2  ;;  %907 = vmatpush1.bf16.msra.mxu0 %v1319_v29  ;;  %s1516_s29 = smov 64   ;;  %s1517_s9 = smov 32  }
  0x70   : > { %v1331_v8 = vld.sshfl [vmem:[%s1702_s30 + $0x1c] sm:$0xf pattern:$0x76325410]  ;;  %vm1732_vm6 = vmor %vm1724_vm5, %vm385_vm3  ;;  %908 = vmatprep.subr.bf16.mxu0 %v1513_v5  ;;  %s1518_s14 = smov 96   ;;  %vm307_vm7 = vcmask 130048  }
  0x71   : > { %v1713_v6 = vsub.s32 %v293_v4, %v295_v3  ;;  %v1332_v9 = vld.sshfl [vmem:[%s1702_s30 + $0x28] sm:$0xf pattern:$0x76325410]  ;;  %v334_v12 = vcombine.low %v1330_v7, %v1331_v8  ;;  %v1321_v57 = vld [vmem:[#allocation6 + $0x10] sm:$0xff]   ;;  %s1519_s20 = smov 80  }
  0x72   : > { %v1333_v10 = vld.sshfl [vmem:[%s1702_s30 + $0x30] sm:$0xf pattern:$0x76325410]  ;;  %v1322_v4 = vld [vmem:[#allocation6 + $0x18] sm:$0xff]   ;;  %s1520_s5 = smov 112  }
  0x73   : > { %v1155_v11 = vld.sshfl [vmem:[%s1702_s30] sm:$0x13 pattern:$0x76325410]  ;;  %335 = vrot.lane.b32.xlu0 %v334_v12, %s1514_s25  ;;  %v490_v19 = vcombine.low %v1332_v9, %v1333_v10  ;;  %909 = vmatpush1.bf16.msra.mxu0 %v1320_v39  ;;  %vm338_vm8 = vcmask 261248   ;;  %vm463_vm9 = vcmask 392448  }
  0x74   : > { %v1156_v13 = vld.sshfl [vmem:[%s1702_s30 + $0x4] sm:$0x13 pattern:$0x76325410]  ;;  %v355_v14 = vcombine.high %v1155_v11, %v1155_v11  ;;  %v388_v17 = vshrl.u32 %v1155_v11, 16  ;;  %v391_v18 = vshll.u32 %v1155_v11, 16  ;;  %910 = vmatprep.subr.bf16.mxu0 %v1513_v5 }
  0x75   : > { %v1157_v15 = vld.sshfl [vmem:[%s1702_s30 + $0x8] sm:$0x13 pattern:$0x76325410]  ;;  %v363_v16 = vcombine.high %v1156_v13, %v1156_v13  ;;  %v402_v23 = vshrl.u32 %v1156_v13, 16  ;;  %v405_v28 = vshll.u32 %v1156_v13, 16  ;;  %491 = vrot.lane.b32.xlu1 %v490_v19, %s1515_s26 }
  0x76   : > { %v1158_v20 = vld.sshfl [vmem:[%s1702_s30 + $0xc] sm:$0x13 pattern:$0x76325410]  ;;  %v371_v21 = vcombine.high %v1157_v15, %v1157_v15  ;;  %v397_v22 = vshll.u32 %v355_v14, 16  ;;  %v390_v26 = vrot.slane %v388_v17, 6 }
  0x77   : > { %v379_v24 = vcombine.high %v1158_v20, %v1158_v20  ;;  %v393_v27 = vrot.slane %v391_v18, 7  ;;  %v404_v31 = vrot.slane %v402_v23, 6  ;;  %v411_v32 = vshll.u32 %v363_v16, 16  ;;  %911 = vmatpush1.bf16.msra.mxu0 %v1321_v57  ;;  %s1149_s7 = sshll.u32 %s1698_s13, 3  ;;  %s1213_s11 = sshll.u32 %s1570_s19, 7 }
  0x78   : > { %v399_v30 = vrot.slane %v397_v22, 7  ;;  %v416_v33 = vshrl.u32 %v1157_v15, 16  ;;  %v407_v35 = vrot.slane %v405_v28, 7  ;;  %v419_v36 = vshll.u32 %v1157_v15, 16  ;;  %912 = vmatprep.subr.bf16.mxu0 %v1513_v5  ;;  %s271_s10 = scalar_lea.vmem [#allocation9], %s1149_s7  ;;  %s1801_s22 = scalar_lea.hbm %s1889_s3, %s1213_s11 }
  0x79   : > { %v394_v34 = vor.u32 %v393_v27, %v390_v26  ;;  %v425_v37 = vshll.u32 %v371_v21, 16  ;;  %v1334_v38 = vld.sshfl [vmem:[%s1702_s30 + $0x3c] sm:$0xf pattern:$0x76325410]  ;;  %v413_v41 = vrot.slane %v411_v32, 7 }
  0x7a   : > { %v418_v42 = vrot.slane %v416_v33, 6  ;;  %v430_v43 = vshrl.u32 %v1158_v20, 16  ;;  %v433_v44 = vshll.u32 %v1158_v20, 16  ;;  %v408_v47 = vor.u32 %v407_v35, %v404_v31  ;;  %v1323_v26 = vld [vmem:[#allocation6 + $0x20] sm:$0xff]   ;;  %s1001_s8 = sshll.u32 %s271_s10, 4  ;;  %s983_s23 = scalar_lea.sflag [#allocation5], %s1698_s13  ;;  %s1806_s8 = int_to_ptr.vmem [resolvable:$true] %s1001_s8 }
  0x7b   : > { %v1335_v45 = vld.sshfl [vmem:[%s1702_s30 + $0x44] sm:$0xf pattern:$0x76325410]  ;;  %v395_v46 = vrot.slane %v394_v34, 2  ;;  %v421_v48 = vrot.slane %v419_v36, 7  ;;  %913 = vmatpush1.bf16.msra.mxu0 %v1322_v4 }
  0x7c   : > { %v427_v49 = vrot.slane %v425_v37, 7  ;;  %v432_v50 = vrot.slane %v430_v43, 6  ;;  %v435_v51 = vrot.slane %v433_v44, 7  ;;  %v439_v52 = vshll.u32 %v379_v24, 16  ;;  %914 = vmatprep.subr.bf16.mxu0 %v1513_v5  ;;  %p1911_p13 = scmp.ne.s32.totalorder %s1898_s27, 0  ;;  %s1521_s25 = smov [#allocation9]  }
  0x7d   : > { %v400_v53 = vsel %vm1732_vm6, %v395_v46, %v399_v30  ;;  %v409_v54 = vrot.slane %v408_v47, 2  ;;  %v422_v55 = vor.u32 %v421_v48, %v418_v42  ;;  %v1171_v56 = vld.sshfl [vmem:[%s1702_s30 + $0x28] sm:$0x13 pattern:$0x76325410]  ;;  %v521_v1 = vcombine.low %v1334_v38, %v1335_v45  ;;  %s1402_s26 = sshll.u32 %s1521_s25, 4  ;;  %s1403_s26 = int_to_ptr.vmem [resolvable:$false] %s1402_s26 }
  0x7e   : > { %v436_v58 = vor.u32 %v435_v51, %v432_v50  ;;  %v441_v59 = vrot.slane %v439_v52, 7  ;;  %v1172_v60 = vld.sshfl [vmem:[%s1702_s30 + $0x2c] sm:$0x13 pattern:$0x76325410]  ;;  %v542_v61 = vcombine.high %v1171_v56, %v1171_v56  ;;  %v568_v62 = vshrl.u32 %v1171_v56, 16  ;;  %p1405_p8 = scmp.lt.s32.totalorder %s1806_s8, %s1403_s26 }
  0x7f   : > { %v1745_v63 = vsel %vm1732_vm6, %v409_v54, %v413_v41  ;;  %v423_v0 = vrot.slane %v422_v55, 2  ;;  %v1173_v2 = vld.sshfl [vmem:[%s1702_s30 + $0x30] sm:$0x13 pattern:$0x76325410]  ;;  %v550_v3 = vcombine.high %v1172_v60, %v1172_v60  ;;  %522 = vrot.lane.b32.xlu1 %v521_v1, %s1516_s29  ;;  %v571_v14 = vshll.u32 %v1171_v56, 16  ;;  %915 = vmatpush1.bf16.msra.mxu0 %v1323_v26 }
  0x80   : > { %v437_v7 = vrot.slane %v436_v58, 2  ;;  %v443_v8 = vcombine.low %v400_v53, %v1745_v63  ;;  %v1174_v9 = vld.sshfl [vmem:[%s1702_s30 + $0x34] sm:$0x13 pattern:$0x76325410]  ;;  %v558_v10 = vcombine.high %v1173_v2, %v1173_v2  ;;  %v570_v11 = vrot.slane %v568_v62, 6  ;;  %916 = vmatprep.subr.bf16.mxu0 %v1513_v5 }
  0x81   : > { %v1752_v12 = vsel %vm1732_vm6, %v423_v0, %v427_v49  ;;  %v566_v13 = vcombine.high %v1174_v9, %v1174_v9  ;;  %v577_v15 = vshll.u32 %v542_v61, 16  ;;  %v582_v18 = vshrl.u32 %v1172_v60, 16  ;;  %v1336_v24 = vld.sshfl [vmem:[%s1702_s30 + $0x4] sm:$0xf pattern:$0x76325410] }
  0x82   : > { %v1757_v16 = vsel %vm1732_vm6, %v437_v7, %v441_v59  ;;  %v451_v17 = vrot.slane %v443_v8, %v1713_v6  ;;  %v585_v19 = vshll.u32 %v1172_v60, 16  ;;  %v573_v21 = vrot.slane %v571_v14, 7  ;;  %v1337_v25 = vld.sshfl [vmem:[%s1702_s30 + $0xc] sm:$0xf pattern:$0x76325410] }
  0x83   : > { %v444_v20 = vcombine.low %v1752_v12, %v1757_v16  ;;  %v579_v22 = vrot.slane %v577_v15, 7  ;;  %v591_v23 = vshll.u32 %v550_v3, 16  ;;  %v584_v27 = vrot.slane %v582_v18, 6  ;;  %v1324_v50 = vld [vmem:[#allocation6 + $0x28] sm:$0xff]   ;;  %v1325_v61 = vld [vmem:[#allocation6 + $0x30] sm:$0xff]   ;;  %v1326_v0 = vld [vmem:[#allocation6 + $0x38] sm:$0xff]  }
  0x84   : > { %v587_v28 = vrot.slane %v585_v19, 7  ;;  %v596_v29 = vshrl.u32 %v1173_v2, 16  ;;  %v599_v30 = vshll.u32 %v1173_v2, 16  ;;  %v574_v32 = vor.u32 %v573_v21, %v570_v11  ;;  %917 = vmatpush1.bf16.msra.mxu0 %v1324_v50  ;;  %v1327_v11 = vld [vmem:[#allocation6 + $0x40] sm:$0xff]  }
  0x85   : > { %v458_v31 = vrot.slane %v444_v20, %v1713_v6  ;;  %v593_v33 = vrot.slane %v591_v23, 7  ;;  %v605_v34 = vshll.u32 %v558_v10, 16  ;;  %v610_v38 = vshrl.u32 %v1174_v9, 16  ;;  %918 = vmatprep.subr.bf16.mxu0 %v1513_v5 }
  0x86   : > { %v588_v35 = vor.u32 %v587_v28, %v584_v27  ;;  %v598_v36 = vrot.slane %v596_v29, 6  ;;  %v601_v37 = vrot.slane %v599_v30, 7  ;;  %v575_v41 = vrot.slane %v574_v32, 2 }
  0x87   : > { %v459_v39 = vcombine.low %v451_v17, %v458_v31  ;;  %v607_v42 = vrot.slane %v605_v34, 7  ;;  %v613_v43 = vshll.u32 %v1174_v9, 16  ;;  %v612_v46 = vrot.slane %v610_v38, 6 }
  0x88   : > { %v589_v44 = vrot.slane %v588_v35, 2  ;;  %v602_v45 = vor.u32 %v601_v37, %v598_v36  ;;  %v619_v47 = vshll.u32 %v566_v13, 16  ;;  %v580_v48 = vsel %vm1732_vm6, %v575_v41, %v579_v22  ;;  %v1338_v57 = vld.sshfl [vmem:[%s1702_s30 + $0x18] sm:$0xf pattern:$0x76325410]  ;;  %919 = vmatpush1.bf16.msra.mxu0 %v1325_v61 }
  0x89   : > { %460 = vrot.lane.b32.xlu0 %v459_v39, %s1517_s9  ;;  %v615_v49 = vrot.slane %v613_v43, 7  ;;  %v670_v55 = vcombine.low %v1336_v24, %v1337_v25  ;;  %v1339_v58 = vld.sshfl [vmem:[%s1702_s30 + $0x20] sm:$0xf pattern:$0x76325410]  ;;  %920 = vmatprep.subr.bf16.mxu0 %v1513_v5  ;;  %v803_v23 = vcombine.low %v1745_v63, %v1752_v12  ;;  %vm494_vm10 = vcmask 523648  }
  0x8a   : > { %v594_v51 = vsel %vm1732_vm6, %v589_v44, %v593_v33  ;;  %v603_v52 = vrot.slane %v602_v45, 2  ;;  %v621_v53 = vrot.slane %v619_v47, 7  ;;  %v1340_v3 = vld.sshfl [vmem:[%s1702_s30] sm:$0xf pattern:$0x76325410]  ;;  %v701_v17 = vcombine.low %v1338_v57, %v1339_v58 }
  0x8b   : > { %v616_v54 = vor.u32 %v615_v49, %v612_v46  ;;  %v623_v56 = vcombine.low %v580_v48, %v594_v51  ;;  %671 = vrot.lane.b32.xlu1 %v670_v55, %s1518_s14  ;;  %v1341_v4 = vld.sshfl [vmem:[%s1702_s30 + $0x8] sm:$0xf pattern:$0x76325410]  ;;  %vm525_vm11 = vcmask 654848   ;;  %vm643_vm12 = vcmask 786048  }
  0x8c   : > { %v608_v59 = vsel %vm1732_vm6, %v603_v52, %v607_v42  ;;  %v1190_v8 = vld.sshfl [vmem:[%s1702_s30 + $0x10] sm:$0x13 pattern:$0x76325410]  ;;  %921 = vmatpush1.bf16.msra.mxu0 %v1326_v0  ;;  %v305_v13 = vcombine.low %v1340_v3, %v1341_v4  ;;  %vm674_vm13 = vcmask 917248   ;;  %vm705_vm14 = vcmask 1048448  }
  0x8d   : > { %v617_v60 = vrot.slane %v616_v54, 2  ;;  %v631_v2 = vrot.slane %v623_v56, %v1713_v6  ;;  %v746_v10 = vcombine.high %v1190_v8, %v1190_v8  ;;  %v790_v14 = vshrl.u32 %v1190_v8, 16  ;;  %922 = vmatprep.subr.bf16.mxu0 %v1513_v5  ;;  %v1191_v33 = vld [vmem:[#allocation8] ss:$0 sm:$0xff]  ;;  %s1398_s30 = scalar_lea.vmem %s1806_s8, 128  ;;  %s1404_s9 = scalar_lea.vmem %s1403_s26, 256 }
  0x8e   : > { %v793_v15 = vshll.u32 %v1190_v8, 16  ;;  %308 = vst.msk [vmem:[#allocation2] sm:$0xff] %vm307_vm7, %v305_v13  ;;  %v811_v5 = vrot.slane %v803_v23, %v1713_v6  ;;  %vm955_vm15 = vcmask 257024   ;;  %vm958_vm0 = vcmask 261120   ;;  %p1399_p12 = scmp.ne.s32.totalorder %s1806_s8, %s1398_s30  ;;  %p1406_p9 = scmp.lt.s32.totalorder %s1404_s9, %s1398_s30 }
  0x8f   : > { %v622_v62 = vsel %vm1732_vm6, %v617_v60, %v621_v53  ;;  %v799_v18 = vshll.u32 %v746_v10, 16  ;;  %v792_v19 = vrot.slane %v790_v14, 6 }
  0x90   : > { %v624_v1 = vcombine.low %v608_v59, %v622_v62  ;;  %v795_v20 = vrot.slane %v793_v15, 7  ;;  %923 = vmatpush1.bf16.msra.mxu0 %v1327_v11  ;;  %p1400_p0 = pnand %p1399_p12, %p1911_p13  ;;  %p1407_p10 = por %p1406_p9, %p1405_p8 }
  0x91   : > { %v801_v22 = vrot.slane %v799_v18, 7 }
  0x92   : > { %v638_v7 = vrot.slane %v624_v1, %v1713_v6  ;;  %v796_v21 = vor.u32 %v795_v20, %v792_v19  ;;  %p1401_p7 = pneg %p1400_p0 }
  0x94   : > { %v639_v9 = vcombine.low %v631_v2, %v638_v7  ;;  %v797_v24 = vrot.slane %v796_v21, 2  ;;  %p1408_p1 = pnand %p1407_p10, %p1401_p7 }
  0x96   : > { %640 = vrot.lane.b32.xlu0 %v639_v9, %s1519_s20  ;;  %v802_v25 = vsel %vm1732_vm6, %v797_v24, %v801_v22 }
  0x97   : > { %v804_v26 = vcombine.low %v1757_v16, %v802_v25 }
  0x99   : > { %v818_v27 = vrot.slane %v804_v26, %v1713_v6 }
  0x9a   : > { %702 = vrot.lane.b32.xlu0 %v701_v17, %s1520_s5 }
  0x9b   : > { %v819_v28 = vcombine.low %v811_v5, %v818_v27 }
  0x9d   : > { %821 = vst.msk [vmem:[#allocation2 + $0x8] sm:$0xff] %vm307_vm7, %v819_v28 }
  0xa4   : > { %v823_v29 = vld [vmem:[#allocation2 + $0x8] sm:$0xff] }
  0xa5   : > { %1201 = vmatprep.mubr.msk.bf16.mxu0 %vm307_vm7, %v823_v29 }
  0xe5   : > { %v336_v30 = vpop.permute.xlu0 %335 }
  0xe6   : > { %339 = vst.msk [vmem:[#allocation2] sm:$0xff] %vm338_vm8, %v336_v30 }
  0xe7   : > { %v492_v63 = vpop.permute.xlu1 %491 }
  0xf1   : > { %v523_v12 = vpop.permute.xlu1 %522 }
  0xfb   : > { %v461_v40 = vpop.permute.xlu0 %460 }
  0xfc   : > { %464 = vst.msk [vmem:[#allocation2] sm:$0xff] %vm463_vm9, %v461_v40 }
  0xfd   : > { %495 = vst.msk [vmem:[#allocation2] sm:$0xff] %vm494_vm10, %v492_v63  ;;  %v672_v6 = vpop.permute.xlu1 %671 }
  0xfe   : > { %526 = vst.msk [vmem:[#allocation2] sm:$0xff] %vm525_vm11, %v523_v12 }
 0x108   : > { %v641_v16 = vpop.permute.xlu0 %640 }
 0x109   : > { %644 = vst.msk [vmem:[#allocation2] sm:$0xff] %vm643_vm12, %v641_v16 }
 0x10a   : > { %675 = vst.msk [vmem:[#allocation2] sm:$0xff] %vm674_vm13, %v672_v6 }
 0x10c   : > { %v703_v31 = vpop.permute.xlu0 %702 }
 0x10d   : > { %706 = vst.msk [vmem:[#allocation2] sm:$0xff] %vm705_vm14, %v703_v31 }
 0x114   : > { %v822_v32 = vld [vmem:[#allocation2] sm:$0xff] }
 0x115   : > { %939 = vmatmul.mubr.bf16.vlgmr.msra.gmra.mrb[0].mxu0 %v822_v32 }
 0x1e8   : > { %v940_v34 = vpop.f32.mrb[0].mxu0 }
 0x1e9   : > { %v941_v35 = vadd.f32 %v1191_v33, %v940_v34  ;;  %v942_v36 = vpop.f32.mrb[1].mxu0 }
 0x1ea   : > { %v943_v37 = vpop.f32.mrb[2].mxu0 }
 0x1eb   : > { %v1211_v38 = vpack.c.bf16 %v941_v35, %v941_v35  ;;  %v970_v39 = vmul.f32 %v941_v35, %v941_v35  ;;  %v944_v41 = vadd.f32 %v1191_v33, %v943_v37  ;;  %v945_v42 = vpop.f32.mrb[3].mxu0  ;;  %v959_v43 = vsel %vm958_vm0, %v941_v35, 0.0 }
 0x1ed   : > { %956 = vst.msk [vmem:[%s271_s10] sm:$0xf] %vm955_vm15, %v1211_v38  ;;  %v1212_v44 = vpack.c.bf16 %v944_v41, %v944_v41  ;;  %v960_v45 = vsel %vm958_vm0, %v944_v41, 0.0  ;;  %v971_v46 = vmul.f32 %v944_v41, %v944_v41  ;;  %v972_v48 = vsel %vm958_vm0, %v970_v39, 0.0 }
 0x1ee   : > { %v961_v47 = vadd.f32 %v960_v45, %v959_v43 }
 0x1ef   : > { %957 = vst.msk [vmem:[%s271_s10 + $0x4] sm:$0xf] %vm955_vm15, %v1212_v44  ;;  %v973_v49 = vsel %vm958_vm0, %v971_v46, 0.0 }
 0x1f0   : > { %v962_v50 = vrot.slane %v961_v47, 4  ;;  %v974_v51 = vadd.f32 %v973_v49, %v972_v48 }
 0x1f1   : > { %1411 = shalt.err (!%p1408_p1)
}
 0x1f2   : > { %s1412_s14 = scalar_lea.hbm %s1801_s22, 128  ;;  %s1416_s7 = scalar_lea.hbm %s1889_s3, 256 }
 0x1f3   : > { %p1413_p3 = scmp.ne.s32.totalorder %s1801_s22, %s1412_s14  ;;  %p1417_p6 = scmp.lt.u32.totalorder %s1801_s22, %s1889_s3 }
 0x1f4   : > { %p1418_p11 = scmp.lt.u32.totalorder %s1416_s7, %s1412_s14  ;;  %p1420_p0 = scmp.lt.u32.totalorder %s1412_s14, %s1801_s22 }
 0x1f5   : > { %p1414_p2 = pnand %p1413_p3, %p1911_p13 }
 0x1f6   : > { %p1419_p12 = por %p1418_p11, %p1417_p6 }
 0x1f7   : > { %p1415_p5 = pneg %p1414_p2 }
 0x1f8   : > { %p1421_p7 = por %p1420_p0, %p1419_p12 }
 0x1fa   : > { %p1422_p8 = pnand %p1421_p7, %p1415_p5 }
 0x1fc   : > { %1425 = shalt.err (!%p1422_p8)
}
 0x1fd   : > { %s1522_s6 = smov 4   ;;  %v963_v52 = vadd.f32 %v962_v50, %v961_v47  ;;  %v975_v53 = vrot.slane %v974_v51, 4  ;;  %s1150_s12 = sshll.u32 %s1698_s13, 1  ;;  %vm968_vm1 = vcmask 253952  }
 0x1fe   : > { %1234 = dma.vmem_to_hbm [thread:$0]  (%p1911_p13), %s1806_s8, 128, %s1801_s22, %s983_s23, %s1516_s29, %s1516_s29, %s1522_s6  }
 0x1ff   : > { %v964_v54 = vrot.slane %v963_v52, 2  ;;  %v976_v55 = vadd.f32 %v975_v53, %v974_v51  ;;  %s1208_s30 = sshll.u32 %s1570_s19, 5  ;;  %s278_s25 = scalar_lea.vmem [#allocation10], %s1150_s12 }
 0x200   : > { %s1017_s26 = sshll.u32 %s278_s25, 4  ;;  %s1842_s22 = scalar_lea.hbm %s1890_s4, %s1208_s30  ;;  %s1844_s26 = int_to_ptr.vmem [resolvable:$true] %s1017_s26 }
 0x201   : > { %v965_v56 = vadd.f32 %v964_v54, %v963_v52  ;;  %v977_v57 = vrot.slane %v976_v55, 2  ;;  %s988_s23 = scalar_lea.sflag [#allocation11], %s1698_s13  ;;  %s1426_s9 = scalar_lea.vmem %s1844_s26, 32 }
 0x202   : > { %p1427_p9 = scmp.ne.s32.totalorder %s1844_s26, %s1426_s9  ;;  %s1523_s19 = smov [#allocation10]  }
 0x203   : > { %v966_v58 = vrot.slane %v965_v56, 1  ;;  %v978_v59 = vadd.f32 %v977_v57, %v976_v55  ;;  %s1430_s14 = sshll.u32 %s1523_s19, 4  ;;  %s1431_s14 = int_to_ptr.vmem [resolvable:$false] %s1430_s14 }
 0x204   : > { %p1428_p10 = pnand %p1427_p9, %p1911_p13  ;;  %s1432_s20 = scalar_lea.vmem %s1431_s14, 64 }
 0x205   : > { %v967_v60 = vadd.f32 %v966_v58, %v965_v56  ;;  %v979_v61 = vrot.slane %v978_v59, 1  ;;  %p1433_p3 = scmp.lt.s32.totalorder %s1844_s26, %s1431_s14  ;;  %p1434_p2 = scmp.lt.s32.totalorder %s1432_s20, %s1426_s9 }
 0x206   : > { %p1429_p1 = pneg %p1428_p10 }
 0x207   : > { %v980_v62 = vadd.f32 %v979_v61, %v978_v59  ;;  %969 = vst.msk [vmem:[%s278_s25] sm:$0x1] %vm968_vm1, %v967_v60  ;;  %p1435_p5 = por %p1434_p2, %p1433_p3 }
 0x209   : > { %981 = vst.msk [vmem:[%s278_s25 + $0x1] sm:$0x1] %vm968_vm1, %v980_v62  ;;  %p1436_p6 = pnand %p1435_p5, %p1429_p1 }
 0x20b   : > { %1439 = shalt.err (!%p1436_p6)
}
 0x20c   : > { %s1440_s13 = scalar_lea.hbm %s1842_s22, 32  ;;  %s1444_s11 = scalar_lea.hbm %s1890_s4, 64 }
 0x20d   : > { %p1441_p11 = scmp.ne.s32.totalorder %s1842_s22, %s1440_s13  ;;  %p1445_p7 = scmp.lt.u32.totalorder %s1842_s22, %s1890_s4 }
 0x20e   : > { %p1446_p8 = scmp.lt.u32.totalorder %s1444_s11, %s1440_s13  ;;  %p1448_p10 = scmp.lt.u32.totalorder %s1440_s13, %s1842_s22 }
 0x20f   : > { %p1442_p12 = pnand %p1441_p11, %p1911_p13 }
 0x210   : > { %p1447_p9 = por %p1446_p8, %p1445_p7 }
 0x211   : > { %p1443_p0 = pneg %p1442_p12 }
 0x212   : > { %p1449_p1 = por %p1448_p10, %p1447_p9 }
 0x214   : > { %p1450_p3 = pnand %p1449_p1, %p1443_p0 }
 0x216   : > { %1453 = shalt.err (!%p1450_p3)
}
 0x217   : > { %1235 = dma.vmem_to_hbm [thread:$0]  (%p1911_p13), %s1844_s26, 32, %s1842_s22, %s988_s23  }
 0x218 PF: > { %s1029_s12 = sand.u32 1, %s1488_s15   ;;  %p1912_p2 = scmp.ne.s32.totalorder %s1899_s28, 0 }
 0x219   : > { %s1030_s30 = scalar_lea.sflag [#allocation5], %s1029_s12 }
 0x21a   : > { %p1246_p5 = pnand %p1142_p4, %p1912_p2 }
 0x21c   : > { %1479 = dma.done.wait (!%p1246_p5), %s1030_s30, 128  }
 0x21d   : > { %1481 = vsyncadd (!%p1246_p5), %s1030_s30, 4294967168  ;;  %s1039_s25 = scalar_lea.sflag [#allocation11], %s1029_s12 }
 0x21e   : > { %1483 = dma.done.wait (!%p1246_p5), %s1039_s25, 32  }
 0x21f   : > { %1485 = vsyncadd (!%p1246_p5), %s1039_s25, 4294967264  ;;  %p22_p13 = scmp.ge.s32.totalorder %s1574_s21, 4   ;;  %s1913_s15 = smov %s1492_s16 }
 0x220   : > { %s1914_s16 = smov %s1496_s17  ;;  %s1915_s17 = smov %s1586_s24 }
 0x221   : > { %s1916_s18 = smov %s1574_s21  ;;  %24 = sbr.rel (!%p22_p13) target bundleno = 8 (0x8), region = 112 }
 0x228   :  { %1044 = vsyncpa [#allocation4], 1 }
 0x229   :  { %1046 = vsyncpa [#allocation4 + $0x1], 1 }
 0x22a   :  { %1047 = vsyncpa [#allocation7], 1 }
 0x22b   :  { %1048 = vsyncpa [#allocation5], 1 }
 0x22c   :  { %1050 = vsyncpa [#allocation5 + $0x1], 1 }
 0x22d   :  { %1051 = vsyncpa [#allocation11], 1 }
 0x22e   :  { %1053 = vsyncpa [#allocation11 + $0x1], 1 }

// kernel: discriminator_forward.5
= control target key start
LH: loop header
LB: loop body
LE: loop exit
PB: predicated region body
PF: predicated region fallthrough
CT: control target
= control target key end

     0   :  { %8 = vsyncpa [#allocation4], 0  ;;  %s2180_s0 = inlined_call_operand.hbm [shape: bf16[4,2,9,9,3], index: 0, kind: input, shape index: {}]   ;;  %s2181_s1 = inlined_call_operand.hbm [shape: bf16[27,16], index: 1, kind: input, shape index: {}]   ;;  %s2182_s2 = inlined_call_operand.hbm [shape: f32[1,16], index: 2, kind: input, shape index: {}]   ;;  %s2183_s3 = inlined_call_operand.hbm [shape: bf16[128,16], index: 3, kind: output, shape index: {}]  }
   0x1   :  { %10 = vsyncpa [#allocation4 + $0x1], 0 }
   0x2   :  { %11 = vsyncpa [#allocation7], 0 }
   0x3   :  { %12 = vsyncpa [#allocation5], 0 }
   0x4   :  { %14 = vsyncpa [#allocation5 + $0x1], 0  ;;  %s1796_s12 = smov 0   ;;  %s1798_s13 = smov 0  }
   0x5   :  { %s1800_s14 = smov 0   ;;  %s1802_s15 = smov 0  }
   0x6 LB: > { %s1817_s16 = sadd.s32 4294967295, %s1752_s15   ;;  %s1298_s17 = sadd.s32 4294967294, %s1752_s15   ;;  %s1752_s15 = sphi %s1802_s15, %s2207_s15   ;;  %s1748_s14 = sphi %s1800_s14, %s2206_s14   ;;  %s1744_s13 = sphi %s1798_s13, %s2205_s13   ;;  %s1740_s12 = sphi %s1796_s12, %s2204_s12  }
   0x7   : > { %s1821_s18 = sadd.s32 1, %s1752_s15   ;;  %s27_s19 = sadd.s32 1, %s1748_s14 }
   0x8   : > { %s24_s20 = ssub.s32 %s1752_s15, %s1821_s18  ;;  %p34_p0 = scmp.ne.s32.totalorder %s1748_s14, %s1744_s13 }
   0x9   : > { %p25_p1 = scmp.eq.s32.totalorder %s24_s20, 0  ;;  %p35_p2 = scmp.eq.s32.totalorder %s1752_s15, 0 }
   0xa   : > { %p40_p3 = scmp.ne.s32.totalorder %s1744_s13, %s1740_s12  ;;  %p2184_p4 = scmp.eq.s32.totalorder %s1817_s16, 0 }
   0xb   : > { %s1833_s21 = scalar_select %p25_p1, %s1748_s14, %s27_s19  }
   0xc   : > { %p1835_p5 = por %p35_p2, %p34_p0  ;;  %p1841_p6 = por %p2184_p4, %p40_p3 }
   0xd   : > { %p106_p7 = scmp.eq.s32.totalorder %s1817_s16, 1  ;;  %p112_p8 = scmp.eq.s32.totalorder %s1298_s17, 1 }
   0xe   : > { %s2189_s22 = scalar_select %p1835_p5, 1, 0 }
   0xf   : > { %s2190_s23 = scalar_select %p1841_p6, 1, 0 }
  0x10   : > { %p1299_p9 = scmp.ge.s32.totalorder %s1752_s15, 1  ;;  %p119_p10 = scmp.lt.s32.totalorder %s1752_s15, 3 }
  0x11   : > { %p1848_p11 = por %p106_p7, %p34_p0  ;;  %p1852_p12 = por %p112_p8, %p40_p3 }
  0x12   : > { %p1856_p13 = pnand %p1299_p9, %p119_p10  ;;  %s1754_s27 = smov [#allocation6]  }
  0x13   : > { %s2191_s24 = scalar_select %p1848_p11, 1, 0 }
  0x14   : > { %s2192_s25 = scalar_select %p1852_p12, 1, 0 }
  0x15   : > { %s2193_s26 = scalar_select %p1856_p13, 1, 0 }
  0x16   : > { %p1499_p1 = pneg %p1856_p13  ;;  %s131_s28 = sshll.u32 %s1754_s27, 4  ;;  %s132_s28 = int_to_ptr.vmem [resolvable:$true] %s131_s28 }
  0x17   : > { %s1755_s30 = smov [#allocation8]   ;;  %s1626_s7 = scalar_lea.hbm %s2181_s1, 256 }
  0x18   : > { %p1864_p2 = pnand %p1499_p1, %p2184_p4  ;;  %s145_s4 = sshll.u32 %s1755_s30, 4  ;;  %s1868_s4 = int_to_ptr.vmem [resolvable:$true] %s145_s4 }
  0x19   : > { %p1627_p0 = scmp.ne.s32.totalorder %s2181_s1, %s1626_s7  ;;  %p1633_p9 = scmp.lt.u32.totalorder %s1626_s7, %s2181_s1 }
  0x1a   : > { %p1628_p3 = pneg %p1864_p2 }
  0x1c   : > { %p1629_p7 = pnand %p1628_p3, %p1627_p0 }
  0x1e   : > { %p1630_p8 = pneg %p1629_p7 }
  0x20   : > { %p1635_p10 = pnand %p1633_p9, %p1630_p8 }
  0x22   : > { %1638 = shalt.err (!%p1635_p10)
}
  0x23   : > { %s1639_s17 = scalar_lea.vmem %s132_s28, 256  ;;  %p1647_p11 = scmp.lt.s32.totalorder %s132_s28, %s132_s28 }
  0x24   : > { %p1640_p1 = scmp.ne.s32.totalorder %s132_s28, %s1639_s17  ;;  %p1648_p6 = scmp.lt.s32.totalorder %s1639_s17, %s1639_s17 }
  0x26   : > { %p1642_p4 = pnand %p1640_p1, %p1628_p3  ;;  %p1649_p13 = por %p1648_p6, %p1647_p11 }
  0x28   : > { %p1643_p12 = pneg %p1642_p4 }
  0x2a   : > { %p1650_p5 = pnand %p1649_p13, %p1643_p12 }
  0x2c   : > { %1653 = shalt.err (!%p1650_p5)
}
  0x2d   : > { %s1756_s19 = smov 64   ;;  %s1757_s20 = smov 4  }
  0x2e   : > { %1502 = dma.hbm_to_vmem [thread:$0]  (!%p1864_p2), %s2181_s1, 256, %s132_s28, [#allocation7], %s1756_s19, %s1756_s19, %s1757_s20  }
  0x2f   : > { %s1654_s7 = scalar_lea.hbm %s2182_s2, 16 }
  0x30   : > { %p1655_p4 = scmp.ne.s32.totalorder %s2182_s2, %s1654_s7  ;;  %p1661_p11 = scmp.lt.u32.totalorder %s1654_s7, %s2182_s2 }
  0x32   : > { %p1657_p5 = pnand %p1655_p4, %p1628_p3 }
  0x34   : > { %p1658_p6 = pneg %p1657_p5 }
  0x36   : > { %p1663_p12 = pnand %p1661_p11, %p1658_p6 }
  0x38   : > { %1666 = shalt.err (!%p1663_p12)
}
  0x39   : > { %s1667_s28 = scalar_lea.vmem %s1868_s4, 16  ;;  %s1674_s17 = scalar_lea.vmem %s1868_s4, 32 }
  0x3a   : > { %p1668_p13 = scmp.ne.s32.totalorder %s1868_s4, %s1667_s28  ;;  %p1675_p8 = scmp.lt.s32.totalorder %s1868_s4, %s1868_s4 }
  0x3b   : > { %p1676_p9 = scmp.lt.s32.totalorder %s1674_s17, %s1667_s28 }
  0x3c   : > { %p1670_p0 = pnand %p1668_p13, %p1628_p3 }
  0x3d   : > { %p1677_p10 = por %p1676_p9, %p1675_p8 }
  0x3e   : > { %p1671_p7 = pneg %p1670_p0 }
  0x40   : > { %p1678_p1 = pnand %p1677_p10, %p1671_p7 }
  0x42   : > { %1681 = shalt.err (!%p1678_p1)
}
  0x43   : > { %1505 = dma.hbm_to_vmem [thread:$0]  (!%p1864_p2), %s2182_s2, 16, %s1868_s4, [#allocation7]  }
  0x44   : > { %p1302_p4 = scmp.ge.s32.totalorder %s1752_s15, 2 }
  0x46   : > { %152 = sbr.rel (%p1302_p4) target bundleno = 93 (0x5d), region = 24 }
  0x4d   : > { %s156_s27 = sand.u32 1, %s1748_s14   ;;  %s1478_s30 = smul.u32 1152, %s1752_s15 }
  0x4e   : > { %s1477_s29 = smul.u32 288, %s156_s27  ;;  %s1758_s5 = smov 2304  }
  0x4f   : > { %p2195_p3 = scmp.ne.s32.totalorder %s2189_s22, 0  ;;  %s166_s8 = scalar_lea.hbm %s2180_s0, %s1478_s30 }
  0x50   : > { %s160_s10 = scalar_lea.vmem [#allocation3], %s1477_s29  ;;  %s1759_s28 = smov 1152  }
  0x51   : > { %1485 = sst [smem:[#allocation11]] (%p2195_p3), %s1758_s5  ;;  %s179_s11 = sshll.u32 %s160_s10, 4  ;;  %s180_s11 = int_to_ptr.vmem [resolvable:$true] %s179_s11 }
  0x52   : > { %s1484_s4 = scalar_select %p2195_p3, [#allocation0], [#allocation12] }
  0x53   : > { %1486 = sst [smem:[#allocation11 + $0x1]] (%p2195_p3), %s1759_s28  ;;  %s1760_s17 = smov 18  }
  0x54   : > { %s171_s9 = sld [smem:[%s1484_s4]]   ;;  %s1761_s19 = smov 64  }
  0x55   : > { %1487 = sst [smem:[#allocation11 + $0x2]] (%p2195_p3), %s1760_s17  ;;  %s1762_s20 = smov 4  }
  0x56   : > { %1488 = sst [smem:[#allocation11 + $0x3]] (%p2195_p3), %s1761_s19  ;;  %s157_s29 = scalar_lea.sflag [#allocation4], %s156_s27 }
  0x57   : > { %1489 = sst [smem:[#allocation11 + $0x4]] (%p2195_p3), %s1761_s19  ;;  %s1763_s4 = smov [#allocation10]  }
  0x58   : > { %1490 = sst [smem:[#allocation11 + $0x5]] (%p2195_p3), %s1762_s20 }
  0x5a   : > { %s1304_s30 = sshll.u32 %s171_s9, 26 }
  0x5b   : > { %s1305_s5 = sadd.s32 134217728, %s1304_s30 }
  0x5c   : > { %1491 = dma.general (%p2195_p3), %s166_s8, 4608, %s180_s11, %s157_s29, %s1763_s4, [#allocation11], %s1305_s5, 0  }
  0x5d PF: > { %p2196_p2 = scmp.ne.s32.totalorder %s2193_s26, 0 }
  0x5e   : > { %s1945_s6 = sand.u32 (!%p2196_p2), 1, %s1744_s13   ;;  %p2197_p5 = scmp.ne.s32.totalorder (!%p2196_p2), %s2190_s23, 0 }
  0x5f   : > { %204 = sbr.rel (%p2196_p2) target bundleno = 566 (0x236), region = 32  ;;  %s207_s10 = scalar_lea.sflag (!%p2196_p2), [#allocation4], %s1945_s6 }
  0x60   : > { %s1479_s7 = smul.u32 (!%p2196_p2), 288, %s1945_s6 }
  0x62   : > { %s1949_s28 = scalar_lea.vmem (!%p2196_p2), [#allocation3], %s1479_s7 }
  0x66   : > { %1727 = dma.done.wait (%p2197_p5), %s207_s10, 4608  }
  0x67   : > { %1729 = vsyncadd (%p2197_p5), %s207_s10, 4294962688  ;;  %p2198_p6 = scmp.eq.s32.totalorder %s1817_s16, 0 }
  0x69   : > { %1731 = dma.done.wait (%p2198_p6), [#allocation7], 272   ;;  %p2199_p11 = pmov %p2198_p6 }
  0x6a   : > { %v1568_v0 = vld [vmem:[%s1949_s28 + $0x58] ss:$8 sps:$4 sm:$0xff]   ;;  %v1569_v1 = vld [vmem:[%s1949_s28 + $0x48] ss:$8 sps:$4 sm:$0xff]   ;;  %vm342_vm0 = vsmask.f32 3328 }
  0x6b   : > { %1733 = vsyncadd (%p2199_p11), [#allocation7], 4294967024  ;;  %vm343_vm1 = vsmask.f32 7440  ;;  %s1764_s22 = smov 3   ;;  %s1765_s23 = smov 9  }
  0x6c   : > { %311 = vrot.lane.b32.xlu1 %v1568_v0, %s1764_s22  ;;  %v1570_v2 = vld [vmem:[%s1949_s28 + $0x78] ss:$8 sps:$4 sm:$0xff]   ;;  %309 = vrot.lane.b32.xlu0 %v1569_v1, %s1764_s22  ;;  %v1571_v3 = vld [vmem:[%s1949_s28 + $0x68] ss:$8 sps:$4 sm:$0xff]   ;;  %vm1978_vm2 = vmor %vm342_vm0, %vm343_vm1  ;;  %s1766_s26 = smov 6   ;;  %s1767_s27 = smov 12  }
  0x6d   : > { %v1572_v4 = vld [vmem:[%s1949_s28 + $0xb0] ss:$8 sps:$4 sm:$0xff]   ;;  %v334_v6 = vld [vmem:[%s1949_s28 + $0x20] sm:$0xf]  ;;  %v335_v7 = vld [vmem:[%s1949_s28 + $0x24] sm:$0x1] }
  0x6e   : > { %v1573_v5 = vld [vmem:[%s1949_s28 + $0x90] ss:$8 sps:$4 sm:$0xff]   ;;  %v336_v8 = vld [vmem:[%s1949_s28 + $0x28] sm:$0xf]  ;;  %v337_v9 = vld [vmem:[%s1949_s28 + $0x2c] sm:$0x1] }
  0x6f   : > { %v402_v10 = vshrl.u32 %v334_v6, 16  ;;  %v405_v11 = vshll.u32 %v334_v6, 16  ;;  %v411_v12 = vshll.u32 %v335_v7, 16  ;;  %v416_v13 = vshrl.u32 %v336_v8, 16  ;;  %v326_v16 = vld [vmem:[%s1949_s28] sm:$0xf] }
  0x70   : > { %315 = vrot.lane.b32.xlu1 %v1570_v2, %s1764_s22  ;;  %313 = vrot.lane.b32.xlu0 %v1571_v3, %s1764_s22  ;;  %v419_v14 = vshll.u32 %v336_v8, 16  ;;  %v425_v15 = vshll.u32 %v337_v9, 16  ;;  %v327_v17 = vld [vmem:[%s1949_s28 + $0x4] sm:$0x1]  ;;  %v328_v22 = vld [vmem:[%s1949_s28 + $0x8] sm:$0xf] }
  0x71   : > { %v404_v18 = vrot.slane %v402_v10, 4  ;;  %v407_v19 = vrot.slane %v405_v11, 5  ;;  %v413_v20 = vrot.slane %v411_v12, 5  ;;  %v418_v21 = vrot.slane %v416_v13, 4  ;;  %v329_v25 = vld [vmem:[%s1949_s28 + $0xc] sm:$0x1] }
  0x72   : > { %v421_v23 = vrot.slane %v419_v14, 5  ;;  %v427_v24 = vrot.slane %v425_v15, 5  ;;  %v346_v26 = vshrl.u32 %v326_v16, 16  ;;  %v349_v27 = vshll.u32 %v326_v16, 16  ;;  %v338_v32 = vld [vmem:[%s1949_s28 + $0x30] sm:$0xf] }
  0x73   : > { %v408_v28 = vor.u32 %v407_v19, %v404_v18  ;;  %v355_v29 = vshll.u32 %v327_v17, 16  ;;  %v360_v30 = vshrl.u32 %v328_v22, 16  ;;  %v363_v31 = vshll.u32 %v328_v22, 16  ;;  %v339_v38 = vld [vmem:[%s1949_s28 + $0x34] sm:$0x1]  ;;  %s1768_s8 = smov 15  }
  0x74   : > { %519 = vrot.lane.b32.xlu1 %v1572_v4, %s1765_s23  ;;  %515 = vrot.lane.b32.xlu0 %v1573_v5, %s1765_s23  ;;  %v422_v34 = vor.u32 %v421_v23, %v418_v21  ;;  %v348_v35 = vrot.slane %v346_v26, 4  ;;  %v351_v36 = vrot.slane %v349_v27, 5  ;;  %v369_v37 = vshll.u32 %v329_v25, 16  ;;  %v340_v43 = vld [vmem:[%s1949_s28 + $0x38] sm:$0xf]  ;;  %s1769_s9 = smov 18  }
  0x75   : > { %v409_v39 = vrot.slane %v408_v28, 4  ;;  %v357_v40 = vrot.slane %v355_v29, 5  ;;  %v362_v41 = vrot.slane %v360_v30, 4  ;;  %v365_v42 = vrot.slane %v363_v31, 5  ;;  %v341_v50 = vld [vmem:[%s1949_s28 + $0x3c] sm:$0x1] }
  0x76   : > { %v423_v44 = vrot.slane %v422_v34, 4  ;;  %v352_v45 = vor.u32 %v351_v36, %v348_v35  ;;  %v371_v46 = vrot.slane %v369_v37, 5  ;;  %v430_v47 = vshrl.u32 %v338_v32, 16  ;;  %v330_v57 = vld [vmem:[%s1949_s28 + $0x10] sm:$0xf]  ;;  %s1770_s11 = smov 21  }
  0x77   : > { %v414_v48 = vsel %vm1978_vm2, %v409_v39, %v413_v20  ;;  %v366_v49 = vor.u32 %v365_v42, %v362_v41  ;;  %v433_v51 = vshll.u32 %v338_v32, 16  ;;  %v439_v52 = vshll.u32 %v339_v38, 16  ;;  %v331_v61 = vld [vmem:[%s1949_s28 + $0x14] sm:$0x1]  ;;  %v332_v62 = vld [vmem:[%s1949_s28 + $0x18] sm:$0xf] }
  0x78   : > { %v428_v53 = vsel %vm1978_vm2, %v423_v44, %v427_v24  ;;  %v353_v54 = vrot.slane %v352_v45, 4  ;;  %v432_v55 = vrot.slane %v430_v47, 4  ;;  %v444_v56 = vshrl.u32 %v340_v43, 16  ;;  %v333_v5 = vld [vmem:[%s1949_s28 + $0x1c] sm:$0x1]  ;;  %s1771_s17 = smov 24  }
  0x79   : > { %v1328_v58 = vcombine.low %v414_v48, %v428_v53  ;;  %v367_v59 = vrot.slane %v366_v49, 4  ;;  %v435_v60 = vrot.slane %v433_v51, 5  ;;  %v447_v1 = vshll.u32 %v340_v43, 16  ;;  %v1574_v34 = vld [vmem:[%s1949_s28 + $0xc0] ss:$8 sps:$4 sm:$0xff]   ;;  %s1309_s19 = sshll.u32 %s1945_s6, 5 }
  0x7a   : > { %v358_v63 = vsel %vm1978_vm2, %v353_v54, %v357_v40  ;;  %v446_v0 = vrot.slane %v444_v56, 4  ;;  %v453_v2 = vshll.u32 %v341_v50, 16  ;;  %v374_v6 = vshrl.u32 %v330_v57, 16  ;;  %v1362_v35 = vld [vmem:[%s1949_s28 + $0xb0] sm:$0xf]  ;;  %s240_s20 = scalar_lea.vmem [#allocation9], %s1309_s19 }
  0x7b   : > { %473 = vrot.lane.b32.xlu1 %v1328_v58, %s1766_s26  ;;  %v372_v3 = vsel %vm1978_vm2, %v367_v59, %v371_v46  ;;  %v436_v4 = vor.u32 %v435_v60, %v432_v55  ;;  %v377_v7 = vshll.u32 %v330_v57, 16  ;;  %v441_v9 = vrot.slane %v439_v52, 5  ;;  %v1363_v36 = vld [vmem:[%s1949_s28 + $0xb4] sm:$0x1]  ;;  %v1364_v37 = vld [vmem:[%s1949_s28 + $0xb8] sm:$0xf] }
  0x7c   : > { %v1326_v8 = vcombine.low %v358_v63, %v372_v3  ;;  %v449_v10 = vrot.slane %v447_v1, 5  ;;  %v383_v11 = vshll.u32 %v331_v61, 16  ;;  %v376_v13 = vrot.slane %v374_v6, 4  ;;  %v1365_v38 = vld [vmem:[%s1949_s28 + $0xbc] sm:$0x1]  ;;  %s1454_s30 = sshll.u32 %s1817_s16, 9 }
  0x7d   : > { %v437_v12 = vrot.slane %v436_v4, 4  ;;  %v379_v14 = vrot.slane %v377_v7, 5  ;;  %v388_v15 = vshrl.u32 %v332_v62, 16  ;;  %v455_v17 = vrot.slane %v453_v2, 5  ;;  %v1354_v43 = vld [vmem:[%s1949_s28 + $0x90] sm:$0xf]  ;;  %s2131_s7 = scalar_lea.hbm %s2183_s3, %s1454_s30 }
  0x7e   : > { %469 = vrot.lane.b32.xlu0 %v1326_v8, %s1766_s26  ;;  %v450_v16 = vor.u32 %v449_v10, %v446_v0  ;;  %v391_v18 = vshll.u32 %v332_v62, 16  ;;  %v397_v19 = vshll.u32 %v333_v5, 16  ;;  %v385_v24 = vrot.slane %v383_v11, 5  ;;  %v1575_v45 = vld [vmem:[%s1949_s28 + $0xa0] ss:$8 sps:$4 sm:$0xff]   ;;  %s1206_s5 = sshll.u32 %s240_s20, 4  ;;  %s2133_s5 = int_to_ptr.vmem [resolvable:$true] %s1206_s5 }
  0x7f   : > { %v380_v20 = vor.u32 %v379_v14, %v376_v13  ;;  %v390_v21 = vrot.slane %v388_v15, 4  ;;  %v442_v22 = vsel %vm1978_vm2, %v437_v12, %v441_v9  ;;  %v651_v40 = vshrl.u32 %v1362_v35, 16  ;;  %v1576_v46 = vld [vmem:[%s1949_s28 + $0xf8] ss:$8 sps:$4 sm:$0xff]   ;;  %v1355_v50 = vld [vmem:[%s1949_s28 + $0x94] sm:$0x1] }
  0x80   : > { %v451_v23 = vrot.slane %v450_v16, 4  ;;  %v393_v25 = vrot.slane %v391_v18, 5  ;;  %v399_v29 = vrot.slane %v397_v19, 5  ;;  %v654_v41 = vshll.u32 %v1362_v35, 16  ;;  %v1356_v54 = vld [vmem:[%s1949_s28 + $0x98] sm:$0xf] }
  0x81   : > { %v381_v26 = vrot.slane %v380_v20, 4  ;;  %v660_v42 = vshll.u32 %v1363_v36, 16  ;;  %v665_v47 = vshrl.u32 %v1364_v37, 16  ;;  %v668_v48 = vshll.u32 %v1364_v37, 16  ;;  %v1357_v59 = vld [vmem:[%s1949_s28 + $0x9c] sm:$0x1] }
  0x82   : > { %v456_v27 = vsel %vm1978_vm2, %v451_v23, %v455_v17  ;;  %v394_v28 = vor.u32 %v393_v25, %v390_v21  ;;  %v674_v49 = vshll.u32 %v1365_v38, 16  ;;  %v653_v51 = vrot.slane %v651_v40, 4  ;;  %v1366_v1 = vld [vmem:[%s1949_s28 + $0xc0] sm:$0xf]  ;;  %v1367_v7 = vld [vmem:[%s1949_s28 + $0xc4] sm:$0x1] }
  0x83   : > { %v1329_v30 = vcombine.low %v442_v22, %v456_v27  ;;  %v386_v31 = vsel %vm1978_vm2, %v381_v26, %v385_v24  ;;  %v656_v52 = vrot.slane %v654_v41, 5  ;;  %v662_v53 = vrot.slane %v660_v42, 5  ;;  %v1577_v2 = vld [vmem:[%s1949_s28 + $0xd8] ss:$8 sps:$4 sm:$0xff]   ;;  %v1368_v11 = vld [vmem:[%s1949_s28 + $0xc8] sm:$0xf] }
  0x84   : > { %v395_v32 = vrot.slane %v394_v28, 4  ;;  %v595_v55 = vshrl.u32 %v1354_v43, 16  ;;  %v667_v56 = vrot.slane %v665_v47, 4  ;;  %v670_v57 = vrot.slane %v668_v48, 5  ;;  %v1578_v13 = vld [vmem:[%s1949_s28 + $0x108] ss:$8 sps:$4 sm:$0xff]  }
  0x85   : > { %475 = vrot.lane.b32.xlu1 %v1329_v30, %s1766_s26  ;;  %v676_v58 = vrot.slane %v674_v49, 5  ;;  %v598_v60 = vshll.u32 %v1354_v43, 16  ;;  %v657_v61 = vor.u32 %v656_v52, %v653_v51  ;;  %v604_v63 = vshll.u32 %v1355_v50, 16  ;;  %v1369_v19 = vld [vmem:[%s1949_s28 + $0xcc] sm:$0x1]  ;;  %s1193_s16 = scalar_lea.sflag [#allocation5], %s1945_s6 }
  0x86   : > { %v400_v39 = vsel %vm1978_vm2, %v395_v32, %v399_v29  ;;  %v597_v62 = vrot.slane %v595_v55, 4  ;;  %v609_v0 = vshrl.u32 %v1356_v54, 16  ;;  %v671_v3 = vor.u32 %v670_v57, %v667_v56  ;;  %v1579_v23 = vld [vmem:[%s1949_s28 + $0xe8] ss:$8 sps:$4 sm:$0xff]   ;;  %v1358_v28 = vld [vmem:[%s1949_s28 + $0xa0] sm:$0xf] }
  0x87   : > { %v1327_v44 = vcombine.low %v386_v31, %v400_v39  ;;  %v600_v4 = vrot.slane %v598_v60, 5  ;;  %v612_v5 = vshll.u32 %v1356_v54, 16  ;;  %v618_v6 = vshll.u32 %v1357_v59, 16  ;;  %v1359_v29 = vld [vmem:[%s1949_s28 + $0xa4] sm:$0x1]  ;;  %s1682_s10 = scalar_lea.vmem %s2133_s5, 512 }
  0x88   : > { %v658_v8 = vrot.slane %v657_v61, 4  ;;  %v606_v9 = vrot.slane %v604_v63, 5  ;;  %v611_v10 = vrot.slane %v609_v0, 4  ;;  %v679_v12 = vshrl.u32 %v1366_v1, 16  ;;  %v1360_v35 = vld [vmem:[%s1949_s28 + $0xa8] sm:$0xf]  ;;  %p1683_p12 = scmp.ne.s32.totalorder %s2133_s5, %s1682_s10 }
  0x89   : > { %471 = vrot.lane.b32.xlu0 %v1327_v44, %s1766_s26  ;;  %521 = vrot.lane.b32.xlu1 %v1574_v34, %s1765_s23  ;;  %v672_v14 = vrot.slane %v671_v3, 4  ;;  %v601_v15 = vor.u32 %v600_v4, %v597_v62  ;;  %v614_v16 = vrot.slane %v612_v5, 5  ;;  %v620_v17 = vrot.slane %v618_v6, 5  ;;  %v1580_v5 = vld [vmem:[%s1949_s28 + $0x28] ss:$8 sps:$4 sm:$0xff]   ;;  %p2202_p13 = scmp.ne.s32.totalorder %s2191_s24, 0 }
  0x8a   : > { %v663_v18 = vsel %vm1978_vm2, %v658_v8, %v662_v53  ;;  %v681_v20 = vrot.slane %v679_v12, 4  ;;  %v682_v21 = vshll.u32 %v1366_v1, 16  ;;  %v688_v22 = vshll.u32 %v1367_v7, 16  ;;  %v1582_v7 = vld [vmem:[%s1949_s28 + $0x38] ss:$8 sps:$4 sm:$0xff]  }
  0x8b   : > { %v677_v24 = vsel %vm1978_vm2, %v672_v14, %v676_v58  ;;  %v602_v25 = vrot.slane %v601_v15, 4  ;;  %v615_v26 = vor.u32 %v614_v16, %v611_v10  ;;  %v693_v27 = vshrl.u32 %v1368_v11, 16  ;;  %v1406_v8 = vld [vmem:[%s1949_s28 + $0x28] sm:$0xf]  ;;  %v1408_v12 = vld [vmem:[%s1949_s28 + $0x30] sm:$0xf]  ;;  %p1684_p0 = pnand %p1683_p12, %p2202_p13 }
  0x8c   : > { %v1372_v30 = vcombine.low %v663_v18, %v677_v24  ;;  %v684_v31 = vrot.slane %v682_v21, 5  ;;  %v690_v32 = vrot.slane %v688_v22, 5  ;;  %v696_v34 = vshll.u32 %v1368_v11, 16  ;;  %v1581_v10 = vld [vmem:[%s1949_s28 + $0x8] ss:$8 sps:$4 sm:$0xff]  }
  0x8d   : > { %517 = vrot.lane.b32.xlu0 %v1575_v45, %s1765_s23  ;;  %565 = vrot.lane.b32.xlu1 %v1576_v46, %s1767_s27  ;;  %v607_v36 = vsel %vm1978_vm2, %v602_v25, %v606_v9  ;;  %v616_v37 = vrot.slane %v615_v26, 4  ;;  %v695_v38 = vrot.slane %v693_v27, 4  ;;  %v702_v39 = vshll.u32 %v1369_v19, 16  ;;  %v1361_v46 = vld [vmem:[%s1949_s28 + $0xac] sm:$0x1]  ;;  %p1685_p7 = pneg %p1684_p0 }
  0x8e   : > { %v685_v40 = vor.u32 %v684_v31, %v681_v20  ;;  %v698_v41 = vrot.slane %v696_v34, 5  ;;  %v623_v42 = vshrl.u32 %v1358_v28, 16  ;;  %v626_v43 = vshll.u32 %v1358_v28, 16  ;;  %v1407_v11 = vld [vmem:[%s1949_s28 + $0x2c] sm:$0x1] }
  0x8f   : > { %v621_v44 = vsel %vm1978_vm2, %v616_v37, %v620_v17  ;;  %v704_v45 = vrot.slane %v702_v39, 5  ;;  %v632_v47 = vshll.u32 %v1359_v29, 16  ;;  %v637_v48 = vshrl.u32 %v1360_v35, 16  ;;  %v1398_v18 = vld [vmem:[%s1949_s28 + $0x8] sm:$0xf] }
  0x90   : > { %v686_v49 = vrot.slane %v685_v40, 4  ;;  %v699_v50 = vor.u32 %v698_v41, %v695_v38  ;;  %v625_v51 = vrot.slane %v623_v42, 4  ;;  %v1370_v52 = vcombine.low %v607_v36, %v621_v44  ;;  %v1399_v21 = vld [vmem:[%s1949_s28 + $0xc] sm:$0x1]  ;;  %v1400_v22 = vld [vmem:[%s1949_s28 + $0x10] sm:$0xf] }
  0x91   : > { %561 = vrot.lane.b32.xlu0 %v1577_v2, %s1767_s27  ;;  %567 = vrot.lane.b32.xlu1 %v1578_v13, %s1767_s27  ;;  %v628_v53 = vrot.slane %v626_v43, 5  ;;  %v639_v54 = vrot.slane %v637_v48, 4  ;;  %v640_v55 = vshll.u32 %v1360_v35, 16  ;;  %v646_v58 = vshll.u32 %v1361_v46, 16  ;;  %v1409_v13 = vld [vmem:[%s1949_s28 + $0x34] sm:$0x1] }
  0x92   : > { %v691_v56 = vsel %vm1978_vm2, %v686_v49, %v690_v32  ;;  %v700_v57 = vrot.slane %v699_v50, 4  ;;  %v634_v60 = vrot.slane %v632_v47, 5  ;;  %v900_v14 = vshrl.u32 %v1406_v8, 16  ;;  %v1401_v27 = vld [vmem:[%s1949_s28 + $0x14] sm:$0x1] }
  0x93   : > { %v629_v59 = vor.u32 %v628_v53, %v625_v51  ;;  %v642_v61 = vrot.slane %v640_v55, 5  ;;  %v648_v2 = vrot.slane %v646_v58, 5  ;;  %v903_v15 = vshll.u32 %v1406_v8, 16  ;;  %v1583_v28 = vld [vmem:[%s1949_s28 + $0x18] ss:$8 sps:$4 sm:$0xff]  }
  0x94   : > { %v705_v62 = vsel %vm1978_vm2, %v700_v57, %v704_v45  ;;  %v909_v16 = vshll.u32 %v1407_v11, 16  ;;  %v914_v17 = vshrl.u32 %v1408_v12, 16  ;;  %v917_v19 = vshll.u32 %v1408_v12, 16  ;;  %v1584_v29 = vld [vmem:[%s1949_s28 + $0x70] ss:$8 sps:$4 sm:$0xff]  }
  0x95   : > { %563 = vrot.lane.b32.xlu0 %v1579_v23, %s1767_s27  ;;  %722 = vrot.lane.b32.xlu1 %v1372_v30, %s1768_s8  ;;  %v1373_v63 = vcombine.low %v691_v56, %v705_v62  ;;  %v630_v0 = vrot.slane %v629_v59, 4  ;;  %v643_v1 = vor.u32 %v642_v61, %v639_v54  ;;  %v923_v20 = vshll.u32 %v1409_v13, 16  ;;  %v1410_v39 = vld [vmem:[%s1949_s28 + $0x38] sm:$0xf]  ;;  %v1411_v44 = vld [vmem:[%s1949_s28 + $0x3c] sm:$0x1] }
  0x96   : > { %v902_v23 = vrot.slane %v900_v14, 4  ;;  %v905_v24 = vrot.slane %v903_v15, 5  ;;  %v911_v25 = vrot.slane %v909_v16, 5  ;;  %v916_v26 = vrot.slane %v914_v17, 4  ;;  %v1586_v45 = vld [vmem:[%s1949_s28 + $0x80] ss:$8 sps:$4 sm:$0xff]  }
  0x97   : > { %v635_v3 = vsel %vm1978_vm2, %v630_v0, %v634_v60  ;;  %v644_v4 = vrot.slane %v643_v1, 4  ;;  %v919_v30 = vrot.slane %v917_v19, 5  ;;  %v925_v31 = vrot.slane %v923_v20, 5  ;;  %v1412_v50 = vld [vmem:[%s1949_s28 + $0x40] sm:$0xf] }
  0x98   : > { %v844_v32 = vshrl.u32 %v1398_v18, 16  ;;  %v847_v34 = vshll.u32 %v1398_v18, 16  ;;  %vm275_vm3 = vcmask 23552   ;;  %v906_v35 = vor.u32 %v905_v24, %v902_v23  ;;  %v1585_v51 = vld [vmem:[%s1949_s28 + $0x50] ss:$8 sps:$4 sm:$0xff]   ;;  %v1592_v13 = vld [vmem:[#allocation6] sm:$0xff]  }
  0x99   : > { %718 = vrot.lane.b32.xlu0 %v1370_v52, %s1768_s8  ;;  %724 = vrot.lane.b32.xlu1 %v1373_v63, %s1768_s8  ;;  %v649_v6 = vsel %vm1978_vm2, %v644_v4, %v648_v2  ;;  %v853_v36 = vshll.u32 %v1399_v21, 16  ;;  %v858_v37 = vshrl.u32 %v1400_v22, 16  ;;  %v861_v38 = vshll.u32 %v1400_v22, 16  ;;  %v1413_v55 = vld [vmem:[%s1949_s28 + $0x44] sm:$0x1] }
  0x9a   : > { %v1371_v9 = vcombine.low %v635_v3, %v649_v6  ;;  %v920_v40 = vor.u32 %v919_v30, %v916_v26  ;;  %v846_v41 = vrot.slane %v844_v32, 4  ;;  %v849_v42 = vrot.slane %v847_v34, 5  ;;  %v1402_v61 = vld [vmem:[%s1949_s28 + $0x18] sm:$0xf]  ;;  %v1403_v62 = vld [vmem:[%s1949_s28 + $0x1c] sm:$0x1]  ;;  %1461 = vmatprep.subr.bf16.mxu0 %v1592_v13  ;;  %1473 = vmatprep.subr.bf16.mxu1 %v1592_v13 }
  0x9b   : > { %v867_v43 = vshll.u32 %v1401_v27, 16  ;;  %v907_v46 = vrot.slane %v906_v35, 4  ;;  %v855_v47 = vrot.slane %v853_v36, 5  ;;  %v860_v48 = vrot.slane %v858_v37, 4  ;;  %v1404_v3 = vld [vmem:[%s1949_s28 + $0x20] sm:$0xf]  ;;  %1462 = vmatpush3.bf16.msra.mxu0 %v1592_v13  ;;  %1475 = vmatpush3.bf16.msra.mxu1 %v1592_v13 }
  0x9c   : > { %v863_v49 = vrot.slane %v861_v38, 5  ;;  %v921_v52 = vrot.slane %v920_v40, 4  ;;  %v850_v53 = vor.u32 %v849_v42, %v846_v41  ;;  %v928_v56 = vshrl.u32 %v1410_v39, 16  ;;  %v1405_v8 = vld [vmem:[%s1949_s28 + $0x24] sm:$0x1] }
  0x9d   : > { %768 = vrot.lane.b32.xlu1 %v1580_v5, %s1769_s9  ;;  %720 = vrot.lane.b32.xlu0 %v1371_v9, %s1768_s8  ;;  %v869_v54 = vrot.slane %v867_v43, 5  ;;  %v912_v57 = vsel %vm1978_vm2, %v907_v46, %v911_v25  ;;  %v931_v59 = vshll.u32 %v1410_v39, 16  ;;  %v937_v60 = vshll.u32 %v1411_v44, 16  ;;  %v1588_v18 = vld [vmem:[%s1949_s28 + $0x10] ss:$8 sps:$4 sm:$0xff]  }
  0x9e   : > { %v864_v58 = vor.u32 %v863_v49, %v860_v48  ;;  %v926_v63 = vsel %vm1978_vm2, %v921_v52, %v925_v31  ;;  %v851_v0 = vrot.slane %v850_v53, 4  ;;  %v930_v1 = vrot.slane %v928_v56, 4  ;;  %v1587_v19 = vld [vmem:[%s1949_s28 + $0x60] ss:$8 sps:$4 sm:$0xff]   ;;  %277 = vst.msk [vmem:[#allocation2 + $0x8] sm:$0xff] %vm275_vm3, %v1588_v18 }
  0x9f   : > { %v942_v2 = vshrl.u32 %v1412_v50, 16  ;;  %v1416_v4 = vcombine.low %v912_v57, %v926_v63  ;;  %v933_v6 = vrot.slane %v931_v59, 5  ;;  %v945_v11 = vshll.u32 %v1412_v50, 16  ;;  %v1589_v27 = vld [vmem:[%s1949_s28] ss:$8 sps:$4 sm:$0xff]  }
  0xa0   : > { %v865_v5 = vrot.slane %v864_v58, 4  ;;  %v856_v9 = vsel %vm1978_vm2, %v851_v0, %v855_v47  ;;  %v951_v12 = vshll.u32 %v1413_v55, 16  ;;  %v872_v16 = vshrl.u32 %v1402_v61, 16  ;;  %276 = vst.msk [vmem:[#allocation2] sm:$0xff] %vm275_vm3, %v1589_v27  ;;  %v1590_v37 = vld [vmem:[%s1949_s28 + $0x30] ss:$8 sps:$4 sm:$0xff]  }
  0xa1   : > { %770 = vrot.lane.b32.xlu1 %v1582_v7, %s1769_s9  ;;  %764 = vrot.lane.b32.xlu0 %v1581_v10, %s1769_s9  ;;  %v939_v7 = vrot.slane %v937_v60, 5  ;;  %v944_v10 = vrot.slane %v942_v2, 4  ;;  %v934_v15 = vor.u32 %v933_v6, %v930_v1  ;;  %v875_v17 = vshll.u32 %v1402_v61, 16  ;;  %279 = vst.msk [vmem:[#allocation2 + $0x18] sm:$0xff] %vm275_vm3, %v1590_v37  ;;  %v1591_v42 = vld [vmem:[%s1949_s28 + $0x20] ss:$8 sps:$4 sm:$0xff]  }
  0xa2   : > { %v870_v14 = vsel %vm1978_vm2, %v865_v5, %v869_v54  ;;  %v947_v21 = vrot.slane %v945_v11, 5  ;;  %v881_v22 = vshll.u32 %v1403_v62, 16  ;;  %v874_v24 = vrot.slane %v872_v16, 4  ;;  %278 = vst.msk [vmem:[#allocation2 + $0x10] sm:$0xff] %vm275_vm3, %v1591_v42  ;;  %v1593_v46 = vld [vmem:[#allocation6 + $0x8] sm:$0x3f]  }
  0xa3   : > { %v1414_v20 = vcombine.low %v856_v9, %v870_v14  ;;  %v935_v23 = vrot.slane %v934_v15, 4  ;;  %v877_v25 = vrot.slane %v875_v17, 5  ;;  %v886_v26 = vshrl.u32 %v1404_v3, 16  ;;  %s1773_s28 = smov [#allocation9]  }
  0xa4   : > { %v889_v30 = vshll.u32 %v1404_v3, 16  ;;  %v895_v31 = vshll.u32 %v1405_v8, 16  ;;  %v883_v35 = vrot.slane %v881_v22, 5  ;;  %vm1023_vm4 = vcmask 1044480   ;;  %s1686_s22 = sshll.u32 %s1773_s28, 4  ;;  %s1687_s22 = int_to_ptr.vmem [resolvable:$false] %s1686_s22 }
  0xa5   : > { %814 = vrot.lane.b32.xlu1 %v1584_v29, %s1770_s11  ;;  %766 = vrot.lane.b32.xlu0 %v1583_v28, %s1769_s9  ;;  %v948_v28 = vor.u32 %v947_v21, %v944_v10  ;;  %v953_v29 = vrot.slane %v951_v12, 5  ;;  %v940_v32 = vsel %vm1978_vm2, %v935_v23, %v939_v7  ;;  %v878_v34 = vor.u32 %v877_v25, %v874_v24  ;;  %s1688_s23 = scalar_lea.vmem %s1687_s22, 1024  ;;  %p1689_p8 = scmp.lt.s32.totalorder %s2133_s5, %s1687_s22 }
  0xa6   : > { %v888_v36 = vrot.slane %v886_v26, 4  ;;  %v891_v39 = vrot.slane %v889_v30, 5  ;;  %v897_v40 = vrot.slane %v895_v31, 5  ;;  %vm1024_vm5 = vcmask 1045504   ;;  %v1418_v26 = vld [vmem:[#allocation8] ss:$0 sm:$0xff]  ;;  %p1690_p9 = scmp.lt.s32.totalorder %s1688_s23, %s1682_s10 }
  0xa7   : > { %v949_v38 = vrot.slane %v948_v28, 4  ;;  %v879_v41 = vrot.slane %v878_v34, 4  ;;  %v1772_v49 = vmov 65535   ;;  %vm321_vm6 = vcmask 48152  }
  0xa8   : > { %v892_v44 = vor.u32 %v891_v39, %v888_v36  ;;  %v1025_v50 = vsel %vm1023_vm4, 4294967295, %v1772_v49  ;;  %vm481_vm7 = vcmask 72752   ;;  %vm527_vm8 = vcmask 97352   ;;  %p1691_p10 = por %p1690_p9, %p1689_p8 }
  0xa9   : > { %816 = vrot.lane.b32.xlu1 %v1586_v45, %s1770_s11  ;;  %810 = vrot.lane.b32.xlu0 %v1585_v51, %s1770_s11  ;;  %v954_v43 = vsel %vm1978_vm2, %v949_v38, %v953_v29  ;;  %v884_v47 = vsel %vm1978_vm2, %v879_v41, %v883_v35  ;;  %v1026_v51 = vsel %vm1024_vm5, %v1025_v50, 0  ;;  %vm573_vm9 = vcmask 121952  }
  0xaa   : > { %v1417_v45 = vcombine.low %v940_v32, %v954_v43  ;;  %v893_v48 = vrot.slane %v892_v44, 4  ;;  %v1028_v53 = vand.u32 %v1593_v46, %v1026_v51  ;;  %vm730_vm10 = vcmask 146552   ;;  %p1692_p1 = pnand %p1691_p10, %p1685_p7 }
  0xab   : > { %vm776_vm11 = vcmask 171152   ;;  %vm822_vm12 = vcmask 195752   ;;  %vm979_vm13 = vcmask 220352   ;;  %vm1010_vm14 = vcmask 220160  }
  0xac   : > { %v898_v52 = vsel %vm1978_vm2, %v893_v48, %v897_v40  ;;  %1463 = vmatprep.subr.bf16.mxu0 %v1028_v53  ;;  %1474 = vmatprep.subr.bf16.mxu1 %v1028_v53  ;;  %vm1183_vm15 = vcmask 125952  }
  0xad   : > { %971 = vrot.lane.b32.xlu1 %v1416_v4, %s1771_s17  ;;  %812 = vrot.lane.b32.xlu0 %v1587_v19, %s1770_s11  ;;  %v1415_v54 = vcombine.low %v884_v47, %v898_v52 }
  0xae   : > { %1464 = vmatpush3.bf16.msra.mxu0 %v1028_v53  ;;  %1476 = vmatpush3.bf16.msra.mxu1 %v1028_v53 }
  0xb1   : > { %967 = vrot.lane.b32.xlu0 %v1414_v20, %s1771_s17  ;;  %973 = vrot.lane.b32.xlu1 %v1417_v45, %s1771_s17 }
  0xb5   : > { %969 = vrot.lane.b32.xlu0 %v1415_v54, %s1771_s17 }
  0xde   : > { %v312_v55 = vpop.permute.xlu1 %311  ;;  %v310_v56 = vpop.permute.xlu0 %309 }
  0xdf   : > { %323 = vst.msk [vmem:[#allocation2 + $0x8] sm:$0xff] %vm321_vm6, %v312_v55  ;;  %322 = vst.msk [vmem:[#allocation2] sm:$0xff] %vm321_vm6, %v310_v56 }
  0xe2   : > { %v316_v57 = vpop.permute.xlu1 %315  ;;  %v314_v58 = vpop.permute.xlu0 %313 }
  0xe3   : > { %325 = vst.msk [vmem:[#allocation2 + $0x18] sm:$0xff] %vm321_vm6, %v316_v57  ;;  %324 = vst.msk [vmem:[#allocation2 + $0x10] sm:$0xff] %vm321_vm6, %v314_v58 }
  0xe6   : > { %v520_v59 = vpop.permute.xlu1 %519  ;;  %v516_v33 = vpop.permute.xlu0 %515 }
  0xed   : > { %v474_v60 = vpop.permute.xlu1 %473 }
  0xee   : > { %484 = vst.msk [vmem:[#allocation2 + $0x10] sm:$0xff] %vm481_vm7, %v474_v60 }
  0xef   : > { %530 = vst.msk [vmem:[#allocation2 + $0x10] sm:$0xff] %vm527_vm8, %v520_v59 }
  0xf0   : > { %v470_v61 = vpop.permute.xlu0 %469 }
  0xf1   : > { %482 = vst.msk [vmem:[#allocation2] sm:$0xff] %vm481_vm7, %v470_v61 }
  0xf2   : > { %528 = vst.msk [vmem:[#allocation2] sm:$0xff] %vm527_vm8, %v516_v33 }
  0xf7   : > { %v476_v62 = vpop.permute.xlu1 %475 }
  0xf8   : > { %485 = vst.msk [vmem:[#allocation2 + $0x18] sm:$0xff] %vm481_vm7, %v476_v62 }
  0xfb   : > { %v472_v63 = vpop.permute.xlu0 %471  ;;  %v522_v0 = vpop.permute.xlu1 %521 }
  0xfc   : > { %483 = vst.msk [vmem:[#allocation2 + $0x8] sm:$0xff] %vm481_vm7, %v472_v63 }
  0xfd   : > { %531 = vst.msk [vmem:[#allocation2 + $0x18] sm:$0xff] %vm527_vm8, %v522_v0 }
  0xff   : > { %v518_v1 = vpop.permute.xlu0 %517  ;;  %v566_v2 = vpop.permute.xlu1 %565 }
 0x100   : > { %529 = vst.msk [vmem:[#allocation2 + $0x8] sm:$0xff] %vm527_vm8, %v518_v1 }
 0x101   : > { %576 = vst.msk [vmem:[#allocation2 + $0x10] sm:$0xff] %vm573_vm9, %v566_v2 }
 0x103   : > { %v562_v3 = vpop.permute.xlu0 %561  ;;  %v568_v4 = vpop.permute.xlu1 %567 }
 0x104   : > { %574 = vst.msk [vmem:[#allocation2] sm:$0xff] %vm573_vm9, %v562_v3  ;;  %577 = vst.msk [vmem:[#allocation2 + $0x18] sm:$0xff] %vm573_vm9, %v568_v4 }
 0x107   : > { %v564_v5 = vpop.permute.xlu0 %563  ;;  %v723_v6 = vpop.permute.xlu1 %722 }
 0x108   : > { %575 = vst.msk [vmem:[#allocation2 + $0x8] sm:$0xff] %vm573_vm9, %v564_v5 }
 0x109   : > { %733 = vst.msk [vmem:[#allocation2 + $0x10] sm:$0xff] %vm730_vm10, %v723_v6 }
 0x10b   : > { %v719_v7 = vpop.permute.xlu0 %718  ;;  %v725_v8 = vpop.permute.xlu1 %724 }
 0x10c   : > { %731 = vst.msk [vmem:[#allocation2] sm:$0xff] %vm730_vm10, %v719_v7  ;;  %734 = vst.msk [vmem:[#allocation2 + $0x18] sm:$0xff] %vm730_vm10, %v725_v8 }
 0x10f   : > { %v769_v9 = vpop.permute.xlu1 %768  ;;  %v721_v10 = vpop.permute.xlu0 %720 }
 0x110   : > { %779 = vst.msk [vmem:[#allocation2 + $0x10] sm:$0xff] %vm776_vm11, %v769_v9 }
 0x111   : > { %732 = vst.msk [vmem:[#allocation2 + $0x8] sm:$0xff] %vm730_vm10, %v721_v10 }
 0x113   : > { %v771_v11 = vpop.permute.xlu1 %770  ;;  %v765_v12 = vpop.permute.xlu0 %764 }
 0x114   : > { %780 = vst.msk [vmem:[#allocation2 + $0x18] sm:$0xff] %vm776_vm11, %v771_v11  ;;  %777 = vst.msk [vmem:[#allocation2] sm:$0xff] %vm776_vm11, %v765_v12 }
 0x117   : > { %v815_v13 = vpop.permute.xlu1 %814  ;;  %v767_v14 = vpop.permute.xlu0 %766 }
 0x118   : > { %825 = vst.msk [vmem:[#allocation2 + $0x10] sm:$0xff] %vm822_vm12, %v815_v13 }
 0x119   : > { %778 = vst.msk [vmem:[#allocation2 + $0x8] sm:$0xff] %vm776_vm11, %v767_v14 }
 0x11b   : > { %v817_v15 = vpop.permute.xlu1 %816  ;;  %v811_v16 = vpop.permute.xlu0 %810 }
 0x11c   : > { %826 = vst.msk [vmem:[#allocation2 + $0x18] sm:$0xff] %vm822_vm12, %v817_v15  ;;  %823 = vst.msk [vmem:[#allocation2] sm:$0xff] %vm822_vm12, %v811_v16 }
 0x11f   : > { %v972_v17 = vpop.permute.xlu1 %971  ;;  %v813_v18 = vpop.permute.xlu0 %812 }
 0x120   : > { %982 = vst.msk [vmem:[#allocation2 + $0x10] sm:$0xff] %vm979_vm13, %v972_v17 }
 0x121   : > { %824 = vst.msk [vmem:[#allocation2 + $0x8] sm:$0xff] %vm822_vm12, %v813_v18 }
 0x123   : > { %v968_v19 = vpop.permute.xlu0 %967  ;;  %v974_v20 = vpop.permute.xlu1 %973 }
 0x124   : > { %980 = vst.msk [vmem:[#allocation2] sm:$0xff] %vm979_vm13, %v968_v19  ;;  %983 = vst.msk [vmem:[#allocation2 + $0x18] sm:$0xff] %vm979_vm13, %v974_v20 }
 0x127   : > { %v986_v21 = vld [vmem:[#allocation2 + $0x10] sm:$0xff]  ;;  %v970_v22 = vpop.permute.xlu0 %969 }
 0x128   : > { %1469 = vmatprep.mubr.msk.bf16.mxu1 %vm1010_vm14, %v986_v21  ;;  %981 = vst.msk [vmem:[#allocation2 + $0x8] sm:$0xff] %vm979_vm13, %v970_v22 }
 0x12b   : > { %v984_v23 = vld [vmem:[#allocation2] sm:$0xff]  ;;  %v987_v24 = vld [vmem:[#allocation2 + $0x18] sm:$0xff] }
 0x12c   : > { %1465 = vmatprep.mubr.msk.bf16.mxu0 %vm1010_vm14, %v984_v23  ;;  %1470 = vmatmul.mubr.msk.bf16.vlgmr.msra.gmra.mrb[0].mxu1 %vm1010_vm14, %v987_v24 }
 0x12f   : > { %v985_v25 = vld [vmem:[#allocation2 + $0x8] sm:$0xff] }
 0x130   : > { %1466 = vmatmul.mubr.msk.bf16.vlgmr.msra.gmra.mrb[0].mxu0 %vm1010_vm14, %v985_v25 }
 0x1ff   : > { %v1471_v27 = vpop.f32.mrb[0].mxu1 }
 0x200   : > { %v1089_v28 = vadd.f32 %v1471_v27, %v1418_v26  ;;  %v1080_v29 = vpop.f32.mrb[1].mxu1 }
 0x201   : > { %v1081_v30 = vadd.f32 %v1418_v26, %v1080_v29  ;;  %v1472_v31 = vpop.f32.mrb[2].mxu1 }
 0x202   : > { %v1431_v32 = vmul.f32 -1.442695, %v1089_v28  ;;  %v1092_v34 = vadd.f32 %v1472_v31, %v1418_v26  ;;  %v1083_v35 = vpop.f32.mrb[3].mxu1 }
 0x203   : > { %v1467_v36 = vpop.f32.mrb[0].mxu0  ;;  %v1429_v37 = vmul.f32 -1.442695, %v1081_v30  ;;  %v1084_v38 = vadd.f32 %v1418_v26, %v1083_v35 }
 0x204   : > { %v1073_v39 = vadd.f32 %v1467_v36, %v1418_v26  ;;  %1594 = vpow2.f32 %v1431_v32  ;;  %v1064_v40 = vpop.f32.mrb[1].mxu0  ;;  %v1432_v41 = vmul.f32 -1.442695, %v1092_v34 }
 0x205   : > { %v1065_v42 = vadd.f32 %v1418_v26, %v1064_v40  ;;  %1596 = vpow2.f32 %v1429_v37  ;;  %v1468_v43 = vpop.f32.mrb[2].mxu0  ;;  %v1430_v44 = vmul.f32 -1.442695, %v1084_v38 }
 0x206   : > { %v1427_v45 = vmul.f32 -1.442695, %v1073_v39  ;;  %v1076_v46 = vadd.f32 %v1468_v43, %v1418_v26  ;;  %1598 = vpow2.f32 %v1432_v41  ;;  %v1067_v47 = vpop.f32.mrb[3].mxu0 }
 0x207   : > { %v1425_v48 = vmul.f32 -1.442695, %v1065_v42  ;;  %v1068_v49 = vadd.f32 %v1418_v26, %v1067_v47  ;;  %1600 = vpow2.f32 %v1430_v44 }
 0x208   : > { %1602 = vpow2.f32 %v1427_v45  ;;  %v1428_v50 = vmul.f32 -1.442695, %v1076_v46 }
 0x209   : > { %1604 = vpow2.f32 %v1425_v48  ;;  %v1426_v51 = vmul.f32 -1.442695, %v1068_v49 }
 0x20a   : > { %1606 = vpow2.f32 %v1428_v50 }
 0x20b   : > { %1608 = vpow2.f32 %v1426_v51 }
 0x20e   : > { %v1595_v52 = vpop.eup %1594 }
 0x20f   : > { %v1597_v53 = vpop.eup %1596  ;;  %v1125_v54 = vadd.f32 1.0, %v1595_v52 }
 0x210   : > { %v1599_v55 = vpop.eup %1598  ;;  %v1123_v56 = vadd.f32 1.0, %v1597_v53 }
 0x211   : > { %v1601_v57 = vpop.eup %1600  ;;  %1610 = vrcp.f32 %v1125_v54  ;;  %v1126_v58 = vadd.f32 1.0, %v1599_v55 }
 0x212   : > { %v1603_v59 = vpop.eup %1602  ;;  %1612 = vrcp.f32 %v1123_v56  ;;  %v1124_v33 = vadd.f32 1.0, %v1601_v57 }
 0x213   : > { %v1605_v60 = vpop.eup %1604  ;;  %v1121_v61 = vadd.f32 1.0, %v1603_v59  ;;  %1614 = vrcp.f32 %v1126_v58 }
 0x214   : > { %v1607_v62 = vpop.eup %1606  ;;  %v1119_v63 = vadd.f32 1.0, %v1605_v60  ;;  %1616 = vrcp.f32 %v1124_v33 }
 0x215   : > { %v1609_v0 = vpop.eup %1608  ;;  %1618 = vrcp.f32 %v1121_v61  ;;  %v1122_v1 = vadd.f32 1.0, %v1607_v62 }
 0x216   : > { %1620 = vrcp.f32 %v1119_v63  ;;  %v1120_v2 = vadd.f32 1.0, %v1609_v0 }
 0x217   : > { %1622 = vrcp.f32 %v1122_v1 }
 0x218   : > { %1624 = vrcp.f32 %v1120_v2 }
 0x21b   : > { %v1611_v3 = vpop.eup %1610 }
 0x21c   : > { %v1613_v4 = vpop.eup %1612  ;;  %v1149_v5 = vmul.f32 %v1611_v3, %v1089_v28 }
 0x21d   : > { %v1615_v6 = vpop.eup %1614  ;;  %v1147_v7 = vmul.f32 %v1613_v4, %v1081_v30 }
 0x21e   : > { %v1617_v8 = vpop.eup %1616  ;;  %v1452_v9 = vpack.c.bf16 %v1149_v5, %v1149_v5  ;;  %v1150_v10 = vmul.f32 %v1615_v6, %v1092_v34 }
 0x21f   : > { %v1619_v11 = vpop.eup %1618  ;;  %v1450_v12 = vpack.c.bf16 %v1147_v7, %v1147_v7  ;;  %v1148_v13 = vmul.f32 %v1617_v8, %v1084_v38 }
 0x220   : > { %v1621_v14 = vpop.eup %1620  ;;  %v1145_v15 = vmul.f32 %v1619_v11, %v1073_v39  ;;  %1190 = vst.msk [vmem:[%s240_s20 + $0x18] sm:$0xf] %vm1183_vm15, %v1452_v9  ;;  %v1453_v16 = vpack.c.bf16 %v1150_v10, %v1150_v10 }
 0x221   : > { %v1623_v17 = vpop.eup %1622  ;;  %v1143_v18 = vmul.f32 %v1621_v14, %v1065_v42  ;;  %1188 = vst.msk [vmem:[%s240_s20 + $0x10] sm:$0xf] %vm1183_vm15, %v1450_v12  ;;  %v1451_v19 = vpack.c.bf16 %v1148_v13, %v1148_v13 }
 0x222   : > { %v1625_v20 = vpop.eup %1624  ;;  %v1448_v21 = vpack.c.bf16 %v1145_v15, %v1145_v15  ;;  %v1146_v22 = vmul.f32 %v1623_v17, %v1076_v46  ;;  %1191 = vst.msk [vmem:[%s240_s20 + $0x1c] sm:$0xf] %vm1183_vm15, %v1453_v16 }
 0x223   : > { %v1446_v23 = vpack.c.bf16 %v1143_v18, %v1143_v18  ;;  %v1144_v24 = vmul.f32 %v1625_v20, %v1068_v49  ;;  %1189 = vst.msk [vmem:[%s240_s20 + $0x14] sm:$0xf] %vm1183_vm15, %v1451_v19 }
 0x224   : > { %1186 = vst.msk [vmem:[%s240_s20 + $0x8] sm:$0xf] %vm1183_vm15, %v1448_v21  ;;  %v1449_v25 = vpack.c.bf16 %v1146_v22, %v1146_v22 }
 0x225   : > { %1184 = vst.msk [vmem:[%s240_s20] sm:$0xf] %vm1183_vm15, %v1446_v23  ;;  %v1447_v26 = vpack.c.bf16 %v1144_v24, %v1144_v24 }
 0x226   : > { %1187 = vst.msk [vmem:[%s240_s20 + $0xc] sm:$0xf] %vm1183_vm15, %v1449_v25 }
 0x227   : > { %1185 = vst.msk [vmem:[%s240_s20 + $0x4] sm:$0xf] %vm1183_vm15, %v1447_v26 }
 0x228   : > { %1695 = shalt.err (!%p1692_p1)
}
 0x229   : > { %s1696_s26 = scalar_lea.hbm %s2131_s7, 512  ;;  %s1700_s9 = scalar_lea.hbm %s2183_s3, 1024 }
 0x22a   : > { %p1697_p3 = scmp.ne.s32.totalorder %s2131_s7, %s1696_s26  ;;  %p1701_p6 = scmp.lt.u32.totalorder %s2131_s7, %s2183_s3 }
 0x22b   : > { %p1702_p11 = scmp.lt.u32.totalorder %s1700_s9, %s1696_s26  ;;  %p1704_p0 = scmp.lt.u32.totalorder %s1696_s26, %s2131_s7 }
 0x22c   : > { %p1698_p2 = pnand %p1697_p3, %p2202_p13 }
 0x22d   : > { %p1703_p12 = por %p1702_p11, %p1701_p6 }
 0x22e   : > { %p1699_p5 = pneg %p1698_p2 }
 0x22f   : > { %p1705_p7 = por %p1704_p0, %p1703_p12 }
 0x231   : > { %p1706_p8 = pnand %p1705_p7, %p1699_p5 }
 0x233   : > { %1709 = shalt.err (!%p1706_p8)
}
 0x234   : > { %s1774_s19 = smov 64   ;;  %s1775_s20 = smov 4  }
 0x235   : > { %1497 = dma.vmem_to_hbm [thread:$0]  (%p2202_p13), %s2133_s5, 512, %s2131_s7, %s1193_s16, %s1774_s19, %s1774_s19, %s1775_s20  }
 0x236 PF: > { %s1221_s30 = sand.u32 1, %s1740_s12   ;;  %p2203_p9 = scmp.ne.s32.totalorder %s2192_s25, 0 }
 0x237   : > { %s1222_s29 = scalar_lea.sflag [#allocation5], %s1221_s30 }
 0x238   : > { %p1507_p10 = pnand %p1302_p4, %p2203_p9 }
 0x23a   : > { %1735 = dma.done.wait (!%p1507_p10), %s1222_s29, 512  }
 0x23b   : > { %1737 = vsyncadd (!%p1507_p10), %s1222_s29, 4294966784  ;;  %p17_p1 = scmp.ge.s32.totalorder %s1821_s18, 4   ;;  %s2204_s12 = smov %s1744_s13 }
 0x23c   : > { %s2205_s13 = smov %s1748_s14  ;;  %s2206_s14 = smov %s1833_s21 }
 0x23d   : > { %s2207_s15 = smov %s1821_s18  ;;  %19 = sbr.rel (!%p17_p1) target bundleno = 6 (0x6), region = 95 }
 0x244   :  { %1227 = vsyncpa [#allocation4], 1 }
 0x245   :  { %1229 = vsyncpa [#allocation4 + $0x1], 1 }
 0x246   :  { %1230 = vsyncpa [#allocation7], 1 }
 0x247   :  { %1231 = vsyncpa [#allocation5], 1 }
 0x248   :  { %1233 = vsyncpa [#allocation5 + $0x1], 1 }

// kernel: discriminator_forward.7
= control target key start
LH: loop header
LB: loop body
LE: loop exit
PB: predicated region body
PF: predicated region fallthrough
CT: control target
= control target key end

     0   :  { %12 = vsyncpa [#allocation5], 0  ;;  %s2285_s0 = inlined_call_operand.hbm [shape: bf16[4,2,3,3,32], index: 0, kind: input, shape index: {}]   ;;  %s2286_s1 = inlined_call_operand.hbm [shape: bf16[288,64], index: 1, kind: input, shape index: {}]   ;;  %s2287_s2 = inlined_call_operand.hbm [shape: f32[1,64], index: 2, kind: input, shape index: {}]   ;;  %s2288_s3 = inlined_call_operand.hbm [shape: f32[1,32], index: 3, kind: input, shape index: {}]   ;;  %s2289_s4 = inlined_call_operand.hbm [shape: f32[1,32], index: 4, kind: input, shape index: {}]   ;;  %s2290_s5 = inlined_call_operand.hbm [shape: bf16[8,64], index: 5, kind: output, shape index: {0}]   ;;  %s2291_s6 = inlined_call_operand.hbm [shape: f32[1,2,64], index: 6, kind: output, shape index: {1}]  }
   0x1   :  { %13 = vsyncpa [#allocation8], 0 }
   0x2   :  { %14 = vsyncpa [#allocation11], 0 }
   0x3   :  { %15 = vsyncpa [#allocation6], 0 }
   0x4   :  { %16 = vsyncpa [#allocation15], 0  ;;  %s1775_s21 = smov [#allocation7]   ;;  %s1611_s25 = scalar_lea.hbm %s2286_s1, 2304 }
   0x5   :  { %s34_s22 = sshll.u32 %s1775_s21, 4  ;;  %p1612_p0 = scmp.ne.s32.totalorder %s2286_s1, %s1611_s25  ;;  %s35_s22 = int_to_ptr.vmem [resolvable:$true] %s34_s22 }
   0x6   :  { %p1615_p1 = scmp.lt.u32.totalorder %s1611_s25, %s2286_s1 }
   0x8   :  { %p1617_p2 = pnand %p1615_p1, %p1612_p0 }
   0xa   :  { %1620 = shalt.err (!%p1617_p2)
}
   0xb   :  { %s1621_s30 = scalar_lea.vmem %s35_s22, 2304  ;;  %p1626_p4 = scmp.lt.s32.totalorder %s35_s22, %s35_s22 }
   0xc   :  { %p1622_p3 = scmp.ne.s32.totalorder %s35_s22, %s1621_s30  ;;  %p1627_p5 = scmp.lt.s32.totalorder %s1621_s30, %s1621_s30 }
   0xe   :  { %p1628_p6 = por %p1627_p5, %p1626_p4 }
  0x10   :  { %p1629_p7 = pnand %p1628_p6, %p1622_p3 }
  0x12   :  { %1632 = shalt.err (!%p1629_p7)
}
  0x13   :  { %s1776_s7 = smov 64   ;;  %s1777_s8 = smov 4  }
  0x14   :  { %40 = dma.hbm_to_vmem [thread:$0]  %s2286_s1, 2304, %s35_s22, [#allocation8], %s1776_s7, %s1776_s7, %s1777_s8  }
  0x15   :  { %s1778_s11 = smov [#allocation10]   ;;  %s1779_s13 = smov [#allocation4]  }
  0x16   :  { %s57_s12 = sshll.u32 %s1778_s11, 4  ;;  %s22_s14 = sshll.u32 %s1779_s13, 4  ;;  %s58_s12 = int_to_ptr.vmem [resolvable:$true] %s57_s12  ;;  %s23_s14 = int_to_ptr.vmem [resolvable:$true] %s22_s14 }
  0x17   :  { %s1633_s17 = scalar_lea.hbm %s2288_s3, 16 }
  0x18   :  { %p1634_p8 = scmp.ne.s32.totalorder %s2288_s3, %s1633_s17  ;;  %p1637_p9 = scmp.lt.u32.totalorder %s1633_s17, %s2288_s3 }
  0x1a   :  { %p1639_p10 = pnand %p1637_p9, %p1634_p8 }
  0x1c   :  { %1642 = shalt.err (!%p1639_p10)
}
  0x1d   :  { %s1643_s1 = scalar_lea.vmem %s58_s12, 16  ;;  %s1647_s22 = scalar_lea.vmem %s58_s12, 32 }
  0x1e   :  { %p1644_p11 = scmp.ne.s32.totalorder %s58_s12, %s1643_s1  ;;  %p1648_p12 = scmp.lt.s32.totalorder %s58_s12, %s58_s12 }
  0x1f   :  { %p1649_p13 = scmp.lt.s32.totalorder %s1647_s22, %s1643_s1 }
  0x21   :  { %p1650_p0 = por %p1649_p13, %p1648_p12 }
  0x23   :  { %p1651_p1 = pnand %p1650_p0, %p1644_p11 }
  0x25   :  { %1654 = shalt.err (!%p1651_p1)
}
  0x26   :  { %60 = dma.hbm_to_vmem [thread:$0]  %s2288_s3, 16, %s58_s12, [#allocation11]  }
  0x27   :  { %s1655_s27 = scalar_lea.hbm %s2285_s0, 768 }
  0x28   :  { %p1656_p2 = scmp.ne.s32.totalorder %s2285_s0, %s1655_s27  ;;  %p1659_p3 = scmp.lt.u32.totalorder %s1655_s27, %s2285_s0 }
  0x2a   :  { %p1661_p4 = pnand %p1659_p3, %p1656_p2 }
  0x2c   :  { %1664 = shalt.err (!%p1661_p4)
}
  0x2d   :  { %s1665_s9 = scalar_lea.vmem %s23_s14, 768  ;;  %p1670_p6 = scmp.lt.s32.totalorder %s23_s14, %s23_s14 }
  0x2e   :  { %p1666_p5 = scmp.ne.s32.totalorder %s23_s14, %s1665_s9  ;;  %p1671_p7 = scmp.lt.s32.totalorder %s1665_s9, %s1665_s9 }
  0x30   :  { %p1672_p8 = por %p1671_p7, %p1670_p6 }
  0x32   :  { %p1673_p9 = pnand %p1672_p8, %p1666_p5 }
  0x34   :  { %1676 = shalt.err (!%p1673_p9)
}
  0x35   :  { %s1780_s3 = smov 32   ;;  %s1781_s10 = smov 2  }
  0x36   :  { %28 = dma.hbm_to_vmem [thread:$0]  %s2285_s0, 768, %s23_s14, [#allocation5], %s1780_s3, %s1780_s3, %s1781_s10  }
  0x37   :  { %s1782_s13 = smov [#allocation9]   ;;  %s1783_s16 = smov [#allocation12]  }
  0x38   :  { %s47_s15 = sshll.u32 %s1782_s13, 4  ;;  %s67_s17 = sshll.u32 %s1783_s16, 4  ;;  %s48_s15 = int_to_ptr.vmem [resolvable:$true] %s47_s15  ;;  %s68_s17 = int_to_ptr.vmem [resolvable:$true] %s67_s17 }
  0x39   :  { %s1677_s20 = scalar_lea.hbm %s2287_s2, 16 }
  0x3a   :  { %p1678_p10 = scmp.ne.s32.totalorder %s2287_s2, %s1677_s20  ;;  %p1681_p11 = scmp.lt.u32.totalorder %s1677_s20, %s2287_s2 }
  0x3c   :  { %p1683_p12 = pnand %p1681_p11, %p1678_p10 }
  0x3e   :  { %1686 = shalt.err (!%p1683_p12)
}
  0x3f   :  { %s1687_s0 = scalar_lea.vmem %s48_s15, 16  ;;  %s1691_s14 = scalar_lea.vmem %s48_s15, 32 }
  0x40   :  { %p1688_p13 = scmp.ne.s32.totalorder %s48_s15, %s1687_s0  ;;  %p1692_p0 = scmp.lt.s32.totalorder %s48_s15, %s48_s15 }
  0x41   :  { %p1693_p1 = scmp.lt.s32.totalorder %s1691_s14, %s1687_s0 }
  0x43   :  { %p1694_p2 = por %p1693_p1, %p1692_p0 }
  0x45   :  { %p1695_p3 = pnand %p1694_p2, %p1688_p13 }
  0x47   :  { %1698 = shalt.err (!%p1695_p3)
}
  0x48   :  { %50 = dma.hbm_to_vmem [thread:$0]  %s2287_s2, 16, %s48_s15, [#allocation8]  }
  0x49   :  { %s1699_s28 = scalar_lea.hbm %s2289_s4, 16 }
  0x4a   :  { %p1700_p4 = scmp.ne.s32.totalorder %s2289_s4, %s1699_s28  ;;  %p1703_p5 = scmp.lt.u32.totalorder %s1699_s28, %s2289_s4 }
  0x4c   :  { %p1705_p6 = pnand %p1703_p5, %p1700_p4 }
  0x4e   :  { %1708 = shalt.err (!%p1705_p6)
}
  0x4f   :  { %s1709_s10 = scalar_lea.vmem %s68_s17, 16  ;;  %s1713_s11 = scalar_lea.vmem %s68_s17, 32 }
  0x50   :  { %p1710_p7 = scmp.ne.s32.totalorder %s68_s17, %s1709_s10  ;;  %p1714_p8 = scmp.lt.s32.totalorder %s68_s17, %s68_s17 }
  0x51   :  { %p1715_p9 = scmp.lt.s32.totalorder %s1713_s11, %s1709_s10 }
  0x53   :  { %p1716_p10 = por %p1715_p9, %p1714_p8 }
  0x55   :  { %p1717_p11 = pnand %p1716_p10, %p1710_p7 }
  0x57   :  { %1720 = shalt.err (!%p1717_p11)
}
  0x58   :  { %70 = dma.hbm_to_vmem [thread:$0]  %s2289_s4, 16, %s68_s17, [#allocation11]  }
  0x59   :  { %1765 = dma.done.wait [#allocation5], 768  }
  0x5a   :  { %1766 = vsyncadd [#allocation5], 4294966528 }
  0x5b   :  { %1767 = dma.done.wait [#allocation8], 2320  }
  0x5c   :  { %1768 = vsyncadd [#allocation8], 4294964976 }
  0x5d   :  { %1769 = dma.done.wait [#allocation11], 32  }
  0x5e   :  { %1770 = vsyncadd [#allocation11], 4294967264  ;;  %v89_v0 = vlaneseq  ;;  %v1784_v1 = vmov 0.0   ;;  %v1785_v3 = vmov 1935823168   ;;  %vm191_vm4 = vcmask 254976  }
  0x5f   :  { %1459 = vmatprep.subr.bf16.mxu1 %v1784_v1  ;;  %v1892_v4 = vunpack.c.l.s4 %v1785_v3  ;;  %v223_v5 = vld [vmem:[#allocation4 + $0xc] sm:$0x3]  ;;  %v224_v6 = vld [vmem:[#allocation4 + $0xe] sm:$0x3]  ;;  %v226_v7 = vld [vmem:[#allocation4 + $0x12] sm:$0x3] }
  0x60   :  { %v1890_v2 = vshrl.u32 %v89_v0, 7  ;;  %v227_v8 = vld [vmem:[#allocation4 + $0x14] sm:$0x3]  ;;  %v229_v9 = vunpack.c.l.bf16 %v223_v5  ;;  %v1897_v10 = vld [vmem:[#allocation10] ss:$0 sm:$0xff]  ;;  %v230_v11 = vunpack.c.l.bf16 %v224_v6  ;;  %v232_v12 = vunpack.c.l.bf16 %v226_v7  ;;  %s1786_s4 = smov 96  }
  0x61   :  { %v233_v13 = vunpack.c.l.bf16 %v227_v8  ;;  %v323_v17 = vld [vmem:[#allocation4 + $0x1c] sm:$0x3]  ;;  %v326_v18 = vld [vmem:[#allocation4 + $0x22] sm:$0x3]  ;;  %v528_v19 = vunpack.c.0.s8 %v1892_v4  ;;  %v1908_v20 = vld [vmem:[#allocation12] ss:$0 sm:$0xff] }
  0x62   :  { %vm91_vm0 = vcmp.ge.s32.totalorder %v1890_v2, 1  ;;  %vm94_vm1 = vcmp.lt.s32.totalorder %v1890_v2, 3  ;;  %vm215_vm2 = vcmp.lt.s32.totalorder %v1890_v2, 2  ;;  %v235_v16 = vmul.f32 %v1897_v10, %v229_v9  ;;  %v421_v25 = vld [vmem:[#allocation4 + $0x28] sm:$0x3] }
  0x63   :  { %vm1899_vm3 = vmand %vm91_vm0, %vm94_vm1  ;;  %v1904_v15 = vsel %vm215_vm2, 1.0, %v1784_v1  ;;  %v236_v21 = vmul.f32 %v1897_v10, %v230_v11  ;;  %v238_v22 = vmul.f32 %v1897_v10, %v232_v12  ;;  %v239_v23 = vmul.f32 %v1897_v10, %v233_v13  ;;  %v424_v28 = vld [vmem:[#allocation4 + $0x2e] sm:$0x3]  ;;  %v102_v39 = vld [vmem:[#allocation4 + $0x2] sm:$0x3] }
  0x64   :  { %v329_v24 = vunpack.c.l.bf16 %v323_v17  ;;  %v1914_v26 = vadd.f32 %v1908_v20, %v235_v16  ;;  %v332_v27 = vunpack.c.l.bf16 %v326_v18  ;;  %v427_v29 = vunpack.c.l.bf16 %v421_v25  ;;  %v103_v40 = vld [vmem:[#allocation4 + $0x4] sm:$0x3]  ;;  %v105_v48 = vld [vmem:[#allocation4 + $0x8] sm:$0x3]  ;;  %v106_v49 = vld [vmem:[#allocation4 + $0xa] sm:$0x3] }
  0x65   :  { %v1919_v30 = vsel %vm1899_vm3, 1.0, %v1784_v1  ;;  %v1922_v31 = vadd.f32 %v1908_v20, %v236_v21  ;;  %v1925_v32 = vadd.f32 %v1908_v20, %v238_v22  ;;  %v1928_v33 = vadd.f32 %v1908_v20, %v239_v23  ;;  %v321_v53 = vld [vmem:[#allocation4 + $0x18] sm:$0x3]  ;;  %v322_v60 = vld [vmem:[#allocation4 + $0x1a] sm:$0x3] }
  0x66   :  { %v335_v34 = vmul.f32 %v1897_v10, %v329_v24  ;;  %v1369_v35 = vmul.f32 -1.442695, %v1914_v26  ;;  %v338_v36 = vmul.f32 %v1897_v10, %v332_v27  ;;  %v430_v37 = vunpack.c.l.bf16 %v424_v28  ;;  %v324_v61 = vld [vmem:[#allocation4 + $0x1e] sm:$0x3]  ;;  %v325_v7 = vld [vmem:[#allocation4 + $0x20] sm:$0x3] }
  0x67   :  { %v433_v38 = vmul.f32 %v1897_v10, %v427_v29  ;;  %v1370_v41 = vmul.f32 -1.442695, %v1922_v31  ;;  %v1372_v42 = vmul.f32 -1.442695, %v1925_v32  ;;  %v1373_v43 = vmul.f32 -1.442695, %v1928_v33 }
  0x68   :  { %v1938_v44 = vadd.f32 %v1908_v20, %v335_v34  ;;  %1515 = vpow2.f32 %v1369_v35  ;;  %v1941_v45 = vadd.f32 %v1908_v20, %v338_v36  ;;  %v436_v46 = vmul.f32 %v1897_v10, %v430_v37  ;;  %v101_v16 = vld [vmem:[#allocation4] sm:$0x3]  ;;  %v104_v27 = vld [vmem:[#allocation4 + $0x6] sm:$0x3]  ;;  %v1490_v28 = vld [vmem:[#allocation7 + $0x40] sm:$0xff]  }
  0x69   :  { %v1945_v47 = vadd.f32 %v1908_v20, %v433_v38  ;;  %1517 = vpow2.f32 %v1370_v41  ;;  %v108_v51 = vunpack.c.l.bf16 %v102_v39  ;;  %v109_v52 = vunpack.c.l.bf16 %v103_v40  ;;  %v1491_v29 = vld [vmem:[#allocation7] sm:$0xff]   ;;  %1434 = vmatprep.subr.bf16.mxu0 %v1490_v28  ;;  %v420_v4 = vld [vmem:[#allocation4 + $0x26] sm:$0x3] }
  0x6a   :  { %v1377_v50 = vmul.f32 -1.442695, %v1938_v44  ;;  %1519 = vpow2.f32 %v1372_v42  ;;  %v1380_v54 = vmul.f32 -1.442695, %v1941_v45  ;;  %v1950_v55 = vadd.f32 %v1908_v20, %v436_v46  ;;  %v225_v38 = vld [vmem:[#allocation4 + $0x10] sm:$0x3]  ;;  %1435 = vmatpush3.bf16.msra.mxu0 %v1491_v29 }
  0x6b   :  { %v1383_v56 = vmul.f32 -1.442695, %v1945_v47  ;;  %1521 = vpow2.f32 %v1373_v43  ;;  %v111_v57 = vunpack.c.l.bf16 %v105_v48  ;;  %v112_v58 = vunpack.c.l.bf16 %v106_v49  ;;  %v228_v43 = vld [vmem:[#allocation4 + $0x16] sm:$0x3]  ;;  %v1492_v46 = vld [vmem:[#allocation7 + $0x48] sm:$0xff]  }
  0x6c   :  { %v120_v59 = vmul.f32 %v1897_v10, %v108_v51  ;;  %1523 = vpow2.f32 %v1377_v50  ;;  %v1386_v62 = vmul.f32 -1.442695, %v1950_v55  ;;  %v121_v63 = vmul.f32 %v1897_v10, %v109_v52  ;;  %v1493_v52 = vld [vmem:[#allocation7 + $0x8] sm:$0xff]   ;;  %1436 = vmatprep.subr.bf16.mxu0 %v1492_v46 }
  0x6d   :  { %v327_v0 = vunpack.c.l.bf16 %v321_v53  ;;  %1525 = vpow2.f32 %v1380_v54  ;;  %v123_v3 = vmul.f32 %v1897_v10, %v111_v57  ;;  %v124_v5 = vmul.f32 %v1897_v10, %v112_v58  ;;  %v1494_v58 = vld [vmem:[#allocation7 + $0x50] sm:$0xff]  }
  0x6e   :  { %v1959_v6 = vadd.f32 %v1908_v20, %v120_v59  ;;  %1527 = vpow2.f32 %v1383_v56  ;;  %v1962_v8 = vadd.f32 %v1908_v20, %v121_v63  ;;  %v328_v9 = vunpack.c.l.bf16 %v322_v60  ;;  %1437 = vmatpush3.bf16.msra.mxu0 %v1493_v52 }
  0x6f   :  { %v330_v11 = vunpack.c.l.bf16 %v324_v61  ;;  %1529 = vpow2.f32 %v1386_v62  ;;  %v1965_v12 = vadd.f32 %v1908_v20, %v123_v3  ;;  %v1968_v13 = vadd.f32 %v1908_v20, %v124_v5  ;;  %1438 = vmatprep.subr.bf16.mxu0 %v1494_v58  ;;  %v423_v58 = vld [vmem:[#allocation4 + $0x2c] sm:$0x3] }
  0x70   :  { %v1363_v14 = vmul.f32 -1.442695, %v1959_v6  ;;  %v1364_v17 = vmul.f32 -1.442695, %v1962_v8  ;;  %v331_v18 = vunpack.c.l.bf16 %v325_v7  ;;  %v333_v21 = vmul.f32 %v1897_v10, %v327_v0 }
  0x71   :  { %v334_v22 = vmul.f32 %v1897_v10, %v328_v9  ;;  %v1366_v23 = vmul.f32 -1.442695, %v1965_v12  ;;  %v1367_v24 = vmul.f32 -1.442695, %v1968_v13  ;;  %v336_v25 = vmul.f32 %v1897_v10, %v330_v11 }
  0x72   :  { %1531 = vpow2.f32 %v1363_v14  ;;  %v1516_v34 = vpop.eup %1515  ;;  %v337_v35 = vmul.f32 %v1897_v10, %v331_v18  ;;  %v1979_v36 = vadd.f32 %v1908_v20, %v333_v21  ;;  %v107_v42 = vunpack.c.l.bf16 %v101_v16  ;;  %v1495_v16 = vld [vmem:[#allocation7 + $0x10] sm:$0xff]  }
  0x73   :  { %1533 = vpow2.f32 %v1364_v17  ;;  %v1982_v37 = vadd.f32 %v1908_v20, %v334_v22  ;;  %v1518_v39 = vpop.eup %1517  ;;  %v265_v40 = vadd.f32 1.0, %v1516_v34  ;;  %v1985_v41 = vadd.f32 %v1908_v20, %v336_v25  ;;  %1439 = vmatpush3.bf16.msra.mxu0 %v1495_v16 }
  0x74   :  { %1535 = vpow2.f32 %v1366_v23  ;;  %v1520_v48 = vpop.eup %1519  ;;  %v266_v49 = vadd.f32 1.0, %v1518_v39  ;;  %v1988_v50 = vadd.f32 %v1908_v20, %v337_v35  ;;  %v1375_v51 = vmul.f32 -1.442695, %v1979_v36  ;;  %v1496_v23 = vld [vmem:[#allocation7 + $0x58] sm:$0xff]  }
  0x75   :  { %1537 = vpow2.f32 %v1367_v24  ;;  %v1522_v53 = vpop.eup %1521  ;;  %v268_v54 = vadd.f32 1.0, %v1520_v48  ;;  %v1992_v56 = vmul.f32 -1.442695, %v1982_v37  ;;  %v1995_v57 = vmul.f32 -1.442695, %v1985_v41  ;;  %1440 = vmatprep.subr.bf16.mxu0 %v1496_v23 }
  0x76   :  { %1539 = vrcp.f32 %v265_v40  ;;  %v1524_v59 = vpop.eup %1523  ;;  %v269_v60 = vadd.f32 1.0, %v1522_v53  ;;  %v1998_v61 = vmul.f32 -1.442695, %v1988_v50  ;;  %v110_v62 = vunpack.c.l.bf16 %v104_v27  ;;  %v422_v48 = vld [vmem:[#allocation4 + $0x2a] sm:$0x3] }
  0x77   :  { %1541 = vrcp.f32 %v266_v49  ;;  %v1526_v63 = vpop.eup %1525  ;;  %v365_v0 = vadd.f32 1.0, %v1524_v59  ;;  %v119_v3 = vmul.f32 %v1897_v10, %v107_v42  ;;  %v231_v5 = vunpack.c.l.bf16 %v225_v38  ;;  %v419_v38 = vld [vmem:[#allocation4 + $0x24] sm:$0x3]  ;;  %v305_v23 = vld [vmem:[#allocation3 + $0xe] sm:$0x3] }
  0x78   :  { %1543 = vrcp.f32 %v268_v54  ;;  %v1528_v7 = vpop.eup %1527  ;;  %v368_v9 = vadd.f32 1.0, %v1526_v63  ;;  %v122_v11 = vmul.f32 %v1897_v10, %v110_v62  ;;  %v234_v14 = vunpack.c.l.bf16 %v228_v43 }
  0x79   :  { %1545 = vrcp.f32 %v269_v60  ;;  %v1530_v17 = vpop.eup %1529  ;;  %vm192_vm5 = vsmask.f32 1280  ;;  %v463_v18 = vadd.f32 1.0, %v1528_v7  ;;  %v2003_v21 = vadd.f32 %v1908_v20, %v119_v3 }
  0x7a   :  { %1547 = vrcp.f32 %v365_v0  ;;  %v237_v22 = vmul.f32 %v1897_v10, %v231_v5  ;;  %v466_v24 = vadd.f32 1.0, %v1530_v17  ;;  %v2007_v25 = vadd.f32 %v1908_v20, %v122_v11  ;;  %vm2056_vm9 = vmand %vm191_vm4, %vm192_vm5 }
  0x7b   :  { %1549 = vrcp.f32 %v368_v9  ;;  %v240_v27 = vmul.f32 %v1897_v10, %v234_v14  ;;  %v2013_v29 = vsub.s32 %v528_v19, %v1890_v2  ;;  %v2016_v34 = vmul.f32 -1.442695, %v2003_v21  ;;  %v302_v14 = vld [vmem:[#allocation3 + $0xc] sm:$0x3] }
  0x7c   :  { %v1532_v28 = vpop.eup %1531  ;;  %1551 = vrcp.f32 %v463_v18  ;;  %v2019_v35 = vadd.f32 %v1908_v20, %v237_v22  ;;  %v2022_v42 = vmul.f32 -1.442695, %v2007_v25  ;;  %v425_v49 = vunpack.c.l.bf16 %v419_v38  ;;  %v311_v38 = vld [vmem:[#allocation3 + $0x12] sm:$0x3] }
  0x7d   :  { %v1534_v39 = vpop.eup %1533  ;;  %1553 = vrcp.f32 %v466_v24  ;;  %v156_v40 = vadd.f32 1.0, %v1532_v28  ;;  %v2025_v43 = vadd.f32 %v1908_v20, %v240_v27  ;;  %v426_v59 = vunpack.c.l.bf16 %v420_v4 }
  0x7e   :  { %v1536_v2 = vpop.eup %1535  ;;  %v157_v19 = vadd.f32 1.0, %v1534_v39  ;;  %1555 = vpow2.f32 %v1375_v51  ;;  %v2028_v46 = vmul.f32 -1.442695, %v2019_v35  ;;  %v428_v63 = vunpack.c.l.bf16 %v422_v48 }
  0x7f   :  { %v1538_v52 = vpop.eup %1537  ;;  %v159_v53 = vadd.f32 1.0, %v1536_v2  ;;  %1557 = vrcp.f32 %v156_v40  ;;  %v2031_v54 = vmul.f32 -1.442695, %v2025_v43  ;;  %v429_v0 = vunpack.c.l.bf16 %v423_v58 }
  0x80   :  { %v1540_v60 = vpop.eup %1539  ;;  %v160_v62 = vadd.f32 1.0, %v1538_v52  ;;  %1559 = vrcp.f32 %v157_v19  ;;  %vm628_vm6 = vsmask.f32 256  ;;  %vm629_vm7 = vsmask.f32 1284 }
  0x81   :  { %v1542_v51 = vpop.eup %1541  ;;  %v283_v3 = vmul.f32 %v1540_v60, %v1914_v26  ;;  %1561 = vrcp.f32 %v159_v53  ;;  %v431_v5 = vmul.f32 %v1897_v10, %v425_v49  ;;  %v432_v7 = vmul.f32 %v1897_v10, %v426_v59  ;;  %v314_v53 = vld [vmem:[#allocation3 + $0x14] sm:$0x3]  ;;  %vm2085_vm12 = vmor %vm628_vm6, %vm629_vm7 }
  0x82   :  { %v1544_v9 = vpop.eup %1543  ;;  %v284_v11 = vmul.f32 %v1542_v51, %v1922_v31  ;;  %1563 = vrcp.f32 %v160_v62  ;;  %v2038_v16 = vmul.f32 %v1897_v10, %v428_v63  ;;  %v2041_v17 = vmul.f32 %v1897_v10, %v429_v0 }
  0x83   :  { %v1546_v18 = vpop.eup %1545  ;;  %v286_v26 = vmul.f32 %v1544_v9, %v1925_v32  ;;  %v289_v22 = vmul.f32 0.0, %v283_v3  ;;  %1565 = vpow2.f32 %v1992_v56  ;;  %v2046_v24 = vadd.f32 %v1908_v20, %v431_v5  ;;  %v415_v3 = vld [vmem:[#allocation3 + $0x22] sm:$0x3] }
  0x84   :  { %v1548_v27 = vpop.eup %1547  ;;  %v287_v31 = vmul.f32 %v1546_v18, %v1928_v33  ;;  %v290_v28 = vmul.f32 %v1904_v15, %v284_v11  ;;  %1567 = vpow2.f32 %v1995_v57  ;;  %vm631_vm8 = vsmask.f32 2312  ;;  %v504_v18 = vld [vmem:[#allocation3 + $0x28] sm:$0x3] }
  0x85   :  { %v2052_v10 = vadd.f32 %v1908_v20, %v432_v7  ;;  %v1550_v32 = vpop.eup %1549  ;;  %v292_v39 = vmul.f32 0.0, %v286_v26  ;;  %v295_v40 = vpack.c.bf16 %v289_v22, %v289_v22  ;;  %v383_v33 = vmul.f32 %v1548_v27, %v1938_v44  ;;  %v513_v27 = vld [vmem:[#allocation3 + $0x2e] sm:$0x3]  ;;  %vm2101_vm13 = vmor %vm2085_vm12, %vm631_vm8 }
  0x86   :  { %1569 = vpow2.f32 %v1998_v61  ;;  %v1552_v4 = vpop.eup %1551  ;;  %v293_v57 = vmul.f32 %v1904_v15, %v287_v31  ;;  %v296_v2 = vpack.c.bf16 %v290_v28, %v290_v28  ;;  %v386_v19 = vmul.f32 %v1550_v32, %v1941_v45  ;;  %v406_v45 = vld [vmem:[#allocation3 + $0x1c] sm:$0x3] }
  0x87   :  { %1571 = vpow2.f32 %v2016_v34  ;;  %v1554_v48 = vpop.eup %1553  ;;  %v298_v49 = vpack.c.bf16 %v292_v39, %v292_v39  ;;  %v303_v52 = vsel %vm2056_vm9, %v295_v40, %v302_v14  ;;  %v389_v58 = vmul.f32 0.0, %v383_v33 }
  0x88   :  { %v481_v59 = vmul.f32 %v1552_v4, %v1945_v47  ;;  %vm633_vm10 = vsmask.f32 3340  ;;  %v1556_v44 = vpop.eup %1555  ;;  %v299_v61 = vpack.c.bf16 %v293_v57, %v293_v57  ;;  %304 = vst [vmem:[#allocation3 + $0xc] sm:$0x3] %v303_v52  ;;  %v306_v60 = vsel %vm2056_vm9, %v296_v2, %v305_v23  ;;  %v197_v2 = vld [vmem:[#allocation3 + $0x2] sm:$0x3] }
  0x89   :  { %v392_v62 = vmul.f32 0.0, %v386_v19  ;;  %v484_v34 = vmul.f32 %v1554_v48, %v1950_v55  ;;  %v1558_v63 = vpop.eup %1557  ;;  %307 = vst [vmem:[#allocation3 + $0xe] sm:$0x3] %v306_v60  ;;  %v312_v0 = vsel %vm2056_vm9, %v298_v49, %v311_v38  ;;  %v395_v51 = vpack.c.bf16 %v389_v58, %v389_v58  ;;  %v200_v52 = vld [vmem:[#allocation3 + $0x4] sm:$0x3]  ;;  %vm634_vm14 = vmor %vm2101_vm13, %vm633_vm10 }
  0x8a   :  { %v487_v5 = vmul.f32 0.0, %v481_v59  ;;  %v363_v47 = vadd.f32 1.0, %v1556_v44  ;;  %v1560_v7 = vpop.eup %1559  ;;  %313 = vst [vmem:[#allocation3 + $0x12] sm:$0x3] %v312_v0  ;;  %v315_v9 = vsel %vm2056_vm9, %v299_v61, %v314_v53  ;;  %v174_v26 = vmul.f32 %v1558_v63, %v1959_v6  ;;  %v206_v53 = vld [vmem:[#allocation3 + $0x8] sm:$0x3] }
  0x8b   :  { %v398_v11 = vpack.c.bf16 %v392_v62, %v392_v62  ;;  %v490_v14 = vmul.f32 0.0, %v484_v34  ;;  %vm635_vm11 = vsmask.f32 4368  ;;  %v1562_v55 = vpop.eup %1561  ;;  %316 = vst [vmem:[#allocation3 + $0x14] sm:$0x3] %v315_v9  ;;  %v407_v22 = vsel %vm2056_vm9, %v395_v51, %v406_v45 }
  0x8c   :  { %v493_v23 = vpack.c.bf16 %v487_v5, %v487_v5  ;;  %v175_v31 = vmul.f32 %v1560_v7, %v1962_v8  ;;  %1573 = vrcp.f32 %v363_v47  ;;  %v1564_v28 = vpop.eup %1563  ;;  %408 = vst [vmem:[#allocation3 + $0x1c] sm:$0x3] %v407_v22  ;;  %v177_v39 = vmul.f32 %v1562_v55, %v1965_v12  ;;  %v209_v61 = vld [vmem:[#allocation3 + $0xa] sm:$0x3]  ;;  %vm2131_vm15 = vmor %vm634_vm14, %vm635_vm11 }
  0x8d   :  { %v416_v38 = vsel %vm2056_vm9, %v398_v11, %v415_v3  ;;  %v496_v32 = vpack.c.bf16 %v490_v14, %v490_v14  ;;  %v180_v6 = vmul.f32 %v1919_v30, %v174_v26  ;;  %v1566_v33 = vpop.eup %1565  ;;  %v178_v4 = vmul.f32 %v1564_v28, %v1968_v13  ;;  %v400_v28 = vld [vmem:[#allocation3 + $0x18] sm:$0x3] }
  0x8e   :  { %417 = vst [vmem:[#allocation3 + $0x22] sm:$0x3] %v416_v38  ;;  %v505_v8 = vsel %vm2056_vm9, %v493_v23, %v504_v18  ;;  %v181_v57 = vmul.f32 %v1919_v30, %v175_v31  ;;  %1575 = vpow2.f32 %v2022_v42  ;;  %v1568_v12 = vpop.eup %1567  ;;  %v183_v48 = vmul.f32 %v1919_v30, %v177_v39  ;;  %v1499_v23 = vld [vmem:[#allocation7 + $0x18] sm:$0xff]  }
  0x8f   :  { %506 = vst [vmem:[#allocation3 + $0x28] sm:$0x3] %v505_v8  ;;  %v514_v19 = vsel %vm2056_vm9, %v496_v32, %v513_v27  ;;  %v186_v49 = vpack.c.bf16 %v180_v6, %v180_v6  ;;  %v364_v58 = vadd.f32 1.0, %v1566_v33  ;;  %v184_v13 = vmul.f32 %v1919_v30, %v178_v4  ;;  %v1500_v27 = vld [vmem:[#allocation7 + $0x60] sm:$0xff]   ;;  %1441 = vmatpush3.bf16.msra.mxu0 %v1499_v23 }
  0x90   :  { %v1570_v59 = vpop.eup %1569  ;;  %515 = vst [vmem:[#allocation3 + $0x2e] sm:$0x3] %v514_v19  ;;  %v187_v44 = vpack.c.bf16 %v181_v57, %v181_v57  ;;  %v366_v60 = vadd.f32 1.0, %v1568_v12  ;;  %1577 = vpow2.f32 %v2028_v46  ;;  %v189_v45 = vpack.c.bf16 %v183_v48, %v183_v48  ;;  %1442 = vmatprep.subr.bf16.mxu0 %v1500_v27 }
  0x91   :  { %v1572_v62 = vpop.eup %1571  ;;  %v198_v34 = vsel %vm2056_vm9, %v186_v49, %v197_v2  ;;  %v367_v63 = vadd.f32 1.0, %v1570_v59  ;;  %1579 = vrcp.f32 %v364_v58  ;;  %v1482_v0 = vld [vmem:[#allocation3 + $0xc] ss:$6 sps:$4 sm:$0x11]   ;;  %v190_v51 = vpack.c.bf16 %v184_v13, %v184_v13 }
  0x92   :  { %199 = vst [vmem:[#allocation3 + $0x2] sm:$0x3] %v198_v34  ;;  %v201_v3 = vsel %vm2056_vm9, %v187_v44, %v200_v52  ;;  %1581 = vrcp.f32 %v366_v60  ;;  %v155_v5 = vadd.f32 1.0, %v1572_v62  ;;  %v1483_v47 = vld [vmem:[#allocation3 + $0xe] ss:$6 sps:$4 sm:$0x11]   ;;  %v207_v46 = vsel %vm2056_vm9, %v189_v45, %v206_v53 }
  0x93   :  { %202 = vst [vmem:[#allocation3 + $0x4] sm:$0x3] %v201_v3  ;;  %1583 = vrcp.f32 %v367_v63  ;;  %v2117_v7 = vadd.f32 %v1908_v20, %v2038_v16  ;;  %v567_v9 = vrot.slane %v1482_v0, %v2013_v29  ;;  %208 = vst [vmem:[#allocation3 + $0x8] sm:$0x3] %v207_v46  ;;  %v210_v11 = vsel %vm2056_vm9, %v190_v51, %v209_v61  ;;  %v403_v34 = vld [vmem:[#allocation3 + $0x1a] sm:$0x3] }
  0x94   :  { %1585 = vrcp.f32 %v155_v5  ;;  %v2124_v14 = vadd.f32 %v1908_v20, %v2041_v17  ;;  %v574_v18 = vrot.slane %v1483_v47, %v2013_v29  ;;  %211 = vst [vmem:[#allocation3 + $0xa] sm:$0x3] %v210_v11  ;;  %v1381_v26 = vmul.f32 -1.442695, %v2046_v24  ;;  %v409_v3 = vld [vmem:[#allocation3 + $0x1e] sm:$0x3] }
  0x95   :  { %1587 = vpow2.f32 %v2031_v54  ;;  %v1382_v16 = vmul.f32 -1.442695, %v2052_v10  ;;  %vm637_vm0 = vsmask.f32 5396  ;;  %v1384_v20 = vmul.f32 -1.442695, %v2117_v7 }
  0x96   :  { %v1574_v55 = vpop.eup %1573  ;;  %v575_v17 = vcombine.low %v567_v9, %v574_v18  ;;  %vm639_vm1 = vsmask.f32 6424  ;;  %vm641_vm2 = vsmask.f32 7452  ;;  %1589 = vpow2.f32 %v1381_v26  ;;  %vm2143_vm3 = vmor %vm2131_vm15, %vm637_vm0 }
  0x97   :  { %v381_v31 = vmul.f32 %v1574_v55, %v1979_v36  ;;  %v1385_v38 = vmul.f32 -1.442695, %v2124_v14  ;;  %1591 = vpow2.f32 %v1382_v16  ;;  %vm2152_vm4 = vmor %vm2143_vm3, %vm639_vm1  ;;  %vm549_vm6 = vcmask 257024  }
  0x98   :  { %v1576_v54 = vpop.eup %1575  ;;  %v582_v32 = vrot.slane %v575_v17, %v2013_v29  ;;  %1593 = vpow2.f32 %v1384_v20  ;;  %vm2167_vm5 = vmor %vm2152_vm4, %vm641_vm2  ;;  %vm1787_vm7 = vmmov 0   ;;  %vm1222_vm8 = vcmask 261120  }
  0x99   :  { %v387_v39 = vmul.f32 %v1919_v30, %v381_v31  ;;  %v158_v36 = vadd.f32 1.0, %v1576_v54  ;;  %v1388_v33 = vld.sshfl [vmem:[#allocation3 + $0x2] sm:$0x11 pattern:$0x75316420]  ;;  %1463 = vmatprep.mubr.msk.bf16.mxu1 %vm1787_vm7, %v1784_v1  ;;  %vm706_vm10 = vcmask 781824  }
  0x9a   :  { %v1578_v40 = vpop.eup %1577  ;;  %583 = vrot.lane.b32.xlu0 %v582_v32, %s1780_s3  ;;  %v1484_v4 = vld [vmem:[#allocation3 + $0x2] ss:$6 sps:$4 sm:$0x11]   ;;  %v611_v2 = vcombine.high %v1388_v33, %v1388_v33  ;;  %v653_v12 = vshrl.u32 %v1388_v33, 16  ;;  %vm743_vm11 = vcmask 1044224   ;;  %vm1309_vm12 = vcmask 523264  }
  0x9b   :  { %v1580_v8 = vpop.eup %1579  ;;  %v393_v57 = vpack.c.bf16 %v387_v39, %v387_v39  ;;  %1595 = vrcp.f32 %v158_v36  ;;  %v1485_v48 = vld [vmem:[#allocation3 + $0x4] ss:$6 sps:$4 sm:$0x11]   ;;  %v267_v53 = vadd.f32 1.0, %v1578_v40  ;;  %v900_v59 = vrot.slane %v1484_v4, %v2013_v29 }
  0x9c   :  { %v1582_v19 = vpop.eup %1581  ;;  %v382_v49 = vmul.f32 %v1580_v8, %v1982_v37  ;;  %1597 = vpow2.f32 %v1385_v38  ;;  %v1390_v61 = vld.sshfl [vmem:[#allocation3 + $0x8] sm:$0x11 pattern:$0x75316420]  ;;  %v658_v60 = vshll.u32 %v611_v2, 16  ;;  %v907_v42 = vrot.slane %v1485_v48, %v2013_v29 }
  0x9d   :  { %v1584_v58 = vpop.eup %1583  ;;  %v384_v13 = vmul.f32 %v1582_v19, %v1985_v41  ;;  %v401_v44 = vsel %vm2056_vm9, %v393_v57, %v400_v28  ;;  %v627_v63 = vcombine.high %v1390_v61, %v1390_v61  ;;  %v412_v41 = vld [vmem:[#allocation3 + $0x20] sm:$0x3]  ;;  %v1404_v26 = vld.sshfl [vmem:[#allocation3 + $0x4] sm:$0x11 pattern:$0x75316420]  ;;  %1599 = vrcp.f32 %v267_v53 }
  0x9e   :  { %v1586_v37 = vpop.eup %1585  ;;  %v385_v62 = vmul.f32 %v1584_v58, %v1988_v50  ;;  %v388_v45 = vmul.f32 %v1919_v30, %v382_v49  ;;  %402 = vst [vmem:[#allocation3 + $0x18] sm:$0x3] %v401_v44  ;;  %v671_v50 = vshrl.u32 %v1390_v61, 16  ;;  %v908_v46 = vcombine.low %v900_v59, %v907_v42 }
  0x9f   :  { %v1588_v0 = vpop.eup %1587  ;;  %v390_v51 = vmul.f32 %v1919_v30, %v384_v13  ;;  %v173_v47 = vmul.f32 %v1586_v37, %v2003_v21  ;;  %v676_v18 = vshll.u32 %v627_v63, 16  ;;  %v1406_v23 = vld.sshfl [vmem:[#allocation3 + $0xa] sm:$0x11 pattern:$0x75316420]  ;;  %v660_v54 = vsel %vm2167_vm5, %v653_v12, %v658_v60 }
  0xa0   :  { %v391_v9 = vmul.f32 %v1919_v30, %v385_v62  ;;  %v394_v11 = vpack.c.bf16 %v388_v45, %v388_v45  ;;  %v270_v22 = vadd.f32 1.0, %v1588_v0  ;;  %v1590_v27 = vpop.eup %1589  ;;  %v915_v20 = vrot.slane %v908_v46, %v2013_v29  ;;  %v194_v21 = vld [vmem:[#allocation3] sm:$0x3]  ;;  %v203_v37 = vld [vmem:[#allocation3 + $0x6] sm:$0x3] }
  0xa1   :  { %v396_v16 = vpack.c.bf16 %v390_v51, %v390_v51  ;;  %v179_v55 = vmul.f32 0.0, %v173_v47  ;;  %v1592_v30 = vpop.eup %1591  ;;  %v678_v32 = vsel %vm2167_vm5, %v671_v50, %v676_v18  ;;  %v980_v36 = vcombine.high %v1404_v26, %v1404_v26 }
  0xa2   :  { %v397_v17 = vpack.c.bf16 %v391_v9, %v391_v9  ;;  %v404_v31 = vsel %vm2056_vm9, %v394_v11, %v403_v34  ;;  %1601 = vrcp.f32 %v270_v22  ;;  %v1594_v39 = vpop.eup %1593  ;;  %916 = vrot.lane.b32.xlu1 %v915_v20, %s1776_s7  ;;  %v996_v40 = vcombine.high %v1406_v23, %v1406_v23 }
  0xa3   :  { %405 = vst [vmem:[#allocation3 + $0x1a] sm:$0x3] %v404_v31  ;;  %v410_v28 = vsel %vm2056_vm9, %v396_v16, %v409_v3  ;;  %v185_v38 = vpack.c.bf16 %v179_v55, %v179_v55  ;;  %v680_v19 = vcombine.low %v660_v54, %v678_v32  ;;  %v1007_v48 = vshrl.u32 %v1404_v26, 16 }
  0xa4   :  { %411 = vst [vmem:[#allocation3 + $0x1e] sm:$0x3] %v410_v28  ;;  %v413_v6 = vsel %vm2056_vm9, %v397_v17, %v412_v41  ;;  %v1012_v49 = vshll.u32 %v980_v36, 16  ;;  %v1025_v52 = vshrl.u32 %v1406_v23, 16  ;;  %v1030_v53 = vshll.u32 %v996_v40, 16 }
  0xa5   :  { %v1596_v33 = vpop.eup %1595  ;;  %414 = vst [vmem:[#allocation3 + $0x20] sm:$0x3] %v413_v6  ;;  %v1395_v8 = vld.sshfl [vmem:[#allocation3 + $0x18] sm:$0x11 pattern:$0x75316420]  ;;  %v195_v4 = vsel %vm2056_vm9, %v185_v38, %v194_v21  ;;  %v2193_v34 = vrot.slane %v680_v19, %v2013_v29 }
  0xa6   :  { %v1598_v57 = vpop.eup %1597  ;;  %v794_v2 = vcombine.high %v1395_v8, %v1395_v8  ;;  %v176_v12 = vmul.f32 %v1596_v33, %v2007_v25  ;;  %196 = vst [vmem:[#allocation3] sm:$0x3] %v195_v4  ;;  %v461_v58 = vadd.f32 1.0, %v1590_v27  ;;  %v820_v59 = vshrl.u32 %v1395_v8, 16  ;;  %v308_v36 = vld [vmem:[#allocation3 + $0x10] sm:$0x3] }
  0xa7   :  { %v462_v44 = vadd.f32 1.0, %v1592_v30  ;;  %v464_v61 = vadd.f32 1.0, %v1594_v39  ;;  %v1014_v42 = vsel %vm2167_vm5, %v1007_v48, %v1012_v49  ;;  %v1032_v62 = vsel %vm2167_vm5, %v1025_v52, %v1030_v53  ;;  %v1600_v0 = vpop.eup %1599  ;;  %v317_v4 = vld [vmem:[#allocation3 + $0x16] sm:$0x3] }
  0xa8   :  { %v182_v13 = vmul.f32 0.0, %v176_v12  ;;  %v825_v60 = vshll.u32 %v794_v2, 16  ;;  %1603 = vrcp.f32 %v461_v58  ;;  %v1034_v63 = vcombine.low %v1014_v42, %v1032_v62 }
  0xa9   :  { %1605 = vrcp.f32 %v462_v44  ;;  %v465_v47 = vadd.f32 1.0, %v1598_v57  ;;  %v285_v18 = vmul.f32 %v1600_v0, %v2019_v35  ;;  %v1498_v57 = vld [vmem:[#allocation3 + $0x2] ss:$6 sps:$4 sm:$0x11]   ;;  %vm1307_vm13 = vcmask 519168  }
  0xaa   :  { %v1396_v25 = vld.sshfl [vmem:[#allocation3 + $0x1a] sm:$0x11 pattern:$0x75316420]  ;;  %v188_v45 = vpack.c.bf16 %v182_v13, %v182_v13  ;;  %1607 = vrcp.f32 %v464_v61  ;;  %v1048_v27 = vrot.slane %v1034_v63, %v2013_v29  ;;  %v827_v20 = vsel %vm2167_vm5, %v820_v59, %v825_v60  ;;  %v1503_v13 = vld [vmem:[#allocation7 + $0x20] sm:$0xff]  }
  0xab   :  { %v1397_v51 = vld.sshfl [vmem:[#allocation3 + $0x1e] sm:$0x11 pattern:$0x75316420]  ;;  %v802_v3 = vcombine.high %v1396_v25, %v1396_v25  ;;  %v829_v41 = vshrl.u32 %v1396_v25, 16  ;;  %v291_v28 = vmul.f32 %v1904_v15, %v285_v18  ;;  %1609 = vrcp.f32 %v465_v47  ;;  %1443 = vmatpush3.bf16.msra.mxu0 %v1503_v13 }
  0xac   :  { %v1398_v50 = vld.sshfl [vmem:[#allocation3 + $0x20] sm:$0x11 pattern:$0x75316420]  ;;  %v810_v46 = vcombine.high %v1397_v51, %v1397_v51  ;;  %v838_v9 = vshrl.u32 %v1397_v51, 16  ;;  %v204_v11 = vsel %vm2056_vm9, %v188_v45, %v203_v37  ;;  %v1602_v26 = vpop.eup %1601  ;;  %v1049_v38 = vcombine.low %v2193_v34, %v1048_v27 }
  0xad   :  { %v818_v16 = vcombine.high %v1398_v50, %v1398_v50  ;;  %v834_v55 = vshll.u32 %v802_v3, 16  ;;  %v847_v22 = vshrl.u32 %v1398_v50, 16  ;;  %205 = vst [vmem:[#allocation3 + $0x6] sm:$0x3] %v204_v11  ;;  %v288_v21 = vmul.f32 %v1602_v26, %v2025_v43  ;;  %v1504_v3 = vld [vmem:[#allocation7 + $0x68] sm:$0xff]  }
  0xae   :  { %v1387_v23 = vld.sshfl [vmem:[#allocation3] sm:$0x11 pattern:$0x75316420]  ;;  %v843_v17 = vshll.u32 %v810_v46, 16  ;;  %v297_v8 = vpack.c.bf16 %v291_v28, %v291_v28  ;;  %v1056_v59 = vrot.slane %v1049_v38, %v2013_v29  ;;  %v539_v0 = vrot.slane %v1498_v57, %v2013_v29  ;;  %1444 = vmatprep.subr.bf16.mxu0 %v1504_v3  ;;  %v1510_v57 = vld [vmem:[#allocation7 + $0x38] sm:$0xff]  }
  0xaf   :  { %v603_v31 = vcombine.high %v1387_v23, %v1387_v23  ;;  %v836_v54 = vsel %vm2167_vm5, %v829_v41, %v834_v55  ;;  %v852_v30 = vshll.u32 %v818_v16, 16  ;;  %v1486_v35 = vld [vmem:[#allocation3 + $0x18] ss:$6 sps:$4 sm:$0x11]   ;;  %v294_v6 = vmul.f32 %v1904_v15, %v288_v21  ;;  %v498_v16 = vld [vmem:[#allocation3 + $0x24] sm:$0x3] }
  0xb0   :  { %v845_v32 = vsel %vm2167_vm5, %v838_v9, %v843_v17  ;;  %v1487_v39 = vld [vmem:[#allocation3 + $0x1a] ss:$6 sps:$4 sm:$0x11]   ;;  %v644_v33 = vshrl.u32 %v1387_v23, 16  ;;  %v724_v12 = vrot.slane %v1486_v35, %v2013_v29  ;;  %v309_v58 = vsel %vm2056_vm9, %v297_v8, %v308_v36  ;;  %1058 = vst.msk [vmem:[#allocation2 + $0x8] sm:$0xf] %vm549_vm6, %v1056_v59 }
  0xb1   :  { %v854_v43 = vsel %vm2167_vm5, %v847_v22, %v852_v30  ;;  %v855_v40 = vcombine.low %v827_v20, %v845_v32  ;;  %v731_v19 = vrot.slane %v1487_v39, %v2013_v29  ;;  %v300_v48 = vpack.c.bf16 %v294_v6, %v294_v6  ;;  %310 = vst [vmem:[#allocation3 + $0x10] sm:$0x3] %v309_v58  ;;  %v1488_v50 = vld [vmem:[#allocation3 + $0xe] ss:$6 sps:$4 sm:$0x11]   ;;  %v1508_v30 = vld [vmem:[#allocation7 + $0x80] sm:$0xff]  }
  0xb2   :  { %v856_v2 = vcombine.low %v836_v54, %v854_v43  ;;  %v1604_v49 = vpop.eup %1603  ;;  %v649_v53 = vshll.u32 %v603_v31, 16  ;;  %v501_v27 = vld [vmem:[#allocation3 + $0x26] sm:$0x3]  ;;  %v1506_v21 = vld [vmem:[#allocation7 + $0x70] sm:$0xff]   ;;  %v1509_v6 = vld [vmem:[#allocation7 + $0x78] sm:$0xff]   ;;  %1460 = vmatpush3.bf16.msra.mxu1 %v1508_v30  ;;  %v937_v8 = vrot.slane %v1488_v50, %v2013_v29 }
  0xb3   :  { %v863_v52 = vrot.slane %v855_v40, %v2013_v29  ;;  %v1606_v44 = vpop.eup %1605  ;;  %v318_v37 = vsel %vm2056_vm9, %v300_v48, %v317_v4  ;;  %v479_v42 = vmul.f32 %v1604_v49, %v2046_v24  ;;  %v732_v47 = vcombine.low %v724_v12, %v731_v19  ;;  %v1507_v54 = vld [vmem:[#allocation7 + $0x30] sm:$0xff]   ;;  %1461 = vmatprep.subr.bf16.mxu1 %v1784_v1  ;;  %v510_v19 = vld [vmem:[#allocation3 + $0x2c] sm:$0x3] }
  0xb4   :  { %v870_v61 = vrot.slane %v856_v2, %v2013_v29  ;;  %v1389_v60 = vld.sshfl [vmem:[#allocation3 + $0x6] sm:$0x11 pattern:$0x75316420]  ;;  %v1608_v62 = vpop.eup %1607  ;;  %319 = vst [vmem:[#allocation3 + $0x16] sm:$0x3] %v318_v37  ;;  %v480_v51 = vmul.f32 %v1606_v44, %v2052_v10  ;;  %v651_v9 = vsel %vm2167_vm5, %v644_v33, %v649_v53 }
  0xb5   :  { %v619_v25 = vcombine.high %v1389_v60, %v1389_v60  ;;  %v662_v45 = vshrl.u32 %v1389_v60, 16  ;;  %v1497_v63 = vld [vmem:[#allocation3] ss:$6 sps:$4 sm:$0x11]   ;;  %v482_v46 = vmul.f32 %v1608_v62, %v2117_v7  ;;  %v485_v24 = vmul.f32 %v1904_v15, %v479_v42  ;;  %v1505_v10 = vld [vmem:[#allocation7 + $0x28] sm:$0xff]   ;;  %v1610_v35 = vpop.eup %1609 }
  0xb6   :  { %v871_v41 = vcombine.low %v863_v52, %v870_v61  ;;  %v532_v18 = vrot.slane %v1497_v63, %v2013_v29  ;;  %v486_v26 = vmul.f32 %v1904_v15, %v480_v51  ;;  %v507_v7 = vld [vmem:[#allocation3 + $0x2a] sm:$0x3]  ;;  %1445 = vmatpush3.bf16.msra.mxu0 %v1505_v10  ;;  %v739_v38 = vrot.slane %v732_v47, %v2013_v29 }
  0xb7   :  { %v667_v11 = vshll.u32 %v619_v25, 16  ;;  %v488_v22 = vmul.f32 %v1904_v15, %v482_v46  ;;  %v491_v23 = vpack.c.bf16 %v485_v24, %v485_v24  ;;  %v483_v36 = vmul.f32 %v1610_v35, %v2124_v14  ;;  %1446 = vmatprep.subr.bf16.mxu0 %v1506_v21  ;;  %v1514_v59 = vld [vmem:[#allocation2 + $0x8] ss:$0 sps:$4 sm:$0xff]   ;;  %v1411_v24 = vld [vmem:[#allocation9] ss:$0 sm:$0xff] }
  0xb8   :  { %v878_v55 = vrot.slane %v871_v41, %v2013_v29  ;;  %v540_v17 = vcombine.low %v532_v18, %v539_v0  ;;  %v492_v31 = vpack.c.bf16 %v486_v26, %v486_v26 }
  0xb9   :  { %v669_v20 = vsel %vm2167_vm5, %v662_v45, %v667_v11  ;;  %v494_v32 = vpack.c.bf16 %v488_v22, %v488_v22  ;;  %v499_v39 = vsel %vm2056_vm9, %v491_v23, %v498_v16  ;;  %v489_v14 = vmul.f32 %v1904_v15, %v483_v36  ;;  %v1513_v15 = vld [vmem:[#allocation7 + $0x88] sm:$0xff]  }
  0xba   :  { %879 = vrot.lane.b32.xlu0 %v878_v55, %s1780_s3  ;;  %v679_v28 = vcombine.low %v651_v9, %v669_v20  ;;  %v547_v5 = vrot.slane %v540_v17, %v2013_v29  ;;  %500 = vst [vmem:[#allocation3 + $0x24] sm:$0x3] %v499_v39  ;;  %v502_v43 = vsel %vm2056_vm9, %v492_v31, %v501_v27 }
  0xbb   :  { %v1489_v33 = vld [vmem:[#allocation3 + $0x10] ss:$6 sps:$4 sm:$0x11]   ;;  %503 = vst [vmem:[#allocation3 + $0x26] sm:$0x3] %v502_v43  ;;  %v508_v4 = vsel %vm2056_vm9, %v494_v32, %v507_v7  ;;  %1447 = vmatpush3.bf16.msra.mxu0 %v1507_v54  ;;  %v495_v48 = vpack.c.bf16 %v489_v14, %v489_v14  ;;  %1462 = vmatpush3.bf16.msra.mxu1 %v1513_v15 }
  0xbc   :  { %v687_v40 = vrot.slane %v679_v28, %v2013_v29  ;;  %550 = vst.msk [vmem:[#allocation2] sm:$0xf] %vm549_vm6, %v547_v5  ;;  %509 = vst [vmem:[#allocation3 + $0x2a] sm:$0x3] %v508_v4  ;;  %v944_v12 = vrot.slane %v1489_v33, %v2013_v29  ;;  %1448 = vmatprep.subr.bf16.mxu0 %v1509_v6 }
  0xbd   :  { %v511_v53 = vsel %vm2056_vm9, %v495_v48, %v510_v19  ;;  %vm586_vm9 = vcmask 519424  }
  0xbe   :  { %v695_v2 = vcombine.low %v687_v40, %v2193_v34  ;;  %740 = vrot.lane.b32.xlu0 %v739_v38, %s1786_s4  ;;  %v945_v52 = vcombine.low %v937_v8, %v944_v12  ;;  %512 = vst [vmem:[#allocation3 + $0x2c] sm:$0x3] %v511_v53  ;;  %1464 = vmatmul.mubr.msk.bf16.vlgmr.msra.gmra.mrb[0].mxu1 %vm1222_vm8, %v1514_v59 }
  0xbf   :  { %1449 = vmatpush3.bf16.msra.mxu0 %v1510_v57 }
  0xc0   :  { %v702_v49 = vrot.slane %v695_v2, %v2013_v29  ;;  %v952_v58 = vrot.slane %v945_v52, %v2013_v29 }
  0xc2   :  { %703 = vrot.lane.b32.xlu1 %v702_v49, %s1776_s7  ;;  %s1788_s7 = smov [#allocation13]  }
  0xc3   :  { %v1501_v34 = vld [vmem:[#allocation3 + $0x24] ss:$6 sps:$4 sm:$0x11]   ;;  %s1334_s3 = sshll.u32 %s1788_s7, 4  ;;  %s1335_s3 = int_to_ptr.vmem [resolvable:$true] %s1334_s3 }
  0xc4   :  { %v761_v56 = vrot.slane %v1501_v34, %v2013_v29  ;;  %s1721_s13 = scalar_lea.vmem %s1335_s3, 64  ;;  %p1726_p13 = scmp.lt.s32.totalorder %s1335_s3, %s1335_s3 }
  0xc5   :  { %v1502_v13 = vld [vmem:[#allocation3 + $0x26] ss:$6 sps:$4 sm:$0x11]   ;;  %p1722_p12 = scmp.ne.s32.totalorder %s1335_s3, %s1721_s13  ;;  %p1727_p0 = scmp.lt.s32.totalorder %s1721_s13, %s1721_s13 }
  0xc6   :  { %953 = vrot.lane.b32.xlu1 %v952_v58, %s1786_s4  ;;  %v768_v44 = vrot.slane %v1502_v13, %v2013_v29 }
  0xc7   :  { %p1728_p1 = por %p1727_p0, %p1726_p13 }
  0xc8   :  { %v769_v61 = vcombine.low %v761_v56, %v768_v44 }
  0xc9   :  { %p1729_p2 = pnand %p1728_p1, %p1722_p12 }
  0xca   :  { %v776_v60 = vrot.slane %v769_v61, %v2013_v29 }
  0xcc   :  { %778 = vst.msk [vmem:[#allocation2 + $0x4] sm:$0xf] %vm549_vm6, %v776_v60 }
 0x10c   :  { %v584_v37 = vpop.permute.xlu0 %583 }
 0x10d   :  { %587 = vst.msk [vmem:[#allocation2] sm:$0xf] %vm586_vm9, %v584_v37 }
 0x114   :  { %v917_v1 = vpop.permute.xlu1 %916 }
 0x12c   :  { %v880_v42 = vpop.permute.xlu0 %879 }
 0x12d   :  { %882 = vst.msk [vmem:[#allocation2 + $0x4] sm:$0xf] %vm586_vm9, %v880_v42 }
 0x12e   :  { %919 = vst.msk [vmem:[#allocation2 + $0x4] sm:$0xf] %vm706_vm10, %v917_v1 }
 0x130   :  { %v741_v62 = vpop.permute.xlu0 %740 }
 0x134   :  { %v704_v25 = vpop.permute.xlu1 %703 }
 0x135   :  { %707 = vst.msk [vmem:[#allocation2] sm:$0xf] %vm706_vm10, %v704_v25 }
 0x136   :  { %744 = vst.msk [vmem:[#allocation2] sm:$0xf] %vm743_vm11, %v741_v62 }
 0x138   :  { %v954_v45 = vpop.permute.xlu1 %953 }
 0x139   :  { %956 = vst.msk [vmem:[#allocation2 + $0x4] sm:$0xf] %vm743_vm11, %v954_v45 }
 0x140   :  { %v1059_v63 = vld [vmem:[#allocation2] sm:$0xff] }
 0x141   :  { %v1412_v0 = vcombine.low %v1059_v63, %v1059_v63  ;;  %v1413_v29 = vcombine.high %v1059_v63, %v1059_v63 }
 0x143   :  { %1258 = vmatprep.mubr.bf16.mxu0 %v1413_v29 }
 0x144   :  { %1259 = vmatmul.mubr.bf16.vlgmr.msra.gmra.mrb[0].mxu0 %v1412_v0 }
 0x191   :  { %v1300_v51 = vpop.f32.mrb[0].mxu1 }
 0x192   :  { %v1465_v3 = vpop.f32.mrb[1].mxu1 }
 0x193   :  { %v1303_v41 = vpop.f32.mrb[2].mxu1 }
 0x194   :  { %v1466_v47 = vpop.f32.mrb[3].mxu1 }
 0x217   :  { %v1450_v50 = vpop.f32.mrb[0].mxu0 }
 0x218   :  { %v1451_v46 = vpop.f32.mrb[1].mxu0 }
 0x219   :  { %v1452_v9 = vadd.f32 %v1451_v46, %v1450_v50  ;;  %v1453_v11 = vpop.f32.mrb[2].mxu0 }
 0x21a   :  { %v1454_v18 = vpop.f32.mrb[3].mxu0 }
 0x21b   :  { %v1261_v26 = vadd.f32 %v1452_v9, %v1411_v24 }
 0x21d   :  { %v1301_v16 = vadd.f32 %v1300_v51, %v1261_v26 }
 0x21f   :  { %v1306_v10 = vpack.c.bf16 %v1301_v16, %v1301_v16  ;;  %v1310_v55 = vsel %vm1309_vm12, %v1301_v16, 0.0  ;;  %v1319_v22 = vmul.f32 %v1301_v16, %v1301_v16 }
 0x220   :  { %v1311_v23 = vrot.slane %v1310_v55, 4 }
 0x221   :  { %v1320_v27 = vsel %vm1309_vm12, %v1319_v22, 0.0  ;;  %1308 = vst.msk [vmem:[#allocation13] sm:$0xf] %vm1307_vm13, %v1306_v10 }
 0x222   :  { %v1312_v7 = vadd.f32 %v1311_v23, %v1310_v55  ;;  %v1321_v20 = vrot.slane %v1320_v27, 4 }
 0x223   :  { %1732 = shalt.err (!%p1729_p2)
}
 0x224   :  { %s1733_s17 = scalar_lea.hbm %s2290_s5, 64 }
 0x225   :  { %p1734_p3 = scmp.ne.s32.totalorder %s2290_s5, %s1733_s17  ;;  %p1737_p4 = scmp.lt.u32.totalorder %s1733_s17, %s2290_s5 }
 0x227   :  { %p1739_p5 = pnand %p1737_p4, %p1734_p3 }
 0x229   :  { %1742 = shalt.err (!%p1739_p5)
}
 0x22a   :  { %1337 = dma.vmem_to_hbm [thread:$0]  %s1335_s3, 64, %s2290_s5, [#allocation6]   ;;  %v1313_v17 = vrot.slane %v1312_v7, 2  ;;  %v1322_v31 = vadd.f32 %v1321_v20, %v1320_v27  ;;  %vm1317_vm14 = vcmask 516096  }
 0x22b   :  { %s1789_s23 = smov [#allocation14]  }
 0x22c   :  { %v1314_v21 = vadd.f32 %v1313_v17, %v1312_v7  ;;  %v1323_v54 = vrot.slane %v1322_v31, 2  ;;  %s1344_s0 = sshll.u32 %s1789_s23, 4  ;;  %s1345_s0 = int_to_ptr.vmem [resolvable:$true] %s1344_s0 }
 0x22d   :  { %s1743_s14 = scalar_lea.vmem %s1345_s0, 32  ;;  %p1748_p7 = scmp.lt.s32.totalorder %s1345_s0, %s1345_s0 }
 0x22e   :  { %v1315_v30 = vrot.slane %v1314_v21, 1  ;;  %v1324_v35 = vadd.f32 %v1323_v54, %v1322_v31  ;;  %p1744_p6 = scmp.ne.s32.totalorder %s1345_s0, %s1743_s14  ;;  %p1749_p8 = scmp.lt.s32.totalorder %s1743_s14, %s1743_s14 }
 0x230   :  { %v1316_v28 = vadd.f32 %v1315_v30, %v1314_v21  ;;  %v1325_v38 = vrot.slane %v1324_v35, 1  ;;  %p1750_p9 = por %p1749_p8, %p1748_p7 }
 0x232   :  { %1318 = vst.msk [vmem:[#allocation14] sm:$0x1] %vm1317_vm14, %v1316_v28  ;;  %v1326_v32 = vadd.f32 %v1325_v38, %v1324_v35  ;;  %p1751_p10 = pnand %p1750_p9, %p1744_p6 }
 0x234   :  { %1327 = vst.msk [vmem:[#allocation14 + $0x1] sm:$0x1] %vm1317_vm14, %v1326_v32 }
 0x235   :  { %1754 = shalt.err (!%p1751_p10)
}
 0x236   :  { %s1755_s25 = scalar_lea.hbm %s2291_s6, 32 }
 0x237   :  { %p1756_p11 = scmp.ne.s32.totalorder %s2291_s6, %s1755_s25  ;;  %p1759_p12 = scmp.lt.u32.totalorder %s1755_s25, %s2291_s6 }
 0x239   :  { %p1761_p13 = pnand %p1759_p12, %p1756_p11 }
 0x23b   :  { %1764 = shalt.err (!%p1761_p13)
}
 0x23c   :  { %1347 = dma.vmem_to_hbm [thread:$0]  %s1345_s0, 32, %s2291_s6, [#allocation15]  }
 0x23d   :  { %1771 = dma.done.wait [#allocation6], 64  }
 0x23e   :  { %1772 = vsyncadd [#allocation6], 4294967232 }
 0x23f   :  { %1773 = dma.done.wait [#allocation15], 32  }
 0x240   :  { %1774 = vsyncadd [#allocation15], 4294967264 }
 0x241   :  { %1354 = vsyncpa [#allocation5], 1 }
 0x242   :  { %1355 = vsyncpa [#allocation8], 1 }
 0x243   :  { %1356 = vsyncpa [#allocation11], 1 }
 0x244   :  { %1357 = vsyncpa [#allocation6], 1 }
 0x245   :  { %1358 = vsyncpa [#allocation15], 1 }

// kernel: discriminator_forward.9
= control target key start
LH: loop header
LB: loop body
LE: loop exit
PB: predicated region body
PF: predicated region fallthrough
CT: control target
= control target key end

     0   :  { %8 = vsyncpa [#allocation3], 0  ;;  %s299_s0 = inlined_call_operand.hbm [shape: bf16[2,1,128], index: 0, kind: input, shape index: {}]   ;;  %s300_s1 = inlined_call_operand.hbm [shape: f32[1,128], index: 1, kind: input, shape index: {}]   ;;  %s301_s2 = inlined_call_operand.hbm [shape: f32[1,128], index: 2, kind: input, shape index: {}]   ;;  %s302_s3 = inlined_call_operand.hbm [shape: f32[2,128], index: 3, kind: output, shape index: {}]  }
   0x1   :  { %9 = vsyncpa [#allocation6], 0 }
   0x2   :  { %10 = vsyncpa [#allocation4], 0  ;;  %s218_s12 = smov [#allocation5]   ;;  %s219_s14 = smov [#allocation2]  }
   0x3   :  { %s29_s13 = sshll.u32 %s218_s12, 4  ;;  %s16_s15 = sshll.u32 %s219_s14, 4  ;;  %s30_s13 = int_to_ptr.vmem [resolvable:$true] %s29_s13  ;;  %s244_s15 = int_to_ptr.vmem [resolvable:$true] %s16_s15 }
   0x4   :  { %s124_s18 = scalar_lea.hbm %s300_s1, 16 }
   0x5   :  { %p125_p0 = scmp.ne.s32.totalorder %s300_s1, %s124_s18  ;;  %p128_p1 = scmp.lt.u32.totalorder %s124_s18, %s300_s1 }
   0x7   :  { %p130_p2 = pnand %p128_p1, %p125_p0 }
   0x9   :  { %133 = shalt.err (!%p130_p2)
}
   0xa   :  { %s134_s23 = scalar_lea.vmem %s30_s13, 16  ;;  %s138_s24 = scalar_lea.vmem %s30_s13, 32 }
   0xb   :  { %p135_p3 = scmp.ne.s32.totalorder %s30_s13, %s134_s23  ;;  %p139_p4 = scmp.lt.s32.totalorder %s30_s13, %s30_s13 }
   0xc   :  { %p140_p5 = scmp.lt.s32.totalorder %s138_s24, %s134_s23 }
   0xe   :  { %p141_p6 = por %p140_p5, %p139_p4 }
  0x10   :  { %p142_p7 = pnand %p141_p6, %p135_p3 }
  0x12   :  { %145 = shalt.err (!%p142_p7)
}
  0x13   :  { %32 = dma.hbm_to_vmem [thread:$0]  %s300_s1, 16, %s30_s13, [#allocation6]  }
  0x14   :  { %s146_s29 = scalar_lea.hbm %s299_s0, 32 }
  0x15   :  { %p147_p8 = scmp.ne.s32.totalorder %s299_s0, %s146_s29  ;;  %p150_p9 = scmp.lt.u32.totalorder %s146_s29, %s299_s0 }
  0x17   :  { %p152_p10 = pnand %p150_p9, %p147_p8 }
  0x19   :  { %155 = shalt.err (!%p152_p10)
}
  0x1a   :  { %s156_s7 = scalar_lea.vmem %s244_s15, 32  ;;  %p161_p12 = scmp.lt.s32.totalorder %s244_s15, %s244_s15 }
  0x1b   :  { %p157_p11 = scmp.ne.s32.totalorder %s244_s15, %s156_s7  ;;  %p162_p13 = scmp.lt.s32.totalorder %s156_s7, %s156_s7 }
  0x1d   :  { %p163_p0 = por %p162_p13, %p161_p12 }
  0x1f   :  { %p164_p1 = pnand %p163_p0, %p157_p11 }
  0x21   :  { %167 = shalt.err (!%p164_p1)
}
  0x22   :  { %s220_s1 = smov 16   ;;  %s221_s8 = smov 1  }
  0x23   :  { %22 = dma.hbm_to_vmem [thread:$0]  %s299_s0, 32, %s244_s15, [#allocation3], %s220_s1, %s220_s1, %s221_s8  }
  0x24   :  { %s222_s11 = smov [#allocation7]   ;;  %s168_s16 = scalar_lea.hbm %s301_s2, 16 }
  0x25   :  { %s39_s12 = sshll.u32 %s222_s11, 4  ;;  %p169_p2 = scmp.ne.s32.totalorder %s301_s2, %s168_s16  ;;  %s40_s12 = int_to_ptr.vmem [resolvable:$true] %s39_s12 }
  0x26   :  { %p172_p3 = scmp.lt.u32.totalorder %s168_s16, %s301_s2 }
  0x28   :  { %p174_p4 = pnand %p172_p3, %p169_p2 }
  0x2a   :  { %177 = shalt.err (!%p174_p4)
}
  0x2b   :  { %s178_s21 = scalar_lea.vmem %s40_s12, 16  ;;  %s182_s0 = scalar_lea.vmem %s40_s12, 32 }
  0x2c   :  { %p179_p5 = scmp.ne.s32.totalorder %s40_s12, %s178_s21  ;;  %p183_p6 = scmp.lt.s32.totalorder %s40_s12, %s40_s12 }
  0x2d   :  { %p184_p7 = scmp.lt.s32.totalorder %s182_s0, %s178_s21 }
  0x2f   :  { %p185_p8 = por %p184_p7, %p183_p6 }
  0x31   :  { %p186_p9 = pnand %p185_p8, %p179_p5 }
  0x33   :  { %189 = shalt.err (!%p186_p9)
}
  0x34   :  { %42 = dma.hbm_to_vmem [thread:$0]  %s301_s2, 16, %s40_s12, [#allocation6]  }
  0x35   :  { %212 = dma.done.wait [#allocation3], 32  }
  0x36   :  { %213 = vsyncadd [#allocation3], 4294967264 }
  0x37   :  { %214 = dma.done.wait [#allocation6], 32  }
  0x38   :  { %215 = vsyncadd [#allocation6], 4294967264  ;;  %v52_v0 = vld [vmem:[#allocation2] sm:$0x1]  ;;  %v53_v1 = vld [vmem:[#allocation2 + $0x1] sm:$0x1]  ;;  %v80_v16 = vlaneseq }
  0x39   :  { %v56_v2 = vld [vmem:[#allocation5] sm:$0x1]  ;;  %v54_v3 = vunpack.c.l.bf16 %v52_v0  ;;  %v55_v4 = vunpack.c.l.bf16 %v53_v1  ;;  %v59_v5 = vld [vmem:[#allocation7] sm:$0x1]  ;;  %s223_s2 = smov [#allocation8]   ;;  %vm88_vm0 = vcmask 1041409  }
  0x3a   :  { %v81_v17 = vshrl.u32 %v80_v16, 7  ;;  %s98_s23 = sshll.u32 %s223_s2, 4  ;;  %s99_s23 = int_to_ptr.vmem [resolvable:$true] %s98_s23 }
  0x3b   :  { %v57_v6 = vmul.f32 %v56_v2, %v54_v3  ;;  %v58_v7 = vmul.f32 %v56_v2, %v55_v4  ;;  %s190_s24 = scalar_lea.vmem %s99_s23, 32  ;;  %p195_p11 = scmp.lt.s32.totalorder %s99_s23, %s99_s23 }
  0x3c   :  { %v82_v18 = vsub.s32 0, %v81_v17  ;;  %p191_p10 = scmp.ne.s32.totalorder %s99_s23, %s190_s24  ;;  %p196_p12 = scmp.lt.s32.totalorder %s190_s24, %s190_s24 }
  0x3d   :  { %v60_v8 = vadd.f32 %v59_v5, %v57_v6  ;;  %v61_v9 = vadd.f32 %v59_v5, %v58_v7 }
  0x3e   :  { %p197_p13 = por %p196_p12, %p195_p11 }
  0x3f   :  { %v108_v10 = vmul.f32 -1.442695, %v60_v8  ;;  %v109_v11 = vmul.f32 -1.442695, %v61_v9 }
  0x40   :  { %p198_p0 = pnand %p197_p13, %p191_p10 }
  0x41   :  { %116 = vpow2.f32 %v108_v10 }
  0x42   :  { %118 = vpow2.f32 %v109_v11 }
  0x4b   :  { %v117_v12 = vpop.eup %116 }
  0x4c   :  { %v119_v13 = vpop.eup %118  ;;  %v68_v14 = vadd.f32 1.0, %v117_v12 }
  0x4d   :  { %v69_v15 = vadd.f32 1.0, %v119_v13 }
  0x4e   :  { %120 = vrcp.f32 %v68_v14 }
  0x4f   :  { %122 = vrcp.f32 %v69_v15 }
  0x58   :  { %v121_v19 = vpop.eup %120 }
  0x59   :  { %v123_v20 = vpop.eup %122  ;;  %v74_v21 = vmul.f32 %v121_v19, %v60_v8 }
  0x5a   :  { %v75_v22 = vmul.f32 %v123_v20, %v61_v9 }
  0x5b   :  { %v83_v23 = vrot.slane %v74_v21, %v82_v18 }
  0x5c   :  { %v87_v24 = vrot.slane %v75_v22, %v82_v18 }
  0x5e   :  { %v89_v25 = vsel %vm88_vm0, %v87_v24, %v83_v23 }
  0x5f   :  { %91 = vst [vmem:[#allocation8] sm:$0x3] %v89_v25 }
  0x60   :  { %201 = shalt.err (!%p198_p0)
}
  0x61   :  { %s202_s27 = scalar_lea.hbm %s302_s3, 32 }
  0x62   :  { %p203_p1 = scmp.ne.s32.totalorder %s302_s3, %s202_s27  ;;  %p206_p2 = scmp.lt.u32.totalorder %s202_s27, %s302_s3 }
  0x64   :  { %p208_p3 = pnand %p206_p2, %p203_p1 }
  0x66   :  { %211 = shalt.err (!%p208_p3)
}
  0x67   :  { %101 = dma.vmem_to_hbm [thread:$0]  %s99_s23, 32, %s302_s3, [#allocation4]  }
  0x68   :  { %216 = dma.done.wait [#allocation4], 32  }
  0x69   :  { %217 = vsyncadd [#allocation4], 4294967264 }
  0x6a   :  { %105 = vsyncpa [#allocation3], 1 }
  0x6b   :  { %106 = vsyncpa [#allocation6], 1 }
  0x6c   :  { %107 = vsyncpa [#allocation4], 1 }

// kernel: discriminator_forward.8
= control target key start
LH: loop header
LB: loop body
LE: loop exit
PB: predicated region body
PF: predicated region fallthrough
CT: control target
= control target key end

     0   :  { %12 = vsyncpa [#allocation5], 0  ;;  %s2099_s0 = inlined_call_operand.hbm [shape: bf16[4,2,2,2,64], index: 0, kind: input, shape index: {}]   ;;  %s2100_s1 = inlined_call_operand.hbm [shape: bf16[576,128], index: 1, kind: input, shape index: {}]   ;;  %s2101_s2 = inlined_call_operand.hbm [shape: f32[1,128], index: 2, kind: input, shape index: {}]   ;;  %s2102_s3 = inlined_call_operand.hbm [shape: f32[1,64], index: 3, kind: input, shape index: {}]   ;;  %s2103_s4 = inlined_call_operand.hbm [shape: f32[1,64], index: 4, kind: input, shape index: {}]   ;;  %s2104_s5 = inlined_call_operand.hbm [shape: bf16[2,128], index: 5, kind: output, shape index: {0}]   ;;  %s2105_s6 = inlined_call_operand.hbm [shape: f32[1,2,128], index: 6, kind: output, shape index: {1}]  }
   0x1   :  { %13 = vsyncpa [#allocation8], 0 }
   0x2   :  { %14 = vsyncpa [#allocation11], 0 }
   0x3   :  { %15 = vsyncpa [#allocation6], 0 }
   0x4   :  { %16 = vsyncpa [#allocation15], 0  ;;  %s1775_s21 = smov [#allocation7]   ;;  %s1611_s25 = scalar_lea.hbm %s2100_s1, 4608 }
   0x5   :  { %s34_s22 = sshll.u32 %s1775_s21, 4  ;;  %p1612_p0 = scmp.ne.s32.totalorder %s2100_s1, %s1611_s25  ;;  %s35_s22 = int_to_ptr.vmem [resolvable:$true] %s34_s22 }
   0x6   :  { %p1615_p1 = scmp.lt.u32.totalorder %s1611_s25, %s2100_s1 }
   0x8   :  { %p1617_p2 = pnand %p1615_p1, %p1612_p0 }
   0xa   :  { %1620 = shalt.err (!%p1617_p2)
}
   0xb   :  { %s1621_s30 = scalar_lea.vmem %s35_s22, 4608  ;;  %p1626_p4 = scmp.lt.s32.totalorder %s35_s22, %s35_s22 }
   0xc   :  { %p1622_p3 = scmp.ne.s32.totalorder %s35_s22, %s1621_s30  ;;  %p1627_p5 = scmp.lt.s32.totalorder %s1621_s30, %s1621_s30 }
   0xe   :  { %p1628_p6 = por %p1627_p5, %p1626_p4 }
  0x10   :  { %p1629_p7 = pnand %p1628_p6, %p1622_p3 }
  0x12   :  { %1632 = shalt.err (!%p1629_p7)
}
  0x13   :  { %s1776_s7 = smov 64   ;;  %s1777_s8 = smov 4  }
  0x14   :  { %40 = dma.hbm_to_vmem [thread:$0]  %s2100_s1, 4608, %s35_s22, [#allocation8], %s1776_s7, %s1776_s7, %s1777_s8  }
  0x15   :  { %s1778_s11 = smov [#allocation10]   ;;  %s1779_s13 = smov [#allocation4]  }
  0x16   :  { %s57_s12 = sshll.u32 %s1778_s11, 4  ;;  %s22_s14 = sshll.u32 %s1779_s13, 4  ;;  %s58_s12 = int_to_ptr.vmem [resolvable:$true] %s57_s12  ;;  %s23_s14 = int_to_ptr.vmem [resolvable:$true] %s22_s14 }
  0x17   :  { %s1633_s17 = scalar_lea.hbm %s2102_s3, 16 }
  0x18   :  { %p1634_p8 = scmp.ne.s32.totalorder %s2102_s3, %s1633_s17  ;;  %p1637_p9 = scmp.lt.u32.totalorder %s1633_s17, %s2102_s3 }
  0x1a   :  { %p1639_p10 = pnand %p1637_p9, %p1634_p8 }
  0x1c   :  { %1642 = shalt.err (!%p1639_p10)
}
  0x1d   :  { %s1643_s1 = scalar_lea.vmem %s58_s12, 16  ;;  %s1647_s22 = scalar_lea.vmem %s58_s12, 32 }
  0x1e   :  { %p1644_p11 = scmp.ne.s32.totalorder %s58_s12, %s1643_s1  ;;  %p1648_p12 = scmp.lt.s32.totalorder %s58_s12, %s58_s12 }
  0x1f   :  { %p1649_p13 = scmp.lt.s32.totalorder %s1647_s22, %s1643_s1 }
  0x21   :  { %p1650_p0 = por %p1649_p13, %p1648_p12 }
  0x23   :  { %p1651_p1 = pnand %p1650_p0, %p1644_p11 }
  0x25   :  { %1654 = shalt.err (!%p1651_p1)
}
  0x26   :  { %60 = dma.hbm_to_vmem [thread:$0]  %s2102_s3, 16, %s58_s12, [#allocation11]  }
  0x27   :  { %s1655_s27 = scalar_lea.hbm %s2099_s0, 256 }
  0x28   :  { %p1656_p2 = scmp.ne.s32.totalorder %s2099_s0, %s1655_s27  ;;  %p1659_p3 = scmp.lt.u32.totalorder %s1655_s27, %s2099_s0 }
  0x2a   :  { %p1661_p4 = pnand %p1659_p3, %p1656_p2 }
  0x2c   :  { %1664 = shalt.err (!%p1661_p4)
}
  0x2d   :  { %s1665_s9 = scalar_lea.vmem %s23_s14, 256  ;;  %p1670_p6 = scmp.lt.s32.totalorder %s23_s14, %s23_s14 }
  0x2e   :  { %p1666_p5 = scmp.ne.s32.totalorder %s23_s14, %s1665_s9  ;;  %p1671_p7 = scmp.lt.s32.totalorder %s1665_s9, %s1665_s9 }
  0x30   :  { %p1672_p8 = por %p1671_p7, %p1670_p6 }
  0x32   :  { %p1673_p9 = pnand %p1672_p8, %p1666_p5 }
  0x34   :  { %1676 = shalt.err (!%p1673_p9)
}
  0x35   :  { %s1780_s3 = smov 16   ;;  %s1781_s10 = smov 1  }
  0x36   :  { %28 = dma.hbm_to_vmem [thread:$0]  %s2099_s0, 256, %s23_s14, [#allocation5], %s1780_s3, %s1780_s3, %s1781_s10  }
  0x37   :  { %s1782_s13 = smov [#allocation9]   ;;  %s1783_s16 = smov [#allocation12]  }
  0x38   :  { %s47_s15 = sshll.u32 %s1782_s13, 4  ;;  %s67_s17 = sshll.u32 %s1783_s16, 4  ;;  %s48_s15 = int_to_ptr.vmem [resolvable:$true] %s47_s15  ;;  %s68_s17 = int_to_ptr.vmem [resolvable:$true] %s67_s17 }
  0x39   :  { %s1677_s20 = scalar_lea.hbm %s2101_s2, 16 }
  0x3a   :  { %p1678_p10 = scmp.ne.s32.totalorder %s2101_s2, %s1677_s20  ;;  %p1681_p11 = scmp.lt.u32.totalorder %s1677_s20, %s2101_s2 }
  0x3c   :  { %p1683_p12 = pnand %p1681_p11, %p1678_p10 }
  0x3e   :  { %1686 = shalt.err (!%p1683_p12)
}
  0x3f   :  { %s1687_s0 = scalar_lea.vmem %s48_s15, 16  ;;  %s1691_s14 = scalar_lea.vmem %s48_s15, 32 }
  0x40   :  { %p1688_p13 = scmp.ne.s32.totalorder %s48_s15, %s1687_s0  ;;  %p1692_p0 = scmp.lt.s32.totalorder %s48_s15, %s48_s15 }
  0x41   :  { %p1693_p1 = scmp.lt.s32.totalorder %s1691_s14, %s1687_s0 }
  0x43   :  { %p1694_p2 = por %p1693_p1, %p1692_p0 }
  0x45   :  { %p1695_p3 = pnand %p1694_p2, %p1688_p13 }
  0x47   :  { %1698 = shalt.err (!%p1695_p3)
}
  0x48   :  { %50 = dma.hbm_to_vmem [thread:$0]  %s2101_s2, 16, %s48_s15, [#allocation8]  }
  0x49   :  { %s1699_s28 = scalar_lea.hbm %s2103_s4, 16 }
  0x4a   :  { %p1700_p4 = scmp.ne.s32.totalorder %s2103_s4, %s1699_s28  ;;  %p1703_p5 = scmp.lt.u32.totalorder %s1699_s28, %s2103_s4 }
  0x4c   :  { %p1705_p6 = pnand %p1703_p5, %p1700_p4 }
  0x4e   :  { %1708 = shalt.err (!%p1705_p6)
}
  0x4f   :  { %s1709_s3 = scalar_lea.vmem %s68_s17, 16  ;;  %s1713_s10 = scalar_lea.vmem %s68_s17, 32 }
  0x50   :  { %p1710_p7 = scmp.ne.s32.totalorder %s68_s17, %s1709_s3  ;;  %p1714_p8 = scmp.lt.s32.totalorder %s68_s17, %s68_s17 }
  0x51   :  { %p1715_p9 = scmp.lt.s32.totalorder %s1713_s10, %s1709_s3 }
  0x53   :  { %p1716_p10 = por %p1715_p9, %p1714_p8 }
  0x55   :  { %p1717_p11 = pnand %p1716_p10, %p1710_p7 }
  0x57   :  { %1720 = shalt.err (!%p1717_p11)
}
  0x58   :  { %70 = dma.hbm_to_vmem [thread:$0]  %s2103_s4, 16, %s68_s17, [#allocation11]  }
  0x59   :  { %1765 = dma.done.wait [#allocation5], 256  }
  0x5a   :  { %1766 = vsyncadd [#allocation5], 4294967040 }
  0x5b   :  { %1767 = dma.done.wait [#allocation8], 4624  }
  0x5c   :  { %1768 = vsyncadd [#allocation8], 4294962672 }
  0x5d   :  { %1769 = dma.done.wait [#allocation11], 32  }
  0x5e   :  { %1770 = vsyncadd [#allocation11], 4294967264  ;;  %v89_v0 = vlaneseq  ;;  %v1887_v1 = vld [vmem:[#allocation10] ss:$0 sm:$0xff]  ;;  %v102_v3 = vld [vmem:[#allocation4 + $0x1] sm:$0x1] }
  0x5f   :  { %v104_v4 = vld [vmem:[#allocation4 + $0x3] sm:$0x1]  ;;  %v106_v5 = vunpack.c.l.bf16 %v102_v3  ;;  %v239_v6 = vld [vmem:[#allocation4 + $0x8] sm:$0x1]  ;;  %v240_v7 = vld [vmem:[#allocation4 + $0x9] sm:$0x1] }
  0x60   :  { %v1889_v2 = vshrl.u32 %v89_v0, 7  ;;  %v108_v8 = vunpack.c.l.bf16 %v104_v4  ;;  %v241_v9 = vld [vmem:[#allocation4 + $0xa] sm:$0x1]  ;;  %v242_v10 = vld [vmem:[#allocation4 + $0xb] sm:$0x1]  ;;  %v243_v11 = vunpack.c.l.bf16 %v239_v6  ;;  %v244_v12 = vunpack.c.l.bf16 %v240_v7  ;;  %v1510_v37 = vld [vmem:[#allocation7 + $0x40] sm:$0xff]  }
  0x61   :  { %v298_v13 = vld [vmem:[#allocation4 + $0xd] sm:$0x1]  ;;  %v1891_v14 = vld [vmem:[#allocation12] ss:$0 sm:$0xff]  ;;  %v245_v15 = vunpack.c.l.bf16 %v241_v9  ;;  %v246_v16 = vunpack.c.l.bf16 %v242_v10  ;;  %v300_v17 = vld [vmem:[#allocation4 + $0xf] sm:$0x1]  ;;  %v116_v19 = vmul.f32 %v1887_v1, %v106_v5  ;;  %1434 = vmatprep.subr.bf16.mxu0 %v1510_v37 }
  0x62   :  { %v302_v18 = vunpack.c.l.bf16 %v298_v13  ;;  %v247_v20 = vmul.f32 %v1887_v1, %v243_v11  ;;  %v248_v21 = vmul.f32 %v1887_v1, %v244_v12  ;;  %v304_v22 = vunpack.c.l.bf16 %v300_v17  ;;  %v181_v28 = vld [vmem:[#allocation4 + $0x4] sm:$0x1]  ;;  %v183_v29 = vld [vmem:[#allocation4 + $0x6] sm:$0x1]  ;;  %v182_v34 = vld [vmem:[#allocation4 + $0x5] sm:$0x1] }
  0x63   :  { %v118_v23 = vmul.f32 %v1887_v1, %v108_v8  ;;  %v249_v24 = vmul.f32 %v1887_v1, %v245_v15  ;;  %v250_v25 = vmul.f32 %v1887_v1, %v246_v16  ;;  %v1901_v27 = vadd.f32 %v1891_v14, %v116_v19  ;;  %v184_v35 = vld [vmem:[#allocation4 + $0x7] sm:$0x1]  ;;  %v297_v36 = vld [vmem:[#allocation4 + $0xc] sm:$0x1]  ;;  %v299_v42 = vld [vmem:[#allocation4 + $0xe] sm:$0x1] }
  0x64   :  { %v306_v26 = vmul.f32 %v1887_v1, %v302_v18  ;;  %v1904_v30 = vadd.f32 %v1891_v14, %v247_v20  ;;  %v252_v31 = vadd.f32 %v1891_v14, %v248_v21  ;;  %v308_v32 = vmul.f32 %v1887_v1, %v304_v22  ;;  %v1511_v43 = vld [vmem:[#allocation7] sm:$0xff]   ;;  %v1513_v58 = vld [vmem:[#allocation7 + $0x48] sm:$0xff]   ;;  %v1517_v12 = vld [vmem:[#allocation7 + $0x50] sm:$0xff]   ;;  %s1788_s4 = smov [#allocation13]  }
  0x65   :  { %v1909_v33 = vadd.f32 %v1891_v14, %v118_v23  ;;  %v1912_v38 = vadd.f32 %v1891_v14, %v249_v24  ;;  %v254_v39 = vadd.f32 %v1891_v14, %v250_v25  ;;  %v1362_v41 = vmul.f32 -1.442695, %v1901_v27  ;;  %v1512_v44 = vld [vmem:[#allocation7 + $0xc0] sm:$0xff]   ;;  %1435 = vmatpush3.bf16.msra.mxu0 %v1511_v43  ;;  %v1515_v4 = vld [vmem:[#allocation7 + $0x8] sm:$0xff]   ;;  %v1519_v22 = vld [vmem:[#allocation7 + $0x10] sm:$0xff]  }
  0x66   :  { %v310_v40 = vadd.f32 %v1891_v14, %v306_v26  ;;  %v1370_v45 = vmul.f32 -1.442695, %v1904_v30  ;;  %v1371_v46 = vmul.f32 -1.442695, %v252_v31  ;;  %v312_v47 = vadd.f32 %v1891_v14, %v308_v32  ;;  %1456 = vmatprep.subr.bf16.mxu1 %v1512_v44  ;;  %v1514_v62 = vld [vmem:[#allocation7 + $0x80] sm:$0xff]   ;;  %1436 = vmatprep.subr.bf16.mxu0 %v1513_v58  ;;  %v1516_v8 = vld [vmem:[#allocation7 + $0xc8] sm:$0xff]  }
  0x67   :  { %v1364_v48 = vmul.f32 -1.442695, %v1909_v33  ;;  %v1372_v49 = vmul.f32 -1.442695, %v1912_v38  ;;  %v1373_v50 = vmul.f32 -1.442695, %v254_v39  ;;  %1547 = vpow2.f32 %v1362_v41  ;;  %1457 = vmatpush3.bf16.msra.mxu1 %v1514_v62 }
  0x68   :  { %v1375_v51 = vmul.f32 -1.442695, %v310_v40  ;;  %1549 = vpow2.f32 %v1370_v45  ;;  %v1377_v52 = vmul.f32 -1.442695, %v312_v47  ;;  %v185_v53 = vunpack.c.l.bf16 %v181_v28  ;;  %1458 = vmatprep.subr.bf16.mxu1 %v1516_v8  ;;  %v1518_v21 = vld [vmem:[#allocation7 + $0x88] sm:$0xff]   ;;  %v1520_v26 = vld [vmem:[#allocation7 + $0xd0] sm:$0xff]  }
  0x69   :  { %v187_v54 = vunpack.c.l.bf16 %v183_v29  ;;  %1551 = vpow2.f32 %v1371_v46  ;;  %v186_v55 = vunpack.c.l.bf16 %v182_v34  ;;  %v188_v56 = vunpack.c.l.bf16 %v184_v35  ;;  %1437 = vmatpush3.bf16.msra.mxu0 %v1515_v4  ;;  %v1521_v31 = vld [vmem:[#allocation7 + $0x58] sm:$0xff]   ;;  %v1522_v35 = vld [vmem:[#allocation7 + $0x90] sm:$0xff]  }
  0x6a   :  { %v301_v57 = vunpack.c.l.bf16 %v297_v36  ;;  %1553 = vpow2.f32 %v1372_v49  ;;  %v189_v59 = vmul.f32 %v1887_v1, %v185_v53  ;;  %v303_v61 = vunpack.c.l.bf16 %v299_v42  ;;  %1438 = vmatprep.subr.bf16.mxu0 %v1517_v12  ;;  %v1523_v39 = vld [vmem:[#allocation7 + $0x18] sm:$0xff]   ;;  %v101_v40 = vld [vmem:[#allocation4] sm:$0x1]  ;;  %v103_v41 = vld [vmem:[#allocation4 + $0x2] sm:$0x1] }
  0x6b   :  { %v191_v60 = vmul.f32 %v1887_v1, %v187_v54  ;;  %1555 = vpow2.f32 %v1373_v50  ;;  %v190_v63 = vmul.f32 %v1887_v1, %v186_v55  ;;  %v192_v0 = vmul.f32 %v1887_v1, %v188_v56  ;;  %1459 = vmatpush3.bf16.msra.mxu1 %v1518_v21 }
  0x6c   :  { %v305_v3 = vmul.f32 %v1887_v1, %v301_v57  ;;  %1557 = vpow2.f32 %v1375_v51  ;;  %v1927_v5 = vadd.f32 %v1891_v14, %v189_v59  ;;  %v307_v7 = vmul.f32 %v1887_v1, %v303_v61  ;;  %1460 = vmatprep.subr.bf16.mxu1 %v1520_v26 }
  0x6d   :  { %v1930_v6 = vadd.f32 %v1891_v14, %v191_v60  ;;  %1559 = vpow2.f32 %v1377_v52  ;;  %v1934_v9 = vadd.f32 %v1891_v14, %v190_v63  ;;  %v1937_v10 = vadd.f32 %v1891_v14, %v192_v0  ;;  %1439 = vmatpush3.bf16.msra.mxu0 %v1519_v22 }
  0x6e   :  { %v1940_v11 = vadd.f32 %v1891_v14, %v305_v3  ;;  %1561 = vpow2.f32 %v1364_v48  ;;  %v1366_v13 = vmul.f32 -1.442695, %v1927_v5  ;;  %v1945_v16 = vadd.f32 %v1891_v14, %v307_v7  ;;  %1440 = vmatprep.subr.bf16.mxu0 %v1521_v31 }
  0x6f   :  { %v1368_v15 = vmul.f32 -1.442695, %v1930_v6  ;;  %v1367_v17 = vmul.f32 -1.442695, %v1934_v9  ;;  %v1369_v18 = vmul.f32 -1.442695, %v1937_v10  ;;  %1461 = vmatpush3.bf16.msra.mxu1 %v1522_v35  ;;  %v105_v44 = vunpack.c.l.bf16 %v101_v40 }
  0x70   :  { %v1374_v19 = vmul.f32 -1.442695, %v1940_v11  ;;  %vm91_vm0 = vcmp.ge.s32.totalorder %v1889_v2, 1  ;;  %1563 = vpow2.f32 %v1366_v13  ;;  %v1952_v20 = vmul.f32 -1.442695, %v1945_v16 }
  0x71   :  { %v1548_v23 = vpop.eup %1547  ;;  %1565 = vpow2.f32 %v1368_v15  ;;  %v107_v45 = vunpack.c.l.bf16 %v103_v41  ;;  %vm94_vm1 = vcmp.lt.s32.totalorder %v1889_v2, 2  ;;  %1441 = vmatpush3.bf16.msra.mxu0 %v1523_v39  ;;  %v115_v50 = vmul.f32 %v1887_v1, %v105_v44 }
  0x72   :  { %v1550_v24 = vpop.eup %1549  ;;  %v142_v25 = vadd.f32 1.0, %v1548_v23  ;;  %1567 = vpow2.f32 %v1367_v17  ;;  %vm96_vm2 = vmand %vm91_vm0, %vm94_vm1  ;;  %vm165_vm3 = vcmask 516096   ;;  %v1784_v63 = vmov 0.0  }
  0x73   :  { %v1552_v28 = vpop.eup %1551  ;;  %v267_v29 = vadd.f32 1.0, %v1550_v24  ;;  %1569 = vpow2.f32 %v1369_v18  ;;  %v117_v51 = vmul.f32 %v1887_v1, %v107_v45  ;;  %v1958_v54 = vadd.f32 %v1891_v14, %v115_v50 }
  0x74   :  { %v1554_v32 = vpop.eup %1553  ;;  %v268_v34 = vadd.f32 1.0, %v1552_v28  ;;  %1571 = vrcp.f32 %v142_v25  ;;  %v1358_v0 = vsel %vm96_vm2, 1.0, %v1784_v63  ;;  %v1785_v15 = vmov 1935823168  }
  0x75   :  { %v1556_v36 = vpop.eup %1555  ;;  %v269_v37 = vadd.f32 1.0, %v1554_v32  ;;  %1573 = vrcp.f32 %v267_v29  ;;  %v1961_v55 = vadd.f32 %v1891_v14, %v117_v51  ;;  %v1361_v59 = vmul.f32 -1.442695, %v1958_v54 }
  0x76   :  { %v1558_v42 = vpop.eup %1557  ;;  %v270_v43 = vadd.f32 1.0, %v1556_v36  ;;  %1575 = vrcp.f32 %v268_v34  ;;  %v366_v17 = vunpack.c.l.s4 %v1785_v15  ;;  %vm173_vm4 = vcmp.lt.s32.totalorder %v1889_v2, 1 }
  0x77   :  { %v1560_v46 = vpop.eup %1559  ;;  %1577 = vrcp.f32 %v269_v37  ;;  %v326_v47 = vadd.f32 1.0, %v1558_v42  ;;  %v1363_v60 = vmul.f32 -1.442695, %v1961_v55  ;;  %vm389_vm5 = vcmask 1041409  }
  0x78   :  { %v1562_v48 = vpop.eup %1561  ;;  %1579 = vrcp.f32 %v270_v43  ;;  %v328_v49 = vadd.f32 1.0, %v1560_v46  ;;  %v1985_v43 = vsel %vm173_vm4, 1.0, %v1784_v63  ;;  %v1786_v46 = vmov 1966171168  }
  0x79   :  { %1581 = vrcp.f32 %v326_v47  ;;  %v144_v52 = vadd.f32 1.0, %v1562_v48  ;;  %v393_v47 = vunpack.c.l.s4 %v1786_v46  ;;  %vm462_vm6 = vcmask 1040896  }
  0x7a   :  { %v1564_v53 = vpop.eup %1563  ;;  %1583 = vrcp.f32 %v328_v49  ;;  %vm1787_vm7 = vmmov 0   ;;  %vm1183_vm8 = vcmask 523264   ;;  %vm1309_vm9 = vcmask 1041408  }
  0x7b   :  { %v1566_v56 = vpop.eup %1565  ;;  %1585 = vrcp.f32 %v144_v52  ;;  %v209_v57 = vadd.f32 1.0, %v1564_v53 }
  0x7c   :  { %v1568_v58 = vpop.eup %1567  ;;  %v211_v1 = vadd.f32 1.0, %v1566_v56  ;;  %1587 = vpow2.f32 %v1374_v19 }
  0x7d   :  { %v1570_v61 = vpop.eup %1569  ;;  %1589 = vrcp.f32 %v209_v57  ;;  %v210_v14 = vadd.f32 1.0, %v1568_v58 }
  0x7e   :  { %v1572_v62 = vpop.eup %1571  ;;  %1591 = vrcp.f32 %v211_v1  ;;  %v212_v3 = vadd.f32 1.0, %v1570_v61  ;;  %v394_v61 = vunpack.c.0.s8 %v393_v47 }
  0x7f   :  { %v1574_v4 = vpop.eup %1573  ;;  %v154_v7 = vmul.f32 %v1572_v62, %v1901_v27  ;;  %1593 = vrcp.f32 %v210_v14 }
  0x80   :  { %v1576_v8 = vpop.eup %1575  ;;  %v279_v12 = vmul.f32 %v1574_v4, %v1904_v30  ;;  %1595 = vrcp.f32 %v212_v3  ;;  %v367_v30 = vunpack.c.0.s8 %v366_v17 }
  0x81   :  { %v1578_v13 = vpop.eup %1577  ;;  %v158_v18 = vmul.f32 %v1358_v0, %v154_v7  ;;  %1597 = vpow2.f32 %v1952_v20 }
  0x82   :  { %v1580_v19 = vpop.eup %1579  ;;  %v281_v21 = vmul.f32 %v1578_v13, %v1912_v38  ;;  %v283_v22 = vmul.f32 %v1358_v0, %v279_v12  ;;  %1599 = vpow2.f32 %v1361_v59  ;;  %v1981_v39 = vsub.s32 %v367_v30, %v1889_v2 }
  0x83   :  { %v1582_v23 = vpop.eup %1581  ;;  %v162_v24 = vpack.c.bf16 %v158_v18, %v158_v18  ;;  %1601 = vpow2.f32 %v1363_v60  ;;  %v2002_v13 = vsub.s32 %v394_v61, %v1889_v2  ;;  %v1524_v2 = vld [vmem:[#allocation7 + $0xd8] sm:$0xff]  }
  0x84   :  { %v1584_v27 = vpop.eup %1583  ;;  %v285_v25 = vmul.f32 %v1358_v0, %v281_v21  ;;  %v287_v26 = vpack.c.bf16 %v283_v22, %v283_v22  ;;  %1462 = vmatprep.subr.bf16.mxu1 %v1524_v2  ;;  %v1540_v2 = vld [vmem:[#allocation7 + $0xf8] sm:$0xff]  }
  0x85   :  { %v1586_v28 = vpop.eup %1585  ;;  %167 = vst.msk [vmem:[#allocation3 + $0x1] sm:$0x1] %vm165_vm3, %v162_v24 }
  0x86   :  { %v1588_v29 = vpop.eup %1587  ;;  %v289_v31 = vpack.c.bf16 %v285_v25, %v285_v25  ;;  %292 = vst.msk [vmem:[#allocation3 + $0x8] sm:$0x1] %vm165_vm3, %v287_v26  ;;  %v156_v20 = vmul.f32 %v1586_v28, %v1909_v33 }
  0x87   :  { %v1590_v38 = vpop.eup %1589  ;;  %v325_v32 = vadd.f32 1.0, %v1588_v29 }
  0x88   :  { %v1592_v34 = vpop.eup %1591  ;;  %294 = vst.msk [vmem:[#allocation3 + $0xa] sm:$0x1] %vm165_vm3, %v289_v31  ;;  %v160_v35 = vmul.f32 %v1358_v0, %v156_v20  ;;  %v221_v36 = vmul.f32 %v1590_v38, %v1927_v5  ;;  %v1525_v38 = vld [vmem:[#allocation7 + $0x60] sm:$0xff]  }
  0x89   :  { %v1594_v37 = vpop.eup %1593  ;;  %v223_v40 = vmul.f32 %v1592_v34, %v1930_v6  ;;  %1603 = vrcp.f32 %v325_v32  ;;  %1442 = vmatprep.subr.bf16.mxu0 %v1525_v38 }
  0x8a   :  { %v1596_v41 = vpop.eup %1595  ;;  %v164_v42 = vpack.c.bf16 %v160_v35, %v160_v35  ;;  %v225_v33 = vmul.f32 0.0, %v221_v36  ;;  %v222_v44 = vmul.f32 %v1594_v37, %v1934_v9 }
  0x8b   :  { %v1598_v45 = vpop.eup %1597  ;;  %v227_v48 = vmul.f32 0.0, %v223_v40  ;;  %v224_v5 = vmul.f32 %v1596_v41, %v1937_v10  ;;  %v1527_v41 = vld [vmem:[#allocation7 + $0x20] sm:$0xff]  }
  0x8c   :  { %v1600_v49 = vpop.eup %1599  ;;  %169 = vst.msk [vmem:[#allocation3 + $0x3] sm:$0x1] %vm165_vm3, %v164_v42  ;;  %v1394_v50 = vld.sshfl [vmem:[#allocation3 + $0x1] sm:$0x1 pattern:$0x73625140]  ;;  %v229_v6 = vpack.c.bf16 %v225_v33, %v225_v33  ;;  %v226_v51 = vmul.f32 %v1985_v43, %v222_v44  ;;  %1443 = vmatpush3.bf16.msra.mxu0 %v1527_v41 }
  0x8d   :  { %v327_v52 = vadd.f32 1.0, %v1598_v45  ;;  %v1602_v53 = vpop.eup %1601  ;;  %v1388_v56 = vld.sshfl [vmem:[#allocation3 + $0x8] sm:$0x1 pattern:$0x73625140]  ;;  %v807_v57 = vrot.slane %v1394_v50, %v1981_v39  ;;  %v231_v58 = vpack.c.bf16 %v227_v48, %v227_v48  ;;  %v228_v9 = vmul.f32 %v1985_v43, %v224_v5  ;;  %v1528_v50 = vld [vmem:[#allocation7 + $0xe0] sm:$0xff]  }
  0x8e   :  { %v141_v1 = vadd.f32 1.0, %v1600_v49  ;;  %v642_v59 = vrot.slane %v1388_v56, %v1981_v39  ;;  %234 = vst.msk [vmem:[#allocation3 + $0x4] sm:$0x1] %vm165_vm3, %v229_v6  ;;  %v230_v10 = vpack.c.bf16 %v226_v51, %v226_v51  ;;  %v143_v60 = vadd.f32 1.0, %v1602_v53  ;;  %v1529_v53 = vld [vmem:[#allocation7 + $0x68] sm:$0xff]   ;;  %v1530_v56 = vld [vmem:[#allocation7 + $0xa0] sm:$0xff]  }
  0x8f   :  { %1605 = vrcp.f32 %v327_v52  ;;  %v1389_v14 = vld.sshfl [vmem:[#allocation3 + $0xa] sm:$0x1 pattern:$0x73625140]  ;;  %v1995_v62 = vunpack.c.l.b16 %v807_v57  ;;  %236 = vst.msk [vmem:[#allocation3 + $0x6] sm:$0x1] %vm165_vm3, %v231_v58  ;;  %v232_v0 = vpack.c.bf16 %v228_v9, %v228_v9  ;;  %1444 = vmatprep.subr.bf16.mxu0 %v1529_v53 }
  0x90   :  { %1607 = vrcp.f32 %v141_v1  ;;  %v656_v3 = vrot.slane %v1389_v14, %v1981_v39  ;;  %v657_v4 = vunpack.c.l.b16 %v642_v59  ;;  %235 = vst.msk [vmem:[#allocation3 + $0x5] sm:$0x1] %vm165_vm3, %v230_v10  ;;  %v1531_v57 = vld [vmem:[#allocation7 + $0x28] sm:$0xff]   ;;  %v1533_v10 = vld [vmem:[#allocation7 + $0x70] sm:$0xff]  }
  0x91   :  { %1609 = vrcp.f32 %v143_v60  ;;  %237 = vst.msk [vmem:[#allocation3 + $0x7] sm:$0x1] %vm165_vm3, %v232_v0  ;;  %v824_v17 = vrot.slane %v1995_v62, 1  ;;  %v1532_v59 = vld [vmem:[#allocation7 + $0xe8] sm:$0xff]   ;;  %1445 = vmatpush3.bf16.msra.mxu0 %v1531_v57 }
  0x92   :  { %v658_v7 = vunpack.c.l.b16 %v656_v3  ;;  %v659_v8 = vrot.slane %v657_v4, 1  ;;  %1446 = vmatprep.subr.bf16.mxu0 %v1533_v10 }
  0x93   :  { %v1604_v12 = vpop.eup %1603  ;;  %v1395_v15 = vld.sshfl [vmem:[#allocation3 + $0x3] sm:$0x1 pattern:$0x73625140] }
  0x94   :  { %v660_v18 = vsel %vm389_vm5, %v658_v7, %v659_v8  ;;  %v821_v19 = vrot.slane %v1395_v15, %v1981_v39  ;;  %v337_v21 = vmul.f32 %v1604_v12, %v1940_v11  ;;  %v551_v22 = vrot.slane %v658_v7, 7  ;;  %v1526_v11 = vld [vmem:[#allocation7 + $0x98] sm:$0xff]   ;;  %v1535_v8 = vld [vmem:[#allocation7 + $0x30] sm:$0xff]  }
  0x95   :  { %v661_v23 = vpack.c.b16 %v660_v18, %v660_v18  ;;  %v1380_v24 = vld.sshfl [vmem:[#allocation3 + $0x4] sm:$0x1 pattern:$0x73625140]  ;;  %1463 = vmatpush3.bf16.msra.mxu1 %v1526_v11  ;;  %v1536_v12 = vld [vmem:[#allocation7 + $0xf0] sm:$0xff]   ;;  %1447 = vmatpush3.bf16.msra.mxu0 %v1535_v8 }
  0x96   :  { %v823_v27 = vunpack.c.l.b16 %v821_v19  ;;  %v1381_v25 = vld.sshfl [vmem:[#allocation3 + $0x6] sm:$0x1 pattern:$0x73625140]  ;;  %v425_v26 = vrot.slane %v1380_v24, %v1981_v39  ;;  %v341_v28 = vmul.f32 %v1985_v43, %v337_v21  ;;  %v2013_v20 = vsel %vm389_vm5, %v551_v22, %v657_v4  ;;  %1464 = vmatprep.subr.bf16.mxu1 %v1528_v50  ;;  %v1538_v24 = vld [vmem:[#allocation7 + $0xb0] sm:$0xff]  }
  0x97   :  { %v668_v30 = vrot.slane %v661_v23, %v2002_v13  ;;  %v439_v29 = vrot.slane %v1381_v25, %v1981_v39  ;;  %v1392_v31 = vld.sshfl [vmem:[#allocation3 + $0x5] sm:$0x1 pattern:$0x73625140]  ;;  %v553_v5 = vpack.c.b16 %v2013_v20, %v2013_v20 }
  0x98   :  { %v825_v34 = vsel %vm389_vm5, %v823_v27, %v824_v17  ;;  %v440_v35 = vunpack.c.l.b16 %v425_v26  ;;  %v345_v36 = vpack.c.bf16 %v341_v28, %v341_v28  ;;  %v1393_v37 = vld.sshfl [vmem:[#allocation3 + $0x7] sm:$0x1 pattern:$0x73625140]  ;;  %v752_v40 = vrot.slane %v1392_v31, %v1981_v39  ;;  %v1537_v17 = vld [vmem:[#allocation7 + $0x78] sm:$0xff]  }
  0x99   :  { %v1606_v32 = vpop.eup %1605  ;;  %v675_v33 = vrot.slane %v668_v30, %v2002_v13  ;;  %v826_v44 = vpack.c.b16 %v825_v34, %v825_v34  ;;  %v441_v45 = vunpack.c.l.b16 %v439_v29  ;;  %v766_v48 = vrot.slane %v1393_v37, %v1981_v39  ;;  %1465 = vmatpush3.bf16.msra.mxu1 %v1530_v56  ;;  %v1539_v28 = vld [vmem:[#allocation7 + $0x38] sm:$0xff]   ;;  %1448 = vmatprep.subr.bf16.mxu0 %v1537_v17  ;;  %v1396_v17 = vld [vmem:[#allocation9] ss:$0 sm:$0xff] }
  0x9a   :  { %v1608_v42 = vpop.eup %1607  ;;  %v339_v46 = vmul.f32 %v1606_v32, %v1945_v16  ;;  %350 = vst.msk [vmem:[#allocation3 + $0xc] sm:$0x1] %vm165_vm3, %v345_v36  ;;  %v715_v52 = vrot.slane %v823_v27, 7  ;;  %v767_v58 = vunpack.c.l.b16 %v752_v40  ;;  %1466 = vmatprep.subr.bf16.mxu1 %v1532_v59  ;;  %v560_v21 = vrot.slane %v553_v5, %v2002_v13  ;;  %1449 = vmatpush3.bf16.msra.mxu0 %v1539_v28  ;;  %v1542_v34 = vld [vmem:[#allocation7 + $0xb8] sm:$0xff]  }
  0x9b   :  { %v1610_v47 = vpop.eup %1609  ;;  %v153_v49 = vmul.f32 %v1608_v42, %v1958_v54  ;;  %676 = vrot.lane.b32.xlu1 %v675_v33, %s1776_s7  ;;  %v442_v6 = vrot.slane %v441_v45, 7  ;;  %v768_v9 = vunpack.c.l.b16 %v766_v48  ;;  %v833_v54 = vrot.slane %v826_v44, %v2002_v13  ;;  %1483 = vmatprep.subr.bf16.mxu0 %v1784_v63 }
  0x9c   :  { %v343_v51 = vmul.f32 %v1985_v43, %v339_v46  ;;  %v155_v16 = vmul.f32 %v1610_v47, %v1961_v55  ;;  %v716_v43 = vsel %vm389_vm5, %v715_v52, %v1995_v62  ;;  %v1534_v55 = vld [vmem:[#allocation7 + $0xa8] sm:$0xff]   ;;  %v567_v29 = vrot.slane %v560_v21, %v2002_v13 }
  0x9d   :  { %v157_v1 = vmul.f32 0.0, %v153_v49  ;;  %v443_v60 = vsel %vm389_vm5, %v442_v6, %v440_v35  ;;  %v769_v3 = vrot.slane %v768_v9, 7  ;;  %v717_v7 = vpack.c.b16 %v716_v43, %v716_v43  ;;  %1467 = vmatpush3.bf16.msra.mxu1 %v1534_v55 }
  0x9e   :  { %v347_v61 = vpack.c.bf16 %v343_v51, %v343_v51  ;;  %v159_v14 = vmul.f32 0.0, %v155_v16  ;;  %v444_v0 = vpack.c.b16 %v443_v60, %v443_v60  ;;  %v840_v18 = vrot.slane %v833_v54, %v2002_v13  ;;  %1468 = vmatprep.subr.bf16.mxu1 %v1536_v12 }
  0x9f   :  { %v161_v4 = vpack.c.bf16 %v157_v1, %v157_v1  ;;  %v770_v19 = vsel %vm389_vm5, %v769_v3, %v767_v58  ;;  %v724_v22 = vrot.slane %v717_v7, %v2002_v13  ;;  %v1545_v3 = vld [vmem:[#allocation7 + $0x110] sm:$0xff]   ;;  %v1546_v7 = vld [vmem:[#allocation7 + $0x118] sm:$0xff]  }
  0xa0   :  { %352 = vst.msk [vmem:[#allocation3 + $0xe] sm:$0x1] %vm165_vm3, %v347_v61  ;;  %v163_v15 = vpack.c.bf16 %v159_v14, %v159_v14  ;;  %v451_v62 = vrot.slane %v444_v0, %v2002_v13  ;;  %v771_v23 = vpack.c.b16 %v770_v19, %v770_v19  ;;  %842 = vst.msk [vmem:[#allocation2 + $0x4] sm:$0x1] %vm165_vm3, %v840_v18  ;;  %v1543_v14 = vld [vmem:[#allocation7 + $0x100] sm:$0xff]   ;;  %v1544_v0 = vld [vmem:[#allocation7 + $0x108] sm:$0xff]  }
  0xa1   :  { %166 = vst.msk [vmem:[#allocation3] sm:$0x1] %vm165_vm3, %v161_v4  ;;  %v1386_v25 = vld.sshfl [vmem:[#allocation3 + $0xc] sm:$0x1 pattern:$0x73625140]  ;;  %v731_v26 = vrot.slane %v724_v22, %v2002_v13  ;;  %1469 = vmatpush3.bf16.msra.mxu1 %v1538_v24 }
  0xa2   :  { %168 = vst.msk [vmem:[#allocation3 + $0x2] sm:$0x1] %vm165_vm3, %v163_v15  ;;  %v458_v27 = vrot.slane %v451_v62, %v2002_v13  ;;  %v778_v30 = vrot.slane %v771_v23, %v2002_v13  ;;  %v589_v20 = vrot.slane %v1386_v25, %v1981_v39  ;;  %1470 = vmatprep.subr.bf16.mxu1 %v1540_v2 }
  0xa3   :  { %733 = vst.msk [vmem:[#allocation2 + $0x3] sm:$0x1] %vm165_vm3, %v731_v26 }
  0xa4   :  { %459 = vrot.lane.b32.xlu0 %v458_v27, %s1776_s7  ;;  %v785_v31 = vrot.slane %v778_v30, %v2002_v13  ;;  %v604_v37 = vunpack.c.l.b16 %v589_v20 }
  0xa5   :  { %1471 = vmatpush3.bf16.msra.mxu1 %v1542_v34 }
  0xa6   :  { %786 = vrot.lane.b32.xlu1 %v785_v31, %s1776_s7 }
  0xa7   :  { %v1387_v38 = vld.sshfl [vmem:[#allocation3 + $0xe] sm:$0x1 pattern:$0x73625140] }
  0xa8   :  { %v603_v11 = vrot.slane %v1387_v38, %v1981_v39  ;;  %v1378_v32 = vld.sshfl [vmem:[#allocation3] sm:$0x1 pattern:$0x73625140]  ;;  %568 = vrot.lane.b32.xlu0 %v567_v29, %s1776_s7  ;;  %s1333_s7 = sshll.u32 %s1788_s4, 4  ;;  %s1334_s7 = int_to_ptr.vmem [resolvable:$true] %s1333_s7 }
  0xa9   :  { %v1379_v35 = vld.sshfl [vmem:[#allocation3 + $0x2] sm:$0x1 pattern:$0x73625140]  ;;  %v371_v36 = vrot.slane %v1378_v32, %v1981_v39  ;;  %s1721_s12 = scalar_lea.vmem %s1334_s7, 16  ;;  %s1725_s13 = scalar_lea.vmem %s1334_s7, 32 }
  0xaa   :  { %v605_v40 = vunpack.c.l.b16 %v603_v11  ;;  %v385_v41 = vrot.slane %v1379_v35, %v1981_v39  ;;  %p1722_p12 = scmp.ne.s32.totalorder %s1334_s7, %s1721_s12  ;;  %p1726_p13 = scmp.lt.s32.totalorder %s1334_s7, %s1334_s7 }
  0xab   :  { %v386_v42 = vunpack.c.l.b16 %v371_v36  ;;  %p1727_p0 = scmp.lt.s32.totalorder %s1725_s13, %s1721_s12 }
  0xac   :  { %v606_v33 = vrot.slane %v605_v40, 7  ;;  %v387_v44 = vunpack.c.l.b16 %v385_v41 }
  0xad   :  { %v498_v45 = vrot.slane %v386_v42, 1  ;;  %p1728_p1 = por %p1727_p0, %p1726_p13 }
  0xae   :  { %v607_v46 = vsel %vm389_vm5, %v606_v33, %v604_v37  ;;  %v388_v47 = vrot.slane %v387_v44, 7 }
  0xaf   :  { %v608_v48 = vpack.c.b16 %v607_v46, %v607_v46  ;;  %v499_v5 = vsel %vm389_vm5, %v387_v44, %v498_v45  ;;  %p1729_p2 = pnand %p1728_p1, %p1722_p12 }
  0xb0   :  { %v390_v49 = vsel %vm389_vm5, %v388_v47, %v386_v42  ;;  %v500_v50 = vpack.c.b16 %v499_v5, %v499_v5 }
  0xb1   :  { %v615_v6 = vrot.slane %v608_v48, %v2002_v13  ;;  %v391_v51 = vpack.c.b16 %v390_v49, %v390_v49 }
  0xb2   :  { %v507_v16 = vrot.slane %v500_v50, %v2002_v13 }
  0xb3   :  { %v622_v39 = vrot.slane %v615_v6, %v2002_v13  ;;  %v398_v52 = vrot.slane %v391_v51, %v2002_v13 }
  0xb4   :  { %v514_v53 = vrot.slane %v507_v16, %v2002_v13 }
  0xb5   :  { %624 = vst.msk [vmem:[#allocation2 + $0x2] sm:$0x1] %vm165_vm3, %v622_v39  ;;  %v405_v56 = vrot.slane %v398_v52, %v2002_v13 }
  0xb6   :  { %516 = vst.msk [vmem:[#allocation2 + $0x1] sm:$0x1] %vm165_vm3, %v514_v53 }
  0xb7   :  { %407 = vst.msk [vmem:[#allocation2] sm:$0x1] %vm165_vm3, %v405_v56 }
 0x10d   :  { %v677_v57 = vpop.permute.xlu1 %676 }
 0x10e   :  { %679 = vst.msk [vmem:[#allocation2 + $0x2] sm:$0x1] %vm462_vm6, %v677_v57 }
 0x116   :  { %v460_v58 = vpop.permute.xlu0 %459 }
 0x117   :  { %463 = vst.msk [vmem:[#allocation2] sm:$0x1] %vm462_vm6, %v460_v58 }
 0x118   :  { %v787_v9 = vpop.permute.xlu1 %786 }
 0x119   :  { %789 = vst.msk [vmem:[#allocation2 + $0x3] sm:$0x1] %vm462_vm6, %v787_v9 }
 0x11a   :  { %v569_v1 = vpop.permute.xlu0 %568 }
 0x11b   :  { %571 = vst.msk [vmem:[#allocation2 + $0x1] sm:$0x1] %vm462_vm6, %v569_v1 }
 0x122   :  { %v843_v59 = vld [vmem:[#allocation2] sm:$0x1f] }
 0x123   :  { %v931_v10 = vrot.slane %v843_v59, %v2002_v13  ;;  %v924_v4 = vcombine.high %v843_v59, %v843_v59 }
 0x125   :  { %v939_v54 = vcombine.high %v931_v10, %v931_v10  ;;  %v946_v60 = vrot.slane %v931_v10, %v2002_v13  ;;  %v938_v8 = vrot.slane %v924_v4, %v2002_v13 }
 0x127   :  { %v960_v61 = vrot.slane %v939_v54, %v2002_v13  ;;  %v961_v55 = vcombine.high %v946_v60, %v946_v60  ;;  %v953_v12 = vrot.slane %v938_v8, %v2002_v13 }
 0x129   :  { %1219 = vmatprep.mubr.bf16.mxu0 %v960_v61  ;;  %v962_v43 = vcombine.high %v960_v61, %v960_v61 }
 0x12a   :  { %1220 = vmatmul.mubr.bf16.vlgmr.msra.gmra.mrb[0].mxu0 %v946_v60 }
 0x12b   :  { %1484 = vmatpush3.bf16.msra.mxu0 %v1543_v14  ;;  %1259 = vmatprep.mubr.bf16.mxu1 %v962_v43 }
 0x12c   :  { %1260 = vmatmul.mubr.bf16.vlgmr.msra.gmra.mrb[0].mxu1 %v961_v55  ;;  %1485 = vmatprep.subr.bf16.mxu0 %v1784_v63 }
 0x12d   :  { %1491 = vmatprep.mubr.msk.bf16.mxu0 %vm1787_vm7, %v1784_v63 }
 0x12f   :  { %1486 = vmatpush3.bf16.msra.mxu0 %v1544_v0 }
 0x130   :  { %1487 = vmatprep.subr.bf16.mxu0 %v1784_v63 }
 0x133   :  { %1488 = vmatpush3.bf16.msra.mxu0 %v1545_v3 }
 0x134   :  { %1489 = vmatprep.subr.bf16.mxu0 %v1784_v63 }
 0x137   :  { %1490 = vmatpush3.bf16.msra.mxu0 %v1546_v7 }
 0x13a   :  { %1492 = vmatmul.mubr.msk.bf16.vlgmr.msra.gmra.mrb[4].mxu0 %vm1183_vm8, %v953_v12 }
 0x1fd   :  { %v1450_v15 = vpop.f32.mrb[0].mxu0 }
 0x1fe   :  { %v1451_v18 = vpop.f32.mrb[1].mxu0 }
 0x1ff   :  { %v1452_v62 = vadd.f32 %v1451_v18, %v1450_v15  ;;  %v1453_v19 = vpop.f32.mrb[2].mxu0  ;;  %v1472_v21 = vpop.f32.mrb[0].mxu1 }
 0x200   :  { %v1454_v22 = vpop.f32.mrb[3].mxu0  ;;  %v1473_v23 = vpop.f32.mrb[1].mxu1 }
 0x201   :  { %v1222_v24 = vadd.f32 %v1452_v62, %v1396_v17  ;;  %v1474_v27 = vadd.f32 %v1473_v23, %v1472_v21  ;;  %v1475_v25 = vpop.f32.mrb[2].mxu1 }
 0x202   :  { %v1476_v26 = vpop.f32.mrb[3].mxu1 }
 0x203   :  { %v1262_v28 = vadd.f32 %v1474_v27, %v1222_v24 }
 0x20d   :  { %v1301_v2 = vpop.f32.mrb[4].mxu0 }
 0x20e   :  { %v1302_v63 = vadd.f32 %v1301_v2, %v1262_v28  ;;  %v1493_v13 = vpop.f32.mrb[5].mxu0 }
 0x20f   :  { %v1304_v30 = vpop.f32.mrb[6].mxu0 }
 0x210   :  { %v1310_v29 = vsel %vm1309_vm9, %v1302_v63, 0.0  ;;  %v1318_v31 = vmul.f32 %v1302_v63, %v1302_v63  ;;  %v1494_v20 = vpop.f32.mrb[7].mxu0  ;;  %v1307_v38 = vpack.c.bf16 %v1302_v63, %v1302_v63 }
 0x211   :  { %v1311_v11 = vrot.slane %v1310_v29, 4 }
 0x212   :  { %v1319_v32 = vsel %vm1309_vm9, %v1318_v31, 0.0  ;;  %1308 = vst [vmem:[#allocation13] sm:$0x1] %v1307_v38 }
 0x213   :  { %v1312_v34 = vadd.f32 %v1311_v11, %v1310_v29  ;;  %v1320_v35 = vrot.slane %v1319_v32, 4 }
 0x214   :  { %1732 = shalt.err (!%p1729_p2)
}
 0x215   :  { %s1733_s17 = scalar_lea.hbm %s2104_s5, 16 }
 0x216   :  { %p1734_p3 = scmp.ne.s32.totalorder %s2104_s5, %s1733_s17  ;;  %p1737_p4 = scmp.lt.u32.totalorder %s1733_s17, %s2104_s5 }
 0x218   :  { %p1739_p5 = pnand %p1737_p4, %p1734_p3 }
 0x21a   :  { %1742 = shalt.err (!%p1739_p5)
}
 0x21b   :  { %1336 = dma.vmem_to_hbm [thread:$0]  %s1334_s7, 16, %s2104_s5, [#allocation6]   ;;  %v1313_v36 = vrot.slane %v1312_v34, 2  ;;  %v1321_v37 = vadd.f32 %v1320_v35, %v1319_v32 }
 0x21c   :  { %s1789_s23 = smov [#allocation14]  }
 0x21d   :  { %v1314_v40 = vadd.f32 %v1313_v36, %v1312_v34  ;;  %v1322_v41 = vrot.slane %v1321_v37, 2  ;;  %s1343_s0 = sshll.u32 %s1789_s23, 4  ;;  %s1344_s0 = int_to_ptr.vmem [resolvable:$true] %s1343_s0 }
 0x21e   :  { %s1743_s14 = scalar_lea.vmem %s1344_s0, 32  ;;  %p1748_p7 = scmp.lt.s32.totalorder %s1344_s0, %s1344_s0 }
 0x21f   :  { %v1315_v42 = vrot.slane %v1314_v40, 1  ;;  %v1323_v33 = vadd.f32 %v1322_v41, %v1321_v37  ;;  %p1744_p6 = scmp.ne.s32.totalorder %s1344_s0, %s1743_s14  ;;  %p1749_p8 = scmp.lt.s32.totalorder %s1743_s14, %s1743_s14 }
 0x221   :  { %v1316_v44 = vadd.f32 %v1315_v42, %v1314_v40  ;;  %v1324_v45 = vrot.slane %v1323_v33, 1  ;;  %p1750_p9 = por %p1749_p8, %p1748_p7 }
 0x223   :  { %1317 = vst [vmem:[#allocation14] sm:$0x1] %v1316_v44  ;;  %v1325_v46 = vadd.f32 %v1324_v45, %v1323_v33  ;;  %p1751_p10 = pnand %p1750_p9, %p1744_p6 }
 0x225   :  { %1326 = vst [vmem:[#allocation14 + $0x1] sm:$0x1] %v1325_v46 }
 0x226   :  { %1754 = shalt.err (!%p1751_p10)
}
 0x227   :  { %s1755_s25 = scalar_lea.hbm %s2105_s6, 32 }
 0x228   :  { %p1756_p11 = scmp.ne.s32.totalorder %s2105_s6, %s1755_s25  ;;  %p1759_p12 = scmp.lt.u32.totalorder %s1755_s25, %s2105_s6 }
 0x22a   :  { %p1761_p13 = pnand %p1759_p12, %p1756_p11 }
 0x22c   :  { %1764 = shalt.err (!%p1761_p13)
}
 0x22d   :  { %1346 = dma.vmem_to_hbm [thread:$0]  %s1344_s0, 32, %s2105_s6, [#allocation15]  }
 0x22e   :  { %1771 = dma.done.wait [#allocation6], 16  }
 0x22f   :  { %1772 = vsyncadd [#allocation6], 4294967280 }
 0x230   :  { %1773 = dma.done.wait [#allocation15], 32  }
 0x231   :  { %1774 = vsyncadd [#allocation15], 4294967264 }
 0x232   :  { %1353 = vsyncpa [#allocation5], 1 }
 0x233   :  { %1354 = vsyncpa [#allocation8], 1 }
 0x234   :  { %1355 = vsyncpa [#allocation11], 1 }
 0x235   :  { %1356 = vsyncpa [#allocation6], 1 }
 0x236   :  { %1357 = vsyncpa [#allocation15], 1 }

</bundles_post_ra>
